<compile_context>
chip_gen: v5e
topology: v5e:2x2
jax: 0.10.0
libtpu: 0.0.40
codegen_flags: <defaults>
</compile_context>

<pallas_src>
import functools

import jax
import jax.numpy as jnp
from jax.experimental import pallas as pl
from jax.experimental.pallas import tpu as pltpu

EPS = 1e-5


def _round_up(v, m):
    return (v + m - 1) // m * m


# ------------------------------ Pallas kernels ------------------------------ #

def _stats_kernel(x_ref, s_ref, q_ref):
    # x_ref: (1, C, LIN).  Pad / tail lanes were built with jnp.pad and are exactly
    # zero, so they contribute nothing to sum or sum-of-squares.
    x = x_ref[0]
    s_ref[0] = jnp.sum(x, axis=1, keepdims=True)
    q_ref[0] = jnp.sum(x * x, axis=1, keepdims=True)


def _rot(x, k):
    """out[:, p] = x[:, (p + k) % L] -- explicit, sign-unambiguous lane rotation."""
    L = x.shape[-1]
    kk = k % L
    if kk == 0:
        return x
    return jnp.concatenate([x[:, kk:], x[:, :kk]], axis=1)


def _sigmoid(x):
    # Exact sigmoid with a single EUP transcendental (no approx reciprocal).
    return 0.5 * jnp.tanh(0.5 * x) + 0.5


def _conv_kernel(x_ref, w_ref, b_ref, sc_ref, sh_ref, m_ref, *rest,
                 S, H, W, Cin, fuse_pool_upsample):
    # x_ref : (1, Cin, LIN) f32   zero-padded plane, lane-flattened (rows stride S)
    # w_ref : (2, Cout, 9*Cin) bf16   [hi, lo] split of the tap-stacked weights
    # b_ref : (Cout, 1)   sc_ref/sh_ref : (Cin, 1)   m_ref : (1, LIN) real-pixel mask
    if fuse_pool_upsample:
        par_ref, o_ref, psum_ref, psq_ref, stk_ref = rest
    else:
        par_ref = None
        o_ref, psum_ref, psq_ref, stk_ref = rest

    L = H * S
    x = x_ref[0]                                          # (Cin, LIN)
    m = m_ref[...]                                        # (1, LIN)
    # Folded BatchNorm affine.  The select keeps zero-pad positions (and any
    # never-written garbage lanes of the previous stage's output) exactly zero.
    xn = jnp.where(m != 0.0, x * sc_ref[...] + sh_ref[...], 0.0)

    # Stack the 9 lane-shifted taps into one (9*Cin, L) operand so the MXU does a
    # single deep contraction instead of 9 shallow (K = Cin) pushes of the same RHS.
    for di in range(3):
        for dj in range(3):
            t = 3 * di + dj
            off = di * S + dj
            stk_ref[t * Cin:(t + 1) * Cin, :] = xn[:, off:off + L]
    xs = stk_ref[...]
    x_hi = xs.astype(jnp.bfloat16)
    x_lo = (xs - x_hi.astype(jnp.float32)).astype(jnp.bfloat16)
    w_hi = w_ref[0]
    w_lo = w_ref[1]
    # Near-f32 conv via a 3-pass bf16 split (w_lo*x_lo term ~2^-18, dropped).
    acc = (jnp.dot(w_hi, x_hi, preferred_element_type=jnp.float32)
           + jnp.dot(w_hi, x_lo, preferred_element_type=jnp.float32)
           + jnp.dot(w_lo, x_hi, preferred_element_type=jnp.float32))
    acc = acc + b_ref[...]
    z = _sigmoid(acc)                                     # (Cout, L)

    om = m[:, S + 1:S + 1 + L]                            # real-pixel mask over outputs
    if fuse_pool_upsample:
        # Fused 2x2 max-pool + nearest 2x upsample (sigmoid and max commute, so this
        # realizes l3+l4+l6 with zero extra HBM passes).  Rows sit at S-strided lane
        # offsets, so both reductions are exact lane rotations + parity selects.
        row_even = par_ref[0:1, :] != 0.0                 # (1, L)
        col_even = par_ref[1:2, :] != 0.0
        v = jnp.where(row_even,
                      jnp.maximum(z, _rot(z, S)),         # pair with row below
                      jnp.maximum(z, _rot(z, -S)))        # pair with row above
        res = jnp.where(col_even,
                        jnp.maximum(v, _rot(v, 1)),       # pair with column right
                        jnp.maximum(v, _rot(v, -1)))      # pair with column left
        stat_scale = 0.25   # each pooled value appears exactly 4x among real pixels
        # Store shifted by one padded row + one padded column: the output block IS
        # the zero-padded, lane-flattened plane conv2 consumes (garbage columns land
        # only on pad positions, which conv2's prologue mask forces to zero).
        o_ref[0, :, pl.ds(S + 1, L)] = res
    else:
        res = z
        stat_scale = 1.0
        o_ref[0] = res

    # Per-image partial batch statistics for the next BatchNorm (garbage columns
    # excluded with a select so stray values can never leak into the stats).
    resm = jnp.where(om != 0.0, res, 0.0)
    psum_ref[0] = stat_scale * jnp.sum(resm, axis=1, keepdims=True)
    psq_ref[0] = stat_scale * jnp.sum(resm * resm, axis=1, keepdims=True)


def _final_kernel(r_ref, sc_ref, sh_ref, e_ref, d_ref, o_ref):
    # r_ref: (1, 3, H, S)  sc/sh: (3, 1, 1)  e_ref: (S, 2W) 0/1 bf16  d_ref: (2H, H)
    y = r_ref[0] * sc_ref[...] + sh_ref[...]
    y = _sigmoid(y)                                       # (3, H, S), in [0, 1]
    # Exact 2x nearest upsample via 0/1 selection matmuls on a bf16 hi/lo split
    # (each output element is a single exact product, so no MXU rounding of the
    #  final values beyond the ~2^-18 split error).  E also drops garbage columns.
    y_hi = y.astype(jnp.bfloat16)
    y_lo = (y - y_hi.astype(jnp.float32)).astype(jnp.bfloat16)
    e = e_ref[...]
    d = d_ref[...]

    def _expand(v):                                       # (H, S) bf16 -> (2H, 2W) f32
        t = jnp.dot(v, e, preferred_element_type=jnp.float32)   # exact column dup+drop
        t = t.astype(jnp.bfloat16)                              # exact (values are bf16)
        return jnp.dot(d, t, preferred_element_type=jnp.float32)  # exact row dup

    for ch in range(y.shape[0]):
        o_ref[0, ch] = _expand(y_hi[ch]) + _expand(y_lo[ch])


# --------------------------- pallas_call wrappers --------------------------- #

def _stats_call(xflat):
    N, C, LIN = xflat.shape
    return pl.pallas_call(
        _stats_kernel,
        grid=(N,),
        in_specs=[pl.BlockSpec((1, C, LIN), lambda n: (n, 0, 0))],
        out_shape=(jax.ShapeDtypeStruct((N, C, 1), jnp.float32),
                   jax.ShapeDtypeStruct((N, C, 1), jnp.float32)),
        out_specs=(pl.BlockSpec((1, C, 1), lambda n: (n, 0, 0)),
                   pl.BlockSpec((1, C, 1), lambda n: (n, 0, 0))),
        compiler_params=pltpu.CompilerParams(dimension_semantics=("parallel",)),
    )(xflat)


def _conv_call(x, w2, bias, scale, shift, mask, parity, *,
               S, H, W, fuse_pool_upsample, out_width):
    N, Cin, LIN = x.shape
    Cout = w2.shape[1]
    L = H * S
    kern = functools.partial(_conv_kernel, S=S, H=H, W=W, Cin=Cin,
                             fuse_pool_upsample=fuse_pool_upsample)

    in_specs = [
        pl.BlockSpec((1, Cin, LIN), lambda n: (n, 0, 0)),
        pl.BlockSpec((2, Cout, 9 * Cin), lambda n: (0, 0, 0)),
        pl.BlockSpec((Cout, 1), lambda n: (0, 0)),
        pl.BlockSpec((Cin, 1), lambda n: (0, 0)),
        pl.BlockSpec((Cin, 1), lambda n: (0, 0)),
        pl.BlockSpec((1, LIN), lambda n: (0, 0)),
    ]
    operands = [x, w2, bias, scale, shift, mask]
    if fuse_pool_upsample:
        in_specs.append(pl.BlockSpec((2, L), lambda n: (0, 0)))
        operands.append(parity)

    out_shape = (jax.ShapeDtypeStruct((N, Cout, out_width), jnp.float32),
                 jax.ShapeDtypeStruct((N, Cout, 1), jnp.float32),
                 jax.ShapeDtypeStruct((N, Cout, 1), jnp.float32))
    out_specs = (pl.BlockSpec((1, Cout, out_width), lambda n: (n, 0, 0)),
                 pl.BlockSpec((1, Cout, 1), lambda n: (n, 0, 0)),
                 pl.BlockSpec((1, Cout, 1), lambda n: (n, 0, 0)))

    # VMEM budget: double-buffered IO + f32 tap-stack scratch, with headroom.
    need = 4 * 2 * (Cin * LIN + Cout * out_width) + 4 * 9 * Cin * L + (4 << 20)
    vmem_limit = int(min(max(need, 32 * 1024 * 1024), 100 * 1024 * 1024))
    flops = 3 * 2 * N * Cout * 9 * Cin * L
    byts = 4 * (x.size + N * Cout * out_width) + 2 * w2.size

    return pl.pallas_call(
        kern,
        grid=(N,),
        in_specs=in_specs,
        out_shape=out_shape,
        out_specs=out_specs,
        scratch_shapes=[pltpu.VMEM((9 * Cin, L), jnp.float32)],
        compiler_params=pltpu.CompilerParams(
            dimension_semantics=("parallel",),
            vmem_limit_bytes=vmem_limit),
        cost_estimate=pl.CostEstimate(flops=int(flops),
                                      transcendentals=int(N * Cout * L),
                                      bytes_accessed=int(byts)),
    )(*operands)


def _final_call(r4, scale, shift, e_mat, d_mat):
    N, C, H, S = r4.shape
    W2 = e_mat.shape[1]
    H2 = d_mat.shape[0]
    return pl.pallas_call(
        _final_kernel,
        grid=(N,),
        in_specs=[
            pl.BlockSpec((1, C, H, S), lambda n: (n, 0, 0, 0)),
            pl.BlockSpec((C, 1, 1), lambda n: (0, 0, 0)),
            pl.BlockSpec((C, 1, 1), lambda n: (0, 0, 0)),
            pl.BlockSpec((S, W2), lambda n: (0, 0)),
            pl.BlockSpec((H2, H), lambda n: (0, 0)),
        ],
        out_shape=jax.ShapeDtypeStruct((N, C, H2, W2), jnp.float32),
        out_specs=pl.BlockSpec((1, C, H2, W2), lambda n: (n, 0, 0, 0)),
        compiler_params=pltpu.CompilerParams(dimension_semantics=("parallel",)),
    )(r4, scale, shift, e_mat, d_mat)


# --------------------------------- helpers ---------------------------------- #

def _prep_weight(w_oihw):
    """(Cout, Cin, 3, 3) -> (2, Cout, 9*Cin) bf16 [hi, lo], tap-major (t = 3*di+dj)."""
    cout, cin = w_oihw.shape[0], w_oihw.shape[1]
    w = jnp.transpose(w_oihw, (0, 2, 3, 1)).reshape(cout, 9 * cin).astype(jnp.float32)
    w_hi = w.astype(jnp.bfloat16)
    w_lo = (w - w_hi.astype(jnp.float32)).astype(jnp.bfloat16)
    return jnp.stack([w_hi, w_lo], axis=0)


def _bn_fold(psum, psq, count, gamma, beta):
    """Batch-stat BatchNorm (training mode, biased var) -> per-channel scale/shift."""
    mean = psum / count
    var = jnp.maximum(psq / count - mean * mean, 0.0)
    scale = gamma.reshape(-1, 1) * jax.lax.rsqrt(var + EPS)
    shift = beta.reshape(-1, 1) - mean * scale
    return scale, shift


# ------------------------------- full forward -------------------------------- #

def upscaler_forward(x_nchw, params):
    N, C, H, W = x_nchw.shape
    assert C == 3 and H % 2 == 0 and W % 2 == 0
    x = x_nchw.astype(jnp.float32)
    S = W + 2
    L = H * S
    LIN = _round_up((H + 2) * S + 2, 128)        # lane-dense padded-plane width

    # Cheap layout glue on the 3-channel input only: zero-pad + flatten the plane.
    xp = jnp.pad(x, ((0, 0), (0, 0), (1, 1), (1, 1)))               # (N, 3, H+2, S)
    xflat = xp.reshape(N, 3, (H + 2) * S)
    xflat = jnp.pad(xflat, ((0, 0), (0, 0), (0, LIN - (H + 2) * S)))  # (N, 3, LIN)

    # Real-pixel mask over the padded plane (shared by both conv stages).
    idx = jnp.arange(LIN)
    row, col = idx // S, idx % S
    mask = ((row >= 1) & (row <= H) & (col >= 1) & (col <= W))
    mask = mask.astype(jnp.float32).reshape(1, LIN)

    # Row / column parity over conv-output positions (for fused pool + upsample).
    p = jnp.arange(L)
    parity = jnp.stack([(p // S) % 2 == 0, (p % S) % 2 == 0]).astype(jnp.float32)

    # l1: BN1 batch statistics (Pallas), affine folded into the conv1 prologue.
    s1, q1 = _stats_call(xflat)
    sc1, sh1 = _bn_fold(jnp.sum(s1, axis=0), jnp.sum(q1, axis=0),
                        float(N * H * W), params["bn1_g"], params["bn1_b"])

    # l2+l3+l4+l6 (+ BN2 partial stats): fully fused conv1 stage.
    w1 = _prep_weight(params["conv1_w"])
    up, s2, q2 = _conv_call(xflat, w1, params["conv1_b"].reshape(-1, 1), sc1, sh1,
                            mask, parity, S=S, H=H, W=W,
                            fuse_pool_upsample=True, out_width=LIN)
    sc2, sh2 = _bn_fold(jnp.sum(s2, axis=0), jnp.sum(q2, axis=0),
                        float(N * (H // 2) * (W // 2)),
                        params["bn2_g"], params["bn2_b"])

    # l7+l8 (+ BN3 partial stats): fused conv2 stage (BN2 affine in prologue;
    # it commutes with the nearest upsample already fused into the conv1 output).
    w2 = _prep_weight(params["conv2_w"])
    r, s3, q3 = _conv_call(up, w2, params["conv2_b"].reshape(-1, 1), sc2, sh2,
                           mask, None, S=S, H=H, W=W,
                           fuse_pool_upsample=False, out_width=L)
    sc3, sh3 = _bn_fold(jnp.sum(s3, axis=0), jnp.sum(q3, axis=0),
                        float(N * H * W), params["bn3_g"], params["bn3_b"])

    # l9+l11+l10: BN3 affine + exact sigmoid + final nearest 2x upsample, fused.
    c_i = jnp.arange(S)[:, None]
    d_i = jnp.arange(2 * W)[None, :]
    e_mat = (c_i == d_i // 2).astype(jnp.bfloat16)        # column dup + garbage drop
    r_i = jnp.arange(2 * H)[:, None]
    a_i = jnp.arange(H)[None, :]
    d_mat = (a_i == r_i // 2).astype(jnp.bfloat16)        # row dup
    out = _final_call(r.reshape(N, 3, H, S), sc3.reshape(3, 1, 1),
                      sh3.reshape(3, 1, 1), e_mat, d_mat)
    return out                                            # (N, 3, 2H, 2W)


# ------------------------------ parameter init ------------------------------- #

def init_params(key):
    k1, k2, k3, k4 = jax.random.split(key, 4)
    return dict(
        bn1_g=jnp.ones((3,), jnp.float32), bn1_b=jnp.zeros((3,), jnp.float32),
        conv1_w=0.1 * jax.random.normal(k1, (24, 3, 3, 3), jnp.float32),
        conv1_b=0.1 * jax.random.normal(k2, (24,), jnp.float32),
        bn2_g=jnp.ones((24,), jnp.float32), bn2_b=jnp.zeros((24,), jnp.float32),
        conv2_w=0.1 * jax.random.normal(k3, (3, 24, 3, 3), jnp.float32),
        conv2_b=0.1 * jax.random.normal(k4, (3,), jnp.float32),
        bn3_g=jnp.ones((3,), jnp.float32), bn3_b=jnp.zeros((3,), jnp.float32),
    )


if __name__ == "__main__":
    key = jax.random.PRNGKey(0)
    kx, kp = jax.random.split(key)
    x = jax.random.normal(kx, (2, 3, 16, 16), jnp.float32)   # NCHW input
    params = init_params(kp)

    fwd = jax.jit(upscaler_forward)
    out = jax.block_until_ready(fwd(x, params))

    assert out.shape == (2, 3, 32, 32), out.shape
    assert bool(jnp.all(jnp.isfinite(out)))
    assert bool(jnp.all((out >= 0.0) & (out <= 1.0)))        # final sigmoid range
    print("KERNEL_OK")
</pallas_src>

<mosaic_0001>
module attributes {stable_mosaic.version = 11 : i64} {
  func.func @_stats_kernel(%arg0: i32, %arg1: memref<1x3x384xf32, #tpu.memory_space<vmem>>, %arg2: memref<1x3x1xf32, #tpu.memory_space<vmem>>, %arg3: memref<1x3x1xf32, #tpu.memory_space<vmem>>) attributes {dimension_semantics = [#tpu.dimension_semantics<parallel>], iteration_bounds = array<i64: 2>, scalar_prefetch = 0 : i64, scratch_operands = 0 : i64, tpu.core_type = #tpu.core_type<tc>, window_params = [{transform_indices = @transform_0, window_bounds = array<i64: 1, 3, 384>}, {transform_indices = @transform_1, window_bounds = array<i64: 1, 3, 1>}, {transform_indices = @transform_2, window_bounds = array<i64: 1, 3, 1>}]} {
    %c0 = arith.constant 0 : index
    %c0_0 = arith.constant 0 : index
    %c0_1 = arith.constant 0 : index
    %0 = vector.load %arg1[%c0, %c0_0, %c0_1] : memref<1x3x384xf32, #tpu.memory_space<vmem>>, vector<1x3x384xf32>
    %1 = vector.shape_cast %0 : vector<1x3x384xf32> to vector<3x384xf32>
    %cst = arith.constant dense<0.000000e+00> : vector<3xf32>
    %2 = vector.multi_reduction <add>, %1, %cst [1] : vector<3x384xf32> to vector<3xf32>
    %3 = vector.shape_cast %2 : vector<3xf32> to vector<3x1xf32>
    %c0_2 = arith.constant 0 : index
    %c0_3 = arith.constant 0 : index
    %c0_4 = arith.constant 0 : index
    %4 = vector.load %arg2[%c0_2, %c0_3, %c0_4] : memref<1x3x1xf32, #tpu.memory_space<vmem>>, vector<1x3x1xf32>
    %5 = vector.shape_cast %4 : vector<1x3x1xf32> to vector<3x1xf32>
    %6 = vector.shape_cast %3 : vector<3x1xf32> to vector<1x3x1xf32>
    tpu.vector_store %arg2[%c0_2, %c0_3, %c0_4], %6 {strides = array<i32>} : memref<1x3x1xf32, #tpu.memory_space<vmem>>, vector<1x3x1xf32>,
    %7 = arith.mulf %1, %1 : vector<3x384xf32>
    %cst_5 = arith.constant dense<0.000000e+00> : vector<3xf32>
    %8 = vector.multi_reduction <add>, %7, %cst_5 [1] : vector<3x384xf32> to vector<3xf32>
    %9 = vector.shape_cast %8 : vector<3xf32> to vector<3x1xf32>
    %c0_6 = arith.constant 0 : index
    %c0_7 = arith.constant 0 : index
    %c0_8 = arith.constant 0 : index
    %10 = vector.load %arg3[%c0_6, %c0_7, %c0_8] : memref<1x3x1xf32, #tpu.memory_space<vmem>>, vector<1x3x1xf32>
    %11 = vector.shape_cast %10 : vector<1x3x1xf32> to vector<3x1xf32>
    %12 = vector.shape_cast %9 : vector<3x1xf32> to vector<1x3x1xf32>
    tpu.vector_store %arg3[%c0_6, %c0_7, %c0_8], %12 {strides = array<i32>} : memref<1x3x1xf32, #tpu.memory_space<vmem>>, vector<1x3x1xf32>,
    return
  }
  func.func @transform_0(%arg0: i32) -> (i32, i32, i32) {
    %c0_i32 = arith.constant 0 : i32
    %c0_i32_0 = arith.constant 0 : i32
    %c0_i32_1 = arith.constant 0 : i32
    return %arg0, %c0_i32, %c0_i32_0 : i32, i32, i32
  }
  func.func @transform_1(%arg0: i32) -> (i32, i32, i32) {
    %c0_i32 = arith.constant 0 : i32
    %c0_i32_0 = arith.constant 0 : i32
    %c0_i32_1 = arith.constant 0 : i32
    return %arg0, %c0_i32, %c0_i32_0 : i32, i32, i32
  }
  func.func @transform_2(%arg0: i32) -> (i32, i32, i32) {
    %c0_i32 = arith.constant 0 : i32
    %c0_i32_0 = arith.constant 0 : i32
    %c0_i32_1 = arith.constant 0 : i32
    return %arg0, %c0_i32, %c0_i32_0 : i32, i32, i32
  }
}

module attributes {stable_mosaic.version = 11 : i64} {
  func.func @_conv_kernel(%arg0: i32, %arg1: memref<1x3x384xf32, #tpu.memory_space<vmem>>, %arg2: memref<2x24x27xbf16, #tpu.memory_space<vmem>>, %arg3: memref<24x1xf32, #tpu.memory_space<vmem>>, %arg4: memref<3x1xf32, #tpu.memory_space<vmem>>, %arg5: memref<3x1xf32, #tpu.memory_space<vmem>>, %arg6: memref<1x384xf32, #tpu.memory_space<vmem>>, %arg7: memref<2x288xf32, #tpu.memory_space<vmem>>, %arg8: memref<1x24x384xf32, #tpu.memory_space<vmem>>, %arg9: memref<1x24x1xf32, #tpu.memory_space<vmem>>, %arg10: memref<1x24x1xf32, #tpu.memory_space<vmem>>, %arg11: memref<27x288xf32, #tpu.memory_space<vmem>>) attributes {dimension_semantics = [#tpu.dimension_semantics<parallel>], iteration_bounds = array<i64: 2>, scalar_prefetch = 0 : i64, scratch_operands = 1 : i64, tpu.core_type = #tpu.core_type<tc>, window_params = [{transform_indices = @transform_0, window_bounds = array<i64: 1, 3, 384>}, {pipeline_mode = #tpu.pipeline_mode<synchronous>, transform_indices = @transform_1, window_bounds = array<i64: 2, 24, 27>}, {pipeline_mode = #tpu.pipeline_mode<synchronous>, transform_indices = @transform_2, window_bounds = array<i64: 24, 1>}, {pipeline_mode = #tpu.pipeline_mode<synchronous>, transform_indices = @transform_3, window_bounds = array<i64: 3, 1>}, {pipeline_mode = #tpu.pipeline_mode<synchronous>, transform_indices = @transform_4, window_bounds = array<i64: 3, 1>}, {pipeline_mode = #tpu.pipeline_mode<synchronous>, transform_indices = @transform_5, window_bounds = array<i64: 1, 384>}, {pipeline_mode = #tpu.pipeline_mode<synchronous>, transform_indices = @transform_6, window_bounds = array<i64: 2, 288>}, {transform_indices = @transform_7, window_bounds = array<i64: 1, 24, 384>}, {transform_indices = @transform_8, window_bounds = array<i64: 1, 24, 1>}, {transform_indices = @transform_9, window_bounds = array<i64: 1, 24, 1>}]} {
    %c0 = arith.constant 0 : index
    %c0_0 = arith.constant 0 : index
    %c0_1 = arith.constant 0 : index
    %0 = vector.load %arg1[%c0, %c0_0, %c0_1] : memref<1x3x384xf32, #tpu.memory_space<vmem>>, vector<1x3x384xf32>
    %1 = vector.shape_cast %0 : vector<1x3x384xf32> to vector<3x384xf32>
    %c0_2 = arith.constant 0 : index
    %c0_3 = arith.constant 0 : index
    %2 = vector.load %arg6[%c0_2, %c0_3] : memref<1x384xf32, #tpu.memory_space<vmem>>, vector<1x384xf32>
    %cst = arith.constant 0.000000e+00 : f32
    %3 = vector.broadcast %cst : f32 to vector<1x384xf32>
    %4 = arith.cmpf one, %2, %3 : vector<1x384xf32>
    %c0_4 = arith.constant 0 : index
    %c0_5 = arith.constant 0 : index
    %5 = vector.load %arg4[%c0_4, %c0_5] : memref<3x1xf32, #tpu.memory_space<vmem>>, vector<3x1xf32>
    %6 = vector.broadcast %5 : vector<3x1xf32> to vector<3x384xf32>
    %7 = arith.mulf %1, %6 : vector<3x384xf32>
    %c0_6 = arith.constant 0 : index
    %c0_7 = arith.constant 0 : index
    %8 = vector.load %arg5[%c0_6, %c0_7] : memref<3x1xf32, #tpu.memory_space<vmem>>, vector<3x1xf32>
    %9 = vector.broadcast %8 : vector<3x1xf32> to vector<3x384xf32>
    %10 = arith.addf %7, %9 : vector<3x384xf32>
    %cst_8 = arith.constant 0.000000e+00 : f32
    %11 = vector.shape_cast %4 : vector<1x384xi1> to vector<1x384xi1>
    %12 = vector.broadcast %11 : vector<1x384xi1> to vector<3x384xi1>
    %13 = vector.broadcast %cst_8 : f32 to vector<3x384xf32>
    %14 = arith.select %12, %10, %13 : vector<3x384xi1>, vector<3x384xf32>
    %15 = vector.extract_strided_slice %14 {offsets = [0, 0], sizes = [3, 288], strides = [1, 1]} : vector<3x384xf32> to vector<3x288xf32>
    %c0_9 = arith.constant 0 : index
    %c0_10 = arith.constant 0 : index
    %16 = vector.load %arg11[%c0_9, %c0_10] : memref<27x288xf32, #tpu.memory_space<vmem>>, vector<3x288xf32>
    tpu.vector_store %arg11[%c0_9, %c0_10], %15 {strides = array<i32>} : memref<27x288xf32, #tpu.memory_space<vmem>>, vector<3x288xf32>,
    %17 = vector.extract_strided_slice %14 {offsets = [0, 1], sizes = [3, 288], strides = [1, 1]} : vector<3x384xf32> to vector<3x288xf32>
    %c3 = arith.constant 3 : index
    %c0_11 = arith.constant 0 : index
    %18 = vector.load %arg11[%c3, %c0_11] : memref<27x288xf32, #tpu.memory_space<vmem>>, vector<3x288xf32>
    tpu.vector_store %arg11[%c3, %c0_11], %17 {strides = array<i32>} : memref<27x288xf32, #tpu.memory_space<vmem>>, vector<3x288xf32>,
    %19 = vector.extract_strided_slice %14 {offsets = [0, 2], sizes = [3, 288], strides = [1, 1]} : vector<3x384xf32> to vector<3x288xf32>
    %c6 = arith.constant 6 : index
    %c0_12 = arith.constant 0 : index
    %20 = vector.load %arg11[%c6, %c0_12] : memref<27x288xf32, #tpu.memory_space<vmem>>, vector<3x288xf32>
    tpu.vector_store %arg11[%c6, %c0_12], %19 {strides = array<i32>} : memref<27x288xf32, #tpu.memory_space<vmem>>, vector<3x288xf32>,
    %21 = vector.extract_strided_slice %14 {offsets = [0, 18], sizes = [3, 288], strides = [1, 1]} : vector<3x384xf32> to vector<3x288xf32>
    %c9 = arith.constant 9 : index
    %c0_13 = arith.constant 0 : index
    %22 = vector.load %arg11[%c9, %c0_13] : memref<27x288xf32, #tpu.memory_space<vmem>>, vector<3x288xf32>
    tpu.vector_store %arg11[%c9, %c0_13], %21 {strides = array<i32>} : memref<27x288xf32, #tpu.memory_space<vmem>>, vector<3x288xf32>,
    %23 = vector.extract_strided_slice %14 {offsets = [0, 19], sizes = [3, 288], strides = [1, 1]} : vector<3x384xf32> to vector<3x288xf32>
    %c12 = arith.constant 12 : index
    %c0_14 = arith.constant 0 : index
    %24 = vector.load %arg11[%c12, %c0_14] : memref<27x288xf32, #tpu.memory_space<vmem>>, vector<3x288xf32>
    tpu.vector_store %arg11[%c12, %c0_14], %23 {strides = array<i32>} : memref<27x288xf32, #tpu.memory_space<vmem>>, vector<3x288xf32>,
    %25 = vector.extract_strided_slice %14 {offsets = [0, 20], sizes = [3, 288], strides = [1, 1]} : vector<3x384xf32> to vector<3x288xf32>
    %c15 = arith.constant 15 : index
    %c0_15 = arith.constant 0 : index
    %26 = vector.load %arg11[%c15, %c0_15] : memref<27x288xf32, #tpu.memory_space<vmem>>, vector<3x288xf32>
    tpu.vector_store %arg11[%c15, %c0_15], %25 {strides = array<i32>} : memref<27x288xf32, #tpu.memory_space<vmem>>, vector<3x288xf32>,
    %27 = vector.extract_strided_slice %14 {offsets = [0, 36], sizes = [3, 288], strides = [1, 1]} : vector<3x384xf32> to vector<3x288xf32>
    %c18 = arith.constant 18 : index
    %c0_16 = arith.constant 0 : index
    %28 = vector.load %arg11[%c18, %c0_16] : memref<27x288xf32, #tpu.memory_space<vmem>>, vector<3x288xf32>
    tpu.vector_store %arg11[%c18, %c0_16], %27 {strides = array<i32>} : memref<27x288xf32, #tpu.memory_space<vmem>>, vector<3x288xf32>,
    %29 = vector.extract_strided_slice %14 {offsets = [0, 37], sizes = [3, 288], strides = [1, 1]} : vector<3x384xf32> to vector<3x288xf32>
    %c21 = arith.constant 21 : index
    %c0_17 = arith.constant 0 : index
    %30 = vector.load %arg11[%c21, %c0_17] : memref<27x288xf32, #tpu.memory_space<vmem>>, vector<3x288xf32>
    tpu.vector_store %arg11[%c21, %c0_17], %29 {strides = array<i32>} : memref<27x288xf32, #tpu.memory_space<vmem>>, vector<3x288xf32>,
    %31 = vector.extract_strided_slice %14 {offsets = [0, 38], sizes = [3, 288], strides = [1, 1]} : vector<3x384xf32> to vector<3x288xf32>
    %c24 = arith.constant 24 : index
    %c0_18 = arith.constant 0 : index
    %32 = vector.load %arg11[%c24, %c0_18] : memref<27x288xf32, #tpu.memory_space<vmem>>, vector<3x288xf32>
    tpu.vector_store %arg11[%c24, %c0_18], %31 {strides = array<i32>} : memref<27x288xf32, #tpu.memory_space<vmem>>, vector<3x288xf32>,
    %c0_19 = arith.constant 0 : index
    %c0_20 = arith.constant 0 : index
    %33 = vector.load %arg11[%c0_19, %c0_20] : memref<27x288xf32, #tpu.memory_space<vmem>>, vector<27x288xf32>
    %34 = arith.truncf %33 : vector<27x288xf32> to vector<27x288xbf16>
    %35 = arith.extf %34 : vector<27x288xbf16> to vector<27x288xf32>
    %36 = arith.subf %33, %35 : vector<27x288xf32>
    %37 = arith.truncf %36 : vector<27x288xf32> to vector<27x288xbf16>
    %c0_21 = arith.constant 0 : index
    %c0_22 = arith.constant 0 : index
    %c0_23 = arith.constant 0 : index
    %38 = vector.load %arg2[%c0_21, %c0_22, %c0_23] : memref<2x24x27xbf16, #tpu.memory_space<vmem>>, vector<1x24x27xbf16>
    %39 = vector.shape_cast %38 : vector<1x24x27xbf16> to vector<24x27xbf16>
    %c1 = arith.constant 1 : index
    %c0_24 = arith.constant 0 : index
    %c0_25 = arith.constant 0 : index
    %40 = vector.load %arg2[%c1, %c0_24, %c0_25] : memref<2x24x27xbf16, #tpu.memory_space<vmem>>, vector<1x24x27xbf16>
    %41 = vector.shape_cast %40 : vector<1x24x27xbf16> to vector<24x27xbf16>
    %cst_26 = arith.constant dense<0.000000e+00> : vector<24x288xf32>
    %42 = tpu.matmul %39, %34, %cst_26 {dimension_numbers = #tpu.dot_dimension_numbers<[1], [0], [0], [1], [0, 0, 1, 1], [], []>} : vector<24x27xbf16>, vector<27x288xbf16>, vector<24x288xf32> -> vector<24x288xf32>
    %cst_27 = arith.constant dense<0.000000e+00> : vector<24x288xf32>
    %43 = tpu.matmul %39, %37, %cst_27 {dimension_numbers = #tpu.dot_dimension_numbers<[1], [0], [0], [1], [0, 0, 1, 1], [], []>} : vector<24x27xbf16>, vector<27x288xbf16>, vector<24x288xf32> -> vector<24x288xf32>
    %44 = arith.addf %42, %43 : vector<24x288xf32>
    %cst_28 = arith.constant dense<0.000000e+00> : vector<24x288xf32>
    %45 = tpu.matmul %41, %34, %cst_28 {dimension_numbers = #tpu.dot_dimension_numbers<[1], [0], [0], [1], [0, 0, 1, 1], [], []>} : vector<24x27xbf16>, vector<27x288xbf16>, vector<24x288xf32> -> vector<24x288xf32>
    %46 = arith.addf %44, %45 : vector<24x288xf32>
    %c0_29 = arith.constant 0 : index
    %c0_30 = arith.constant 0 : index
    %47 = vector.load %arg3[%c0_29, %c0_30] : memref<24x1xf32, #tpu.memory_space<vmem>>, vector<24x1xf32>
    %48 = vector.broadcast %47 : vector<24x1xf32> to vector<24x288xf32>
    %49 = arith.addf %46, %48 : vector<24x288xf32>
    %cst_31 = arith.constant 5.000000e-01 : f32
    %50 = vector.broadcast %cst_31 : f32 to vector<24x288xf32>
    %51 = arith.mulf %50, %49 : vector<24x288xf32>
    %52 = math.tanh %51 : vector<24x288xf32>
    %cst_32 = arith.constant 5.000000e-01 : f32
    %53 = vector.broadcast %cst_32 : f32 to vector<24x288xf32>
    %54 = arith.mulf %53, %52 : vector<24x288xf32>
    %cst_33 = arith.constant 5.000000e-01 : f32
    %55 = vector.broadcast %cst_33 : f32 to vector<24x288xf32>
    %56 = arith.addf %54, %55 : vector<24x288xf32>
    %57 = vector.extract_strided_slice %2 {offsets = [0, 19], sizes = [1, 288], strides = [1, 1]} : vector<1x384xf32> to vector<1x288xf32>
    %c0_34 = arith.constant 0 : index
    %c0_35 = arith.constant 0 : index
    %58 = vector.load %arg7[%c0_34, %c0_35] : memref<2x288xf32, #tpu.memory_space<vmem>>, vector<1x288xf32>
    %cst_36 = arith.constant 0.000000e+00 : f32
    %59 = vector.broadcast %cst_36 : f32 to vector<1x288xf32>
    %60 = arith.cmpf one, %58, %59 : vector<1x288xf32>
    %c1_37 = arith.constant 1 : index
    %c0_38 = arith.constant 0 : index
    %61 = vector.load %arg7[%c1_37, %c0_38] : memref<2x288xf32, #tpu.memory_space<vmem>>, vector<1x288xf32>
    %cst_39 = arith.constant 0.000000e+00 : f32
    %62 = vector.broadcast %cst_39 : f32 to vector<1x288xf32>
    %63 = arith.cmpf one, %61, %62 : vector<1x288xf32>
    %64 = vector.extract_strided_slice %56 {offsets = [0, 18], sizes = [24, 270], strides = [1, 1]} : vector<24x288xf32> to vector<24x270xf32>
    %65 = vector.extract_strided_slice %56 {offsets = [0, 0], sizes = [24, 18], strides = [1, 1]} : vector<24x288xf32> to vector<24x18xf32>
    %66 = tpu.concatenate %64, %65 in 1 : vector<24x270xf32>, vector<24x18xf32> -> vector<24x288xf32>
    %67 = arith.maximumf %56, %66 : vector<24x288xf32>
    %68 = vector.extract_strided_slice %56 {offsets = [0, 270], sizes = [24, 18], strides = [1, 1]} : vector<24x288xf32> to vector<24x18xf32>
    %69 = vector.extract_strided_slice %56 {offsets = [0, 0], sizes = [24, 270], strides = [1, 1]} : vector<24x288xf32> to vector<24x270xf32>
    %70 = tpu.concatenate %68, %69 in 1 : vector<24x18xf32>, vector<24x270xf32> -> vector<24x288xf32>
    %71 = arith.maximumf %56, %70 : vector<24x288xf32>
    %72 = vector.shape_cast %60 : vector<1x288xi1> to vector<1x288xi1>
    %73 = vector.broadcast %72 : vector<1x288xi1> to vector<24x288xi1>
    %74 = arith.select %73, %67, %71 : vector<24x288xi1>, vector<24x288xf32>
    %75 = vector.extract_strided_slice %74 {offsets = [0, 1], sizes = [24, 287], strides = [1, 1]} : vector<24x288xf32> to vector<24x287xf32>
    %76 = vector.extract_strided_slice %74 {offsets = [0, 0], sizes = [24, 1], strides = [1, 1]} : vector<24x288xf32> to vector<24x1xf32>
    %77 = tpu.concatenate %75, %76 in 1 : vector<24x287xf32>, vector<24x1xf32> -> vector<24x288xf32>
    %78 = arith.maximumf %74, %77 : vector<24x288xf32>
    %79 = vector.extract_strided_slice %74 {offsets = [0, 287], sizes = [24, 1], strides = [1, 1]} : vector<24x288xf32> to vector<24x1xf32>
    %80 = vector.extract_strided_slice %74 {offsets = [0, 0], sizes = [24, 287], strides = [1, 1]} : vector<24x288xf32> to vector<24x287xf32>
    %81 = tpu.concatenate %79, %80 in 1 : vector<24x1xf32>, vector<24x287xf32> -> vector<24x288xf32>
    %82 = arith.maximumf %74, %81 : vector<24x288xf32>
    %83 = vector.shape_cast %63 : vector<1x288xi1> to vector<1x288xi1>
    %84 = vector.broadcast %83 : vector<1x288xi1> to vector<24x288xi1>
    %85 = arith.select %84, %78, %82 : vector<24x288xi1>, vector<24x288xf32>
    %c0_40 = arith.constant 0 : index
    %c0_41 = arith.constant 0 : index
    %c19 = arith.constant 19 : index
    %86 = vector.load %arg8[%c0_40, %c0_41, %c19] : memref<1x24x384xf32, #tpu.memory_space<vmem>>, vector<1x24x288xf32>
    %87 = vector.shape_cast %86 : vector<1x24x288xf32> to vector<24x288xf32>
    %88 = vector.shape_cast %85 : vector<24x288xf32> to vector<1x24x288xf32>
    tpu.vector_store %arg8[%c0_40, %c0_41, %c19], %88 {strides = array<i32>} : memref<1x24x384xf32, #tpu.memory_space<vmem>>, vector<1x24x288xf32>,
    %cst_42 = arith.constant 0.000000e+00 : f32
    %89 = vector.broadcast %cst_42 : f32 to vector<1x288xf32>
    %90 = arith.cmpf one, %57, %89 : vector<1x288xf32>
    %cst_43 = arith.constant 0.000000e+00 : f32
    %91 = vector.shape_cast %90 : vector<1x288xi1> to vector<1x288xi1>
    %92 = vector.broadcast %91 : vector<1x288xi1> to vector<24x288xi1>
    %93 = vector.broadcast %cst_43 : f32 to vector<24x288xf32>
    %94 = arith.select %92, %85, %93 : vector<24x288xi1>, vector<24x288xf32>
    %cst_44 = arith.constant dense<0.000000e+00> : vector<24xf32>
    %95 = vector.multi_reduction <add>, %94, %cst_44 [1] : vector<24x288xf32> to vector<24xf32>
    %96 = vector.shape_cast %95 : vector<24xf32> to vector<24x1xf32>
    %cst_45 = arith.constant 2.500000e-01 : f32
    %97 = vector.broadcast %cst_45 : f32 to vector<24x1xf32>
    %98 = arith.mulf %97, %96 : vector<24x1xf32>
    %c0_46 = arith.constant 0 : index
    %c0_47 = arith.constant 0 : index
    %c0_48 = arith.constant 0 : index
    %99 = vector.load %arg9[%c0_46, %c0_47, %c0_48] : memref<1x24x1xf32, #tpu.memory_space<vmem>>, vector<1x24x1xf32>
    %100 = vector.shape_cast %99 : vector<1x24x1xf32> to vector<24x1xf32>
    %101 = vector.shape_cast %98 : vector<24x1xf32> to vector<1x24x1xf32>
    tpu.vector_store %arg9[%c0_46, %c0_47, %c0_48], %101 {strides = array<i32>} : memref<1x24x1xf32, #tpu.memory_space<vmem>>, vector<1x24x1xf32>,
    %102 = arith.mulf %94, %94 : vector<24x288xf32>
    %cst_49 = arith.constant dense<0.000000e+00> : vector<24xf32>
    %103 = vector.multi_reduction <add>, %102, %cst_49 [1] : vector<24x288xf32> to vector<24xf32>
    %104 = vector.shape_cast %103 : vector<24xf32> to vector<24x1xf32>
    %cst_50 = arith.constant 2.500000e-01 : f32
    %105 = vector.broadcast %cst_50 : f32 to vector<24x1xf32>
    %106 = arith.mulf %105, %104 : vector<24x1xf32>
    %c0_51 = arith.constant 0 : index
    %c0_52 = arith.constant 0 : index
    %c0_53 = arith.constant 0 : index
    %107 = vector.load %arg10[%c0_51, %c0_52, %c0_53] : memref<1x24x1xf32, #tpu.memory_space<vmem>>, vector<1x24x1xf32>
    %108 = vector.shape_cast %107 : vector<1x24x1xf32> to vector<24x1xf32>
    %109 = vector.shape_cast %106 : vector<24x1xf32> to vector<1x24x1xf32>
    tpu.vector_store %arg10[%c0_51, %c0_52, %c0_53], %109 {strides = array<i32>} : memref<1x24x1xf32, #tpu.memory_space<vmem>>, vector<1x24x1xf32>,
    return
  }
  func.func @transform_0(%arg0: i32) -> (i32, i32, i32) {
    %c0_i32 = arith.constant 0 : i32
    %c0_i32_0 = arith.constant 0 : i32
    %c0_i32_1 = arith.constant 0 : i32
    return %arg0, %c0_i32, %c0_i32_0 : i32, i32, i32
  }
  func.func @transform_1(%arg0: i32) -> (i32, i32, i32) {
    %c0_i32 = arith.constant 0 : i32
    %c0_i32_0 = arith.constant 0 : i32
    %c0_i32_1 = arith.constant 0 : i32
    %c0_i32_2 = arith.constant 0 : i32
    return %c0_i32, %c0_i32_0, %c0_i32_1 : i32, i32, i32
  }
  func.func @transform_2(%arg0: i32) -> (i32, i32) {
    %c0_i32 = arith.constant 0 : i32
    %c0_i32_0 = arith.constant 0 : i32
    %c0_i32_1 = arith.constant 0 : i32
    return %c0_i32, %c0_i32_0 : i32, i32
  }
  func.func @transform_3(%arg0: i32) -> (i32, i32) {
    %c0_i32 = arith.constant 0 : i32
    %c0_i32_0 = arith.constant 0 : i32
    %c0_i32_1 = arith.constant 0 : i32
    return %c0_i32, %c0_i32_0 : i32, i32
  }
  func.func @transform_4(%arg0: i32) -> (i32, i32) {
    %c0_i32 = arith.constant 0 : i32
    %c0_i32_0 = arith.constant 0 : i32
    %c0_i32_1 = arith.constant 0 : i32
    return %c0_i32, %c0_i32_0 : i32, i32
  }
  func.func @transform_5(%arg0: i32) -> (i32, i32) {
    %c0_i32 = arith.constant 0 : i32
    %c0_i32_0 = arith.constant 0 : i32
    %c0_i32_1 = arith.constant 0 : i32
    return %c0_i32, %c0_i32_0 : i32, i32
  }
  func.func @transform_6(%arg0: i32) -> (i32, i32) {
    %c0_i32 = arith.constant 0 : i32
    %c0_i32_0 = arith.constant 0 : i32
    %c0_i32_1 = arith.constant 0 : i32
    return %c0_i32, %c0_i32_0 : i32, i32
  }
  func.func @transform_7(%arg0: i32) -> (i32, i32, i32) {
    %c0_i32 = arith.constant 0 : i32
    %c0_i32_0 = arith.constant 0 : i32
    %c0_i32_1 = arith.constant 0 : i32
    return %arg0, %c0_i32, %c0_i32_0 : i32, i32, i32
  }
  func.func @transform_8(%arg0: i32) -> (i32, i32, i32) {
    %c0_i32 = arith.constant 0 : i32
    %c0_i32_0 = arith.constant 0 : i32
    %c0_i32_1 = arith.constant 0 : i32
    return %arg0, %c0_i32, %c0_i32_0 : i32, i32, i32
  }
  func.func @transform_9(%arg0: i32) -> (i32, i32, i32) {
    %c0_i32 = arith.constant 0 : i32
    %c0_i32_0 = arith.constant 0 : i32
    %c0_i32_1 = arith.constant 0 : i32
    return %arg0, %c0_i32, %c0_i32_0 : i32, i32, i32
  }
}

module attributes {stable_mosaic.version = 11 : i64} {
  func.func @_conv_kernel(%arg0: i32, %arg1: memref<1x24x384xf32, #tpu.memory_space<vmem>>, %arg2: memref<2x3x216xbf16, #tpu.memory_space<vmem>>, %arg3: memref<3x1xf32, #tpu.memory_space<vmem>>, %arg4: memref<24x1xf32, #tpu.memory_space<vmem>>, %arg5: memref<24x1xf32, #tpu.memory_space<vmem>>, %arg6: memref<1x384xf32, #tpu.memory_space<vmem>>, %arg7: memref<1x3x288xf32, #tpu.memory_space<vmem>>, %arg8: memref<1x3x1xf32, #tpu.memory_space<vmem>>, %arg9: memref<1x3x1xf32, #tpu.memory_space<vmem>>, %arg10: memref<216x288xf32, #tpu.memory_space<vmem>>) attributes {dimension_semantics = [#tpu.dimension_semantics<parallel>], iteration_bounds = array<i64: 2>, scalar_prefetch = 0 : i64, scratch_operands = 1 : i64, tpu.core_type = #tpu.core_type<tc>, window_params = [{transform_indices = @transform_0, window_bounds = array<i64: 1, 24, 384>}, {pipeline_mode = #tpu.pipeline_mode<synchronous>, transform_indices = @transform_1, window_bounds = array<i64: 2, 3, 216>}, {pipeline_mode = #tpu.pipeline_mode<synchronous>, transform_indices = @transform_2, window_bounds = array<i64: 3, 1>}, {pipeline_mode = #tpu.pipeline_mode<synchronous>, transform_indices = @transform_3, window_bounds = array<i64: 24, 1>}, {pipeline_mode = #tpu.pipeline_mode<synchronous>, transform_indices = @transform_4, window_bounds = array<i64: 24, 1>}, {pipeline_mode = #tpu.pipeline_mode<synchronous>, transform_indices = @transform_5, window_bounds = array<i64: 1, 384>}, {transform_indices = @transform_6, window_bounds = array<i64: 1, 3, 288>}, {transform_indices = @transform_7, window_bounds = array<i64: 1, 3, 1>}, {transform_indices = @transform_8, window_bounds = array<i64: 1, 3, 1>}]} {
    %c0 = arith.constant 0 : index
    %c0_0 = arith.constant 0 : index
    %c0_1 = arith.constant 0 : index
    %0 = vector.load %arg1[%c0, %c0_0, %c0_1] : memref<1x24x384xf32, #tpu.memory_space<vmem>>, vector<1x24x384xf32>
    %1 = vector.shape_cast %0 : vector<1x24x384xf32> to vector<24x384xf32>
    %c0_2 = arith.constant 0 : index
    %c0_3 = arith.constant 0 : index
    %2 = vector.load %arg6[%c0_2, %c0_3] : memref<1x384xf32, #tpu.memory_space<vmem>>, vector<1x384xf32>
    %cst = arith.constant 0.000000e+00 : f32
    %3 = vector.broadcast %cst : f32 to vector<1x384xf32>
    %4 = arith.cmpf one, %2, %3 : vector<1x384xf32>
    %c0_4 = arith.constant 0 : index
    %c0_5 = arith.constant 0 : index
    %5 = vector.load %arg4[%c0_4, %c0_5] : memref<24x1xf32, #tpu.memory_space<vmem>>, vector<24x1xf32>
    %6 = vector.broadcast %5 : vector<24x1xf32> to vector<24x384xf32>
    %7 = arith.mulf %1, %6 : vector<24x384xf32>
    %c0_6 = arith.constant 0 : index
    %c0_7 = arith.constant 0 : index
    %8 = vector.load %arg5[%c0_6, %c0_7] : memref<24x1xf32, #tpu.memory_space<vmem>>, vector<24x1xf32>
    %9 = vector.broadcast %8 : vector<24x1xf32> to vector<24x384xf32>
    %10 = arith.addf %7, %9 : vector<24x384xf32>
    %cst_8 = arith.constant 0.000000e+00 : f32
    %11 = vector.shape_cast %4 : vector<1x384xi1> to vector<1x384xi1>
    %12 = vector.broadcast %11 : vector<1x384xi1> to vector<24x384xi1>
    %13 = vector.broadcast %cst_8 : f32 to vector<24x384xf32>
    %14 = arith.select %12, %10, %13 : vector<24x384xi1>, vector<24x384xf32>
    %15 = vector.extract_strided_slice %14 {offsets = [0, 0], sizes = [24, 288], strides = [1, 1]} : vector<24x384xf32> to vector<24x288xf32>
    %c0_9 = arith.constant 0 : index
    %c0_10 = arith.constant 0 : index
    %16 = vector.load %arg10[%c0_9, %c0_10] : memref<216x288xf32, #tpu.memory_space<vmem>>, vector<24x288xf32>
    tpu.vector_store %arg10[%c0_9, %c0_10], %15 {strides = array<i32>} : memref<216x288xf32, #tpu.memory_space<vmem>>, vector<24x288xf32>,
    %17 = vector.extract_strided_slice %14 {offsets = [0, 1], sizes = [24, 288], strides = [1, 1]} : vector<24x384xf32> to vector<24x288xf32>
    %c24 = arith.constant 24 : index
    %c0_11 = arith.constant 0 : index
    %18 = vector.load %arg10[%c24, %c0_11] : memref<216x288xf32, #tpu.memory_space<vmem>>, vector<24x288xf32>
    tpu.vector_store %arg10[%c24, %c0_11], %17 {strides = array<i32>} : memref<216x288xf32, #tpu.memory_space<vmem>>, vector<24x288xf32>,
    %19 = vector.extract_strided_slice %14 {offsets = [0, 2], sizes = [24, 288], strides = [1, 1]} : vector<24x384xf32> to vector<24x288xf32>
    %c48 = arith.constant 48 : index
    %c0_12 = arith.constant 0 : index
    %20 = vector.load %arg10[%c48, %c0_12] : memref<216x288xf32, #tpu.memory_space<vmem>>, vector<24x288xf32>
    tpu.vector_store %arg10[%c48, %c0_12], %19 {strides = array<i32>} : memref<216x288xf32, #tpu.memory_space<vmem>>, vector<24x288xf32>,
    %21 = vector.extract_strided_slice %14 {offsets = [0, 18], sizes = [24, 288], strides = [1, 1]} : vector<24x384xf32> to vector<24x288xf32>
    %c72 = arith.constant 72 : index
    %c0_13 = arith.constant 0 : index
    %22 = vector.load %arg10[%c72, %c0_13] : memref<216x288xf32, #tpu.memory_space<vmem>>, vector<24x288xf32>
    tpu.vector_store %arg10[%c72, %c0_13], %21 {strides = array<i32>} : memref<216x288xf32, #tpu.memory_space<vmem>>, vector<24x288xf32>,
    %23 = vector.extract_strided_slice %14 {offsets = [0, 19], sizes = [24, 288], strides = [1, 1]} : vector<24x384xf32> to vector<24x288xf32>
    %c96 = arith.constant 96 : index
    %c0_14 = arith.constant 0 : index
    %24 = vector.load %arg10[%c96, %c0_14] : memref<216x288xf32, #tpu.memory_space<vmem>>, vector<24x288xf32>
    tpu.vector_store %arg10[%c96, %c0_14], %23 {strides = array<i32>} : memref<216x288xf32, #tpu.memory_space<vmem>>, vector<24x288xf32>,
    %25 = vector.extract_strided_slice %14 {offsets = [0, 20], sizes = [24, 288], strides = [1, 1]} : vector<24x384xf32> to vector<24x288xf32>
    %c120 = arith.constant 120 : index
    %c0_15 = arith.constant 0 : index
    %26 = vector.load %arg10[%c120, %c0_15] : memref<216x288xf32, #tpu.memory_space<vmem>>, vector<24x288xf32>
    tpu.vector_store %arg10[%c120, %c0_15], %25 {strides = array<i32>} : memref<216x288xf32, #tpu.memory_space<vmem>>, vector<24x288xf32>,
    %27 = vector.extract_strided_slice %14 {offsets = [0, 36], sizes = [24, 288], strides = [1, 1]} : vector<24x384xf32> to vector<24x288xf32>
    %c144 = arith.constant 144 : index
    %c0_16 = arith.constant 0 : index
    %28 = vector.load %arg10[%c144, %c0_16] : memref<216x288xf32, #tpu.memory_space<vmem>>, vector<24x288xf32>
    tpu.vector_store %arg10[%c144, %c0_16], %27 {strides = array<i32>} : memref<216x288xf32, #tpu.memory_space<vmem>>, vector<24x288xf32>,
    %29 = vector.extract_strided_slice %14 {offsets = [0, 37], sizes = [24, 288], strides = [1, 1]} : vector<24x384xf32> to vector<24x288xf32>
    %c168 = arith.constant 168 : index
    %c0_17 = arith.constant 0 : index
    %30 = vector.load %arg10[%c168, %c0_17] : memref<216x288xf32, #tpu.memory_space<vmem>>, vector<24x288xf32>
    tpu.vector_store %arg10[%c168, %c0_17], %29 {strides = array<i32>} : memref<216x288xf32, #tpu.memory_space<vmem>>, vector<24x288xf32>,
    %31 = vector.extract_strided_slice %14 {offsets = [0, 38], sizes = [24, 288], strides = [1, 1]} : vector<24x384xf32> to vector<24x288xf32>
    %c192 = arith.constant 192 : index
    %c0_18 = arith.constant 0 : index
    %32 = vector.load %arg10[%c192, %c0_18] : memref<216x288xf32, #tpu.memory_space<vmem>>, vector<24x288xf32>
    tpu.vector_store %arg10[%c192, %c0_18], %31 {strides = array<i32>} : memref<216x288xf32, #tpu.memory_space<vmem>>, vector<24x288xf32>,
    %c0_19 = arith.constant 0 : index
    %c0_20 = arith.constant 0 : index
    %33 = vector.load %arg10[%c0_19, %c0_20] : memref<216x288xf32, #tpu.memory_space<vmem>>, vector<216x288xf32>
    %34 = arith.truncf %33 : vector<216x288xf32> to vector<216x288xbf16>
    %35 = arith.extf %34 : vector<216x288xbf16> to vector<216x288xf32>
    %36 = arith.subf %33, %35 : vector<216x288xf32>
    %37 = arith.truncf %36 : vector<216x288xf32> to vector<216x288xbf16>
    %c0_21 = arith.constant 0 : index
    %c0_22 = arith.constant 0 : index
    %c0_23 = arith.constant 0 : index
    %38 = vector.load %arg2[%c0_21, %c0_22, %c0_23] : memref<2x3x216xbf16, #tpu.memory_space<vmem>>, vector<1x3x216xbf16>
    %39 = vector.shape_cast %38 : vector<1x3x216xbf16> to vector<3x216xbf16>
    %c1 = arith.constant 1 : index
    %c0_24 = arith.constant 0 : index
    %c0_25 = arith.constant 0 : index
    %40 = vector.load %arg2[%c1, %c0_24, %c0_25] : memref<2x3x216xbf16, #tpu.memory_space<vmem>>, vector<1x3x216xbf16>
    %41 = vector.shape_cast %40 : vector<1x3x216xbf16> to vector<3x216xbf16>
    %cst_26 = arith.constant dense<0.000000e+00> : vector<3x288xf32>
    %42 = tpu.matmul %39, %34, %cst_26 {dimension_numbers = #tpu.dot_dimension_numbers<[1], [0], [0], [1], [0, 0, 1, 1], [], []>} : vector<3x216xbf16>, vector<216x288xbf16>, vector<3x288xf32> -> vector<3x288xf32>
    %cst_27 = arith.constant dense<0.000000e+00> : vector<3x288xf32>
    %43 = tpu.matmul %39, %37, %cst_27 {dimension_numbers = #tpu.dot_dimension_numbers<[1], [0], [0], [1], [0, 0, 1, 1], [], []>} : vector<3x216xbf16>, vector<216x288xbf16>, vector<3x288xf32> -> vector<3x288xf32>
    %44 = arith.addf %42, %43 : vector<3x288xf32>
    %cst_28 = arith.constant dense<0.000000e+00> : vector<3x288xf32>
    %45 = tpu.matmul %41, %34, %cst_28 {dimension_numbers = #tpu.dot_dimension_numbers<[1], [0], [0], [1], [0, 0, 1, 1], [], []>} : vector<3x216xbf16>, vector<216x288xbf16>, vector<3x288xf32> -> vector<3x288xf32>
    %46 = arith.addf %44, %45 : vector<3x288xf32>
    %c0_29 = arith.constant 0 : index
    %c0_30 = arith.constant 0 : index
    %47 = vector.load %arg3[%c0_29, %c0_30] : memref<3x1xf32, #tpu.memory_space<vmem>>, vector<3x1xf32>
    %48 = vector.broadcast %47 : vector<3x1xf32> to vector<3x288xf32>
    %49 = arith.addf %46, %48 : vector<3x288xf32>
    %cst_31 = arith.constant 5.000000e-01 : f32
    %50 = vector.broadcast %cst_31 : f32 to vector<3x288xf32>
    %51 = arith.mulf %50, %49 : vector<3x288xf32>
    %52 = math.tanh %51 : vector<3x288xf32>
    %cst_32 = arith.constant 5.000000e-01 : f32
    %53 = vector.broadcast %cst_32 : f32 to vector<3x288xf32>
    %54 = arith.mulf %53, %52 : vector<3x288xf32>
    %cst_33 = arith.constant 5.000000e-01 : f32
    %55 = vector.broadcast %cst_33 : f32 to vector<3x288xf32>
    %56 = arith.addf %54, %55 : vector<3x288xf32>
    %57 = vector.extract_strided_slice %2 {offsets = [0, 19], sizes = [1, 288], strides = [1, 1]} : vector<1x384xf32> to vector<1x288xf32>
    %c0_34 = arith.constant 0 : index
    %c0_35 = arith.constant 0 : index
    %c0_36 = arith.constant 0 : index
    %58 = vector.load %arg7[%c0_34, %c0_35, %c0_36] : memref<1x3x288xf32, #tpu.memory_space<vmem>>, vector<1x3x288xf32>
    %59 = vector.shape_cast %58 : vector<1x3x288xf32> to vector<3x288xf32>
    %60 = vector.shape_cast %56 : vector<3x288xf32> to vector<1x3x288xf32>
    tpu.vector_store %arg7[%c0_34, %c0_35, %c0_36], %60 {strides = array<i32>} : memref<1x3x288xf32, #tpu.memory_space<vmem>>, vector<1x3x288xf32>,
    %cst_37 = arith.constant 0.000000e+00 : f32
    %61 = vector.broadcast %cst_37 : f32 to vector<1x288xf32>
    %62 = arith.cmpf one, %57, %61 : vector<1x288xf32>
    %cst_38 = arith.constant 0.000000e+00 : f32
    %63 = vector.shape_cast %62 : vector<1x288xi1> to vector<1x288xi1>
    %64 = vector.broadcast %63 : vector<1x288xi1> to vector<3x288xi1>
    %65 = vector.broadcast %cst_38 : f32 to vector<3x288xf32>
    %66 = arith.select %64, %56, %65 : vector<3x288xi1>, vector<3x288xf32>
    %cst_39 = arith.constant dense<0.000000e+00> : vector<3xf32>
    %67 = vector.multi_reduction <add>, %66, %cst_39 [1] : vector<3x288xf32> to vector<3xf32>
    %68 = vector.shape_cast %67 : vector<3xf32> to vector<3x1xf32>
    %cst_40 = arith.constant 1.000000e+00 : f32
    %69 = vector.broadcast %cst_40 : f32 to vector<3x1xf32>
    %70 = arith.mulf %69, %68 : vector<3x1xf32>
    %c0_41 = arith.constant 0 : index
    %c0_42 = arith.constant 0 : index
    %c0_43 = arith.constant 0 : index
    %71 = vector.load %arg8[%c0_41, %c0_42, %c0_43] : memref<1x3x1xf32, #tpu.memory_space<vmem>>, vector<1x3x1xf32>
    %72 = vector.shape_cast %71 : vector<1x3x1xf32> to vector<3x1xf32>
    %73 = vector.shape_cast %70 : vector<3x1xf32> to vector<1x3x1xf32>
    tpu.vector_store %arg8[%c0_41, %c0_42, %c0_43], %73 {strides = array<i32>} : memref<1x3x1xf32, #tpu.memory_space<vmem>>, vector<1x3x1xf32>,
    %74 = arith.mulf %66, %66 : vector<3x288xf32>
    %cst_44 = arith.constant dense<0.000000e+00> : vector<3xf32>
    %75 = vector.multi_reduction <add>, %74, %cst_44 [1] : vector<3x288xf32> to vector<3xf32>
    %76 = vector.shape_cast %75 : vector<3xf32> to vector<3x1xf32>
    %cst_45 = arith.constant 1.000000e+00 : f32
    %77 = vector.broadcast %cst_45 : f32 to vector<3x1xf32>
    %78 = arith.mulf %77, %76 : vector<3x1xf32>
    %c0_46 = arith.constant 0 : index
    %c0_47 = arith.constant 0 : index
    %c0_48 = arith.constant 0 : index
    %79 = vector.load %arg9[%c0_46, %c0_47, %c0_48] : memref<1x3x1xf32, #tpu.memory_space<vmem>>, vector<1x3x1xf32>
    %80 = vector.shape_cast %79 : vector<1x3x1xf32> to vector<3x1xf32>
    %81 = vector.shape_cast %78 : vector<3x1xf32> to vector<1x3x1xf32>
    tpu.vector_store %arg9[%c0_46, %c0_47, %c0_48], %81 {strides = array<i32>} : memref<1x3x1xf32, #tpu.memory_space<vmem>>, vector<1x3x1xf32>,
    return
  }
  func.func @transform_0(%arg0: i32) -> (i32, i32, i32) {
    %c0_i32 = arith.constant 0 : i32
    %c0_i32_0 = arith.constant 0 : i32
    %c0_i32_1 = arith.constant 0 : i32
    return %arg0, %c0_i32, %c0_i32_0 : i32, i32, i32
  }
  func.func @transform_1(%arg0: i32) -> (i32, i32, i32) {
    %c0_i32 = arith.constant 0 : i32
    %c0_i32_0 = arith.constant 0 : i32
    %c0_i32_1 = arith.constant 0 : i32
    %c0_i32_2 = arith.constant 0 : i32
    return %c0_i32, %c0_i32_0, %c0_i32_1 : i32, i32, i32
  }
  func.func @transform_2(%arg0: i32) -> (i32, i32) {
    %c0_i32 = arith.constant 0 : i32
    %c0_i32_0 = arith.constant 0 : i32
    %c0_i32_1 = arith.constant 0 : i32
    return %c0_i32, %c0_i32_0 : i32, i32
  }
  func.func @transform_3(%arg0: i32) -> (i32, i32) {
    %c0_i32 = arith.constant 0 : i32
    %c0_i32_0 = arith.constant 0 : i32
    %c0_i32_1 = arith.constant 0 : i32
    return %c0_i32, %c0_i32_0 : i32, i32
  }
  func.func @transform_4(%arg0: i32) -> (i32, i32) {
    %c0_i32 = arith.constant 0 : i32
    %c0_i32_0 = arith.constant 0 : i32
    %c0_i32_1 = arith.constant 0 : i32
    return %c0_i32, %c0_i32_0 : i32, i32
  }
  func.func @transform_5(%arg0: i32) -> (i32, i32) {
    %c0_i32 = arith.constant 0 : i32
    %c0_i32_0 = arith.constant 0 : i32
    %c0_i32_1 = arith.constant 0 : i32
    return %c0_i32, %c0_i32_0 : i32, i32
  }
  func.func @transform_6(%arg0: i32) -> (i32, i32, i32) {
    %c0_i32 = arith.constant 0 : i32
    %c0_i32_0 = arith.constant 0 : i32
    %c0_i32_1 = arith.constant 0 : i32
    return %arg0, %c0_i32, %c0_i32_0 : i32, i32, i32
  }
  func.func @transform_7(%arg0: i32) -> (i32, i32, i32) {
    %c0_i32 = arith.constant 0 : i32
    %c0_i32_0 = arith.constant 0 : i32
    %c0_i32_1 = arith.constant 0 : i32
    return %arg0, %c0_i32, %c0_i32_0 : i32, i32, i32
  }
  func.func @transform_8(%arg0: i32) -> (i32, i32, i32) {
    %c0_i32 = arith.constant 0 : i32
    %c0_i32_0 = arith.constant 0 : i32
    %c0_i32_1 = arith.constant 0 : i32
    return %arg0, %c0_i32, %c0_i32_0 : i32, i32, i32
  }
}

module attributes {stable_mosaic.version = 11 : i64} {
  func.func @_final_kernel(%arg0: i32, %arg1: memref<1x3x16x18xf32, #tpu.memory_space<vmem>>, %arg2: memref<3x1x1xf32, #tpu.memory_space<vmem>>, %arg3: memref<3x1x1xf32, #tpu.memory_space<vmem>>, %arg4: memref<18x32xbf16, #tpu.memory_space<vmem>>, %arg5: memref<32x16xbf16, #tpu.memory_space<vmem>>, %arg6: memref<1x3x32x32xf32, #tpu.memory_space<vmem>>) attributes {dimension_semantics = [#tpu.dimension_semantics<parallel>], iteration_bounds = array<i64: 2>, scalar_prefetch = 0 : i64, scratch_operands = 0 : i64, tpu.core_type = #tpu.core_type<tc>, window_params = [{transform_indices = @transform_0, window_bounds = array<i64: 1, 3, 16, 18>}, {pipeline_mode = #tpu.pipeline_mode<synchronous>, transform_indices = @transform_1, window_bounds = array<i64: 3, 1, 1>}, {pipeline_mode = #tpu.pipeline_mode<synchronous>, transform_indices = @transform_2, window_bounds = array<i64: 3, 1, 1>}, {pipeline_mode = #tpu.pipeline_mode<synchronous>, transform_indices = @transform_3, window_bounds = array<i64: 18, 32>}, {pipeline_mode = #tpu.pipeline_mode<synchronous>, transform_indices = @transform_4, window_bounds = array<i64: 32, 16>}, {transform_indices = @transform_5, window_bounds = array<i64: 1, 3, 32, 32>}]} {
    %c0 = arith.constant 0 : index
    %c0_0 = arith.constant 0 : index
    %c0_1 = arith.constant 0 : index
    %c0_2 = arith.constant 0 : index
    %0 = vector.load %arg1[%c0, %c0_0, %c0_1, %c0_2] : memref<1x3x16x18xf32, #tpu.memory_space<vmem>>, vector<1x3x16x18xf32>
    %1 = vector.shape_cast %0 : vector<1x3x16x18xf32> to vector<3x16x18xf32>
    %c0_3 = arith.constant 0 : index
    %c0_4 = arith.constant 0 : index
    %c0_5 = arith.constant 0 : index
    %2 = vector.load %arg2[%c0_3, %c0_4, %c0_5] : memref<3x1x1xf32, #tpu.memory_space<vmem>>, vector<3x1x1xf32>
    %3 = vector.broadcast %2 : vector<3x1x1xf32> to vector<3x16x18xf32>
    %4 = arith.mulf %1, %3 : vector<3x16x18xf32>
    %c0_6 = arith.constant 0 : index
    %c0_7 = arith.constant 0 : index
    %c0_8 = arith.constant 0 : index
    %5 = vector.load %arg3[%c0_6, %c0_7, %c0_8] : memref<3x1x1xf32, #tpu.memory_space<vmem>>, vector<3x1x1xf32>
    %6 = vector.broadcast %5 : vector<3x1x1xf32> to vector<3x16x18xf32>
    %7 = arith.addf %4, %6 : vector<3x16x18xf32>
    %cst = arith.constant 5.000000e-01 : f32
    %8 = vector.broadcast %cst : f32 to vector<3x16x18xf32>
    %9 = arith.mulf %8, %7 : vector<3x16x18xf32>
    %10 = math.tanh %9 : vector<3x16x18xf32>
    %cst_9 = arith.constant 5.000000e-01 : f32
    %11 = vector.broadcast %cst_9 : f32 to vector<3x16x18xf32>
    %12 = arith.mulf %11, %10 : vector<3x16x18xf32>
    %cst_10 = arith.constant 5.000000e-01 : f32
    %13 = vector.broadcast %cst_10 : f32 to vector<3x16x18xf32>
    %14 = arith.addf %12, %13 : vector<3x16x18xf32>
    %15 = arith.truncf %14 : vector<3x16x18xf32> to vector<3x16x18xbf16>
    %16 = arith.extf %15 : vector<3x16x18xbf16> to vector<3x16x18xf32>
    %17 = arith.subf %14, %16 : vector<3x16x18xf32>
    %18 = arith.truncf %17 : vector<3x16x18xf32> to vector<3x16x18xbf16>
    %c0_11 = arith.constant 0 : index
    %c0_12 = arith.constant 0 : index
    %19 = vector.load %arg4[%c0_11, %c0_12] : memref<18x32xbf16, #tpu.memory_space<vmem>>, vector<18x32xbf16>
    %c0_13 = arith.constant 0 : index
    %c0_14 = arith.constant 0 : index
    %20 = vector.load %arg5[%c0_13, %c0_14] : memref<32x16xbf16, #tpu.memory_space<vmem>>, vector<32x16xbf16>
    %21 = vector.extract_strided_slice %15 {offsets = [0, 0, 0], sizes = [1, 16, 18], strides = [1, 1, 1]} : vector<3x16x18xbf16> to vector<1x16x18xbf16>
    %22 = vector.shape_cast %21 : vector<1x16x18xbf16> to vector<16x18xbf16>
    %cst_15 = arith.constant dense<0.000000e+00> : vector<16x32xf32>
    %23 = tpu.matmul %22, %19, %cst_15 {dimension_numbers = #tpu.dot_dimension_numbers<[1], [0], [0], [1], [0, 0, 1, 1], [], []>} : vector<16x18xbf16>, vector<18x32xbf16>, vector<16x32xf32> -> vector<16x32xf32>
    %24 = arith.truncf %23 : vector<16x32xf32> to vector<16x32xbf16>
    %cst_16 = arith.constant dense<0.000000e+00> : vector<32x32xf32>
    %25 = tpu.matmul %20, %24, %cst_16 {dimension_numbers = #tpu.dot_dimension_numbers<[1], [0], [0], [1], [0, 0, 1, 1], [], []>} : vector<32x16xbf16>, vector<16x32xbf16>, vector<32x32xf32> -> vector<32x32xf32>
    %26 = vector.extract_strided_slice %18 {offsets = [0, 0, 0], sizes = [1, 16, 18], strides = [1, 1, 1]} : vector<3x16x18xbf16> to vector<1x16x18xbf16>
    %27 = vector.shape_cast %26 : vector<1x16x18xbf16> to vector<16x18xbf16>
    %cst_17 = arith.constant dense<0.000000e+00> : vector<16x32xf32>
    %28 = tpu.matmul %27, %19, %cst_17 {dimension_numbers = #tpu.dot_dimension_numbers<[1], [0], [0], [1], [0, 0, 1, 1], [], []>} : vector<16x18xbf16>, vector<18x32xbf16>, vector<16x32xf32> -> vector<16x32xf32>
    %29 = arith.truncf %28 : vector<16x32xf32> to vector<16x32xbf16>
    %cst_18 = arith.constant dense<0.000000e+00> : vector<32x32xf32>
    %30 = tpu.matmul %20, %29, %cst_18 {dimension_numbers = #tpu.dot_dimension_numbers<[1], [0], [0], [1], [0, 0, 1, 1], [], []>} : vector<32x16xbf16>, vector<16x32xbf16>, vector<32x32xf32> -> vector<32x32xf32>
    %31 = arith.addf %25, %30 : vector<32x32xf32>
    %c0_19 = arith.constant 0 : index
    %c0_20 = arith.constant 0 : index
    %c0_21 = arith.constant 0 : index
    %c0_22 = arith.constant 0 : index
    %32 = vector.load %arg6[%c0_19, %c0_20, %c0_21, %c0_22] : memref<1x3x32x32xf32, #tpu.memory_space<vmem>>, vector<1x1x32x32xf32>
    %33 = vector.shape_cast %32 : vector<1x1x32x32xf32> to vector<32x32xf32>
    %34 = vector.shape_cast %31 : vector<32x32xf32> to vector<1x1x32x32xf32>
    tpu.vector_store %arg6[%c0_19, %c0_20, %c0_21, %c0_22], %34 {strides = array<i32>} : memref<1x3x32x32xf32, #tpu.memory_space<vmem>>, vector<1x1x32x32xf32>,
    %35 = vector.extract_strided_slice %15 {offsets = [1, 0, 0], sizes = [1, 16, 18], strides = [1, 1, 1]} : vector<3x16x18xbf16> to vector<1x16x18xbf16>
    %36 = vector.shape_cast %35 : vector<1x16x18xbf16> to vector<16x18xbf16>
    %cst_23 = arith.constant dense<0.000000e+00> : vector<16x32xf32>
    %37 = tpu.matmul %36, %19, %cst_23 {dimension_numbers = #tpu.dot_dimension_numbers<[1], [0], [0], [1], [0, 0, 1, 1], [], []>} : vector<16x18xbf16>, vector<18x32xbf16>, vector<16x32xf32> -> vector<16x32xf32>
    %38 = arith.truncf %37 : vector<16x32xf32> to vector<16x32xbf16>
    %cst_24 = arith.constant dense<0.000000e+00> : vector<32x32xf32>
    %39 = tpu.matmul %20, %38, %cst_24 {dimension_numbers = #tpu.dot_dimension_numbers<[1], [0], [0], [1], [0, 0, 1, 1], [], []>} : vector<32x16xbf16>, vector<16x32xbf16>, vector<32x32xf32> -> vector<32x32xf32>
    %40 = vector.extract_strided_slice %18 {offsets = [1, 0, 0], sizes = [1, 16, 18], strides = [1, 1, 1]} : vector<3x16x18xbf16> to vector<1x16x18xbf16>
    %41 = vector.shape_cast %40 : vector<1x16x18xbf16> to vector<16x18xbf16>
    %cst_25 = arith.constant dense<0.000000e+00> : vector<16x32xf32>
    %42 = tpu.matmul %41, %19, %cst_25 {dimension_numbers = #tpu.dot_dimension_numbers<[1], [0], [0], [1], [0, 0, 1, 1], [], []>} : vector<16x18xbf16>, vector<18x32xbf16>, vector<16x32xf32> -> vector<16x32xf32>
    %43 = arith.truncf %42 : vector<16x32xf32> to vector<16x32xbf16>
    %cst_26 = arith.constant dense<0.000000e+00> : vector<32x32xf32>
    %44 = tpu.matmul %20, %43, %cst_26 {dimension_numbers = #tpu.dot_dimension_numbers<[1], [0], [0], [1], [0, 0, 1, 1], [], []>} : vector<32x16xbf16>, vector<16x32xbf16>, vector<32x32xf32> -> vector<32x32xf32>
    %45 = arith.addf %39, %44 : vector<32x32xf32>
    %c0_27 = arith.constant 0 : index
    %c1 = arith.constant 1 : index
    %c0_28 = arith.constant 0 : index
    %c0_29 = arith.constant 0 : index
    %46 = vector.load %arg6[%c0_27, %c1, %c0_28, %c0_29] : memref<1x3x32x32xf32, #tpu.memory_space<vmem>>, vector<1x1x32x32xf32>
    %47 = vector.shape_cast %46 : vector<1x1x32x32xf32> to vector<32x32xf32>
    %48 = vector.shape_cast %45 : vector<32x32xf32> to vector<1x1x32x32xf32>
    tpu.vector_store %arg6[%c0_27, %c1, %c0_28, %c0_29], %48 {strides = array<i32>} : memref<1x3x32x32xf32, #tpu.memory_space<vmem>>, vector<1x1x32x32xf32>,
    %49 = vector.extract_strided_slice %15 {offsets = [2, 0, 0], sizes = [1, 16, 18], strides = [1, 1, 1]} : vector<3x16x18xbf16> to vector<1x16x18xbf16>
    %50 = vector.shape_cast %49 : vector<1x16x18xbf16> to vector<16x18xbf16>
    %cst_30 = arith.constant dense<0.000000e+00> : vector<16x32xf32>
    %51 = tpu.matmul %50, %19, %cst_30 {dimension_numbers = #tpu.dot_dimension_numbers<[1], [0], [0], [1], [0, 0, 1, 1], [], []>} : vector<16x18xbf16>, vector<18x32xbf16>, vector<16x32xf32> -> vector<16x32xf32>
    %52 = arith.truncf %51 : vector<16x32xf32> to vector<16x32xbf16>
    %cst_31 = arith.constant dense<0.000000e+00> : vector<32x32xf32>
    %53 = tpu.matmul %20, %52, %cst_31 {dimension_numbers = #tpu.dot_dimension_numbers<[1], [0], [0], [1], [0, 0, 1, 1], [], []>} : vector<32x16xbf16>, vector<16x32xbf16>, vector<32x32xf32> -> vector<32x32xf32>
    %54 = vector.extract_strided_slice %18 {offsets = [2, 0, 0], sizes = [1, 16, 18], strides = [1, 1, 1]} : vector<3x16x18xbf16> to vector<1x16x18xbf16>
    %55 = vector.shape_cast %54 : vector<1x16x18xbf16> to vector<16x18xbf16>
    %cst_32 = arith.constant dense<0.000000e+00> : vector<16x32xf32>
    %56 = tpu.matmul %55, %19, %cst_32 {dimension_numbers = #tpu.dot_dimension_numbers<[1], [0], [0], [1], [0, 0, 1, 1], [], []>} : vector<16x18xbf16>, vector<18x32xbf16>, vector<16x32xf32> -> vector<16x32xf32>
    %57 = arith.truncf %56 : vector<16x32xf32> to vector<16x32xbf16>
    %cst_33 = arith.constant dense<0.000000e+00> : vector<32x32xf32>
    %58 = tpu.matmul %20, %57, %cst_33 {dimension_numbers = #tpu.dot_dimension_numbers<[1], [0], [0], [1], [0, 0, 1, 1], [], []>} : vector<32x16xbf16>, vector<16x32xbf16>, vector<32x32xf32> -> vector<32x32xf32>
    %59 = arith.addf %53, %58 : vector<32x32xf32>
    %c0_34 = arith.constant 0 : index
    %c2 = arith.constant 2 : index
    %c0_35 = arith.constant 0 : index
    %c0_36 = arith.constant 0 : index
    %60 = vector.load %arg6[%c0_34, %c2, %c0_35, %c0_36] : memref<1x3x32x32xf32, #tpu.memory_space<vmem>>, vector<1x1x32x32xf32>
    %61 = vector.shape_cast %60 : vector<1x1x32x32xf32> to vector<32x32xf32>
    %62 = vector.shape_cast %59 : vector<32x32xf32> to vector<1x1x32x32xf32>
    tpu.vector_store %arg6[%c0_34, %c2, %c0_35, %c0_36], %62 {strides = array<i32>} : memref<1x3x32x32xf32, #tpu.memory_space<vmem>>, vector<1x1x32x32xf32>,
    return
  }
  func.func @transform_0(%arg0: i32) -> (i32, i32, i32, i32) {
    %c0_i32 = arith.constant 0 : i32
    %c0_i32_0 = arith.constant 0 : i32
    %c0_i32_1 = arith.constant 0 : i32
    %c0_i32_2 = arith.constant 0 : i32
    return %arg0, %c0_i32, %c0_i32_0, %c0_i32_1 : i32, i32, i32, i32
  }
  func.func @transform_1(%arg0: i32) -> (i32, i32, i32) {
    %c0_i32 = arith.constant 0 : i32
    %c0_i32_0 = arith.constant 0 : i32
    %c0_i32_1 = arith.constant 0 : i32
    %c0_i32_2 = arith.constant 0 : i32
    return %c0_i32, %c0_i32_0, %c0_i32_1 : i32, i32, i32
  }
  func.func @transform_2(%arg0: i32) -> (i32, i32, i32) {
    %c0_i32 = arith.constant 0 : i32
    %c0_i32_0 = arith.constant 0 : i32
    %c0_i32_1 = arith.constant 0 : i32
    %c0_i32_2 = arith.constant 0 : i32
    return %c0_i32, %c0_i32_0, %c0_i32_1 : i32, i32, i32
  }
  func.func @transform_3(%arg0: i32) -> (i32, i32) {
    %c0_i32 = arith.constant 0 : i32
    %c0_i32_0 = arith.constant 0 : i32
    %c0_i32_1 = arith.constant 0 : i32
    return %c0_i32, %c0_i32_0 : i32, i32
  }
  func.func @transform_4(%arg0: i32) -> (i32, i32) {
    %c0_i32 = arith.constant 0 : i32
    %c0_i32_0 = arith.constant 0 : i32
    %c0_i32_1 = arith.constant 0 : i32
    return %c0_i32, %c0_i32_0 : i32, i32
  }
  func.func @transform_5(%arg0: i32) -> (i32, i32, i32, i32) {
    %c0_i32 = arith.constant 0 : i32
    %c0_i32_0 = arith.constant 0 : i32
    %c0_i32_1 = arith.constant 0 : i32
    %c0_i32_2 = arith.constant 0 : i32
    return %arg0, %c0_i32, %c0_i32_0, %c0_i32_1 : i32, i32, i32, i32
  }
}

</mosaic_0001>

<bundles_post_ra>
// kernel: upscaler_forward.4
= control target key start
LH: loop header
LB: loop body
LE: loop exit
PB: predicated region body
PF: predicated region fallthrough
CT: control target
= control target key end

     0   :  { %s323_s9 = smov 0   ;;  %s353_s0 = inlined_call_operand.vmem [shape: f32[2,3,384], index: 0, kind: input, shape index: {}]   ;;  %s354_s1 = inlined_call_operand.vmem [shape: f32[2,3,1], index: 1, kind: output, shape index: {0}]   ;;  %s355_s2 = inlined_call_operand.vmem [shape: f32[2,3,1], index: 2, kind: output, shape index: {1}]  }
   0x1 LB: > { %s281_s10 = sadd.s32 4294967295, %s306_s9   ;;  %p285_p0 = scmp.ge.s32.totalorder %s306_s9, 1  ;;  %s306_s9 = sphi %s323_s9, %s13_s9  }
   0x2   : > { %p115_p1 = scmp.lt.s32.totalorder %s306_s9, 3 }
   0x4   : > { %p116_p2 = pnand %p285_p0, %p115_p1 }
   0x5   : > { %p140_p3 = scmp.lt.s32.totalorder (!%p116_p2), %s281_s10, 1 }
   0x6   : > { %119 = sbr.rel (%p116_p2) target bundleno = 155 (0x9b), region = 24 }
   0xb   : > { %s357_s10 = smov (!%p140_p3, %s281_s10), 1  ;;  %vm166_vm0 = vcmask 1042432   ;;  %vm174_vm1 = vcmask 2048  }
   0xc   : > { %s291_s11 = smul.u32 12, %s357_s10  ;;  %s287_s15 = sshll.u32 %s357_s10, 2 }
   0xd   : > { %s148_s18 = scalar_lea.vmem %s354_s1, %s287_s15  ;;  %s152_s21 = scalar_lea.vmem %s355_s2, %s287_s15 }
   0xe   : > { %s144_s14 = scalar_lea.vmem %s353_s0, %s291_s11 }
   0xf   : > { %v153_v0 = vld [vmem:[%s144_s14] sm:$0x77]  ;;  %v154_v1 = vld [vmem:[%s144_s14 + $0x8] sm:$0x7] }
  0x10   : > { %157 = vst [vmem:[#allocation1] ss:$2 sm:$0xff] %v153_v0  ;;  %v176_v2 = vmul.f32 %v153_v0, %v153_v0  ;;  %v177_v3 = vmul.f32 %v154_v1, %v154_v1 }
  0x11   : > { %159 = vst [vmem:[#allocation1 + $0x10] ss:$2 sm:$0xff] %v154_v1 }
  0x17   : > { %v160_v4 = vld.sshfl [vmem:[#allocation1] sm:$0xff pattern:$0x75316420]  ;;  %v161_v5 = vld.sshfl [vmem:[#allocation1 + $0x8] sm:$0xff pattern:$0x75316420] }
  0x18   : > { %v162_v6 = vld.sshfl [vmem:[#allocation1 + $0x10] sm:$0xff pattern:$0x75316420]  ;;  %v167_v7 = vsel %vm166_vm0, %v160_v4, 0.0  ;;  %v168_v8 = vsel %vm166_vm0, %v161_v5, 0.0 }
  0x19   : > { %v169_v9 = vadd.f32 %v168_v8, %v167_v7  ;;  %v170_v10 = vsel %vm166_vm0, %v162_v6, 0.0  ;;  %180 = vst [vmem:[#allocation1] ss:$2 sm:$0xff] %v176_v2 }
  0x1a   : > { %182 = vst [vmem:[#allocation1 + $0x10] ss:$2 sm:$0xff] %v177_v3 }
  0x1b   : > { %v171_v11 = vadd.f32 %v170_v10, %v169_v9 }
  0x1d   : > { %172 = vadd.xlane.f32.xlu0 %v171_v11 }
  0x20   : > { %v183_v12 = vld.sshfl [vmem:[#allocation1] sm:$0xff pattern:$0x75316420]  ;;  %v184_v13 = vld.sshfl [vmem:[#allocation1 + $0x8] sm:$0xff pattern:$0x75316420] }
  0x21   : > { %v185_v14 = vld.sshfl [vmem:[#allocation1 + $0x10] sm:$0xff pattern:$0x75316420]  ;;  %v189_v15 = vsel %vm166_vm0, %v183_v12, 0.0  ;;  %v190_v16 = vsel %vm166_vm0, %v184_v13, 0.0 }
  0x22   : > { %v191_v17 = vadd.f32 %v190_v16, %v189_v15  ;;  %v192_v18 = vsel %vm166_vm0, %v185_v14, 0.0 }
  0x24   : > { %v193_v19 = vadd.f32 %v192_v18, %v191_v17 }
  0x26   : > { %194 = vadd.xlane.f32.xlu0 %v193_v19 }
  0x90   : > { %v173_v20 = vpop.xlane.xlu0 %172 }
  0x91   : > { %175 = vst.msk [vmem:[%s148_s18] sm:$0x7] %vm174_vm1, %v173_v20 }
  0x99   : > { %v195_v21 = vpop.xlane.xlu0 %194 }
  0x9a   : > { %196 = vst.msk [vmem:[%s152_s21] sm:$0x7] %vm174_vm1, %v195_v21 }
  0x9b PF: > { %s13_s9 = sadd.s32 1, %s306_s9  }
  0x9c   : > { %p10_p4 = scmp.ge.s32.totalorder %s13_s9, 4  }
  0x9e   :  { %12 = sbr.rel (!%p10_p4) target bundleno = 1 (0x1), region = 68 }

// kernel: upscaler_forward.7
= control target key start
LH: loop header
LB: loop body
LE: loop exit
PB: predicated region body
PF: predicated region fallthrough
CT: control target
= control target key end

     0   :  { %10 = vsyncpa [#allocation3], 0  ;;  %s1123_s0 = inlined_call_operand.vmem [shape: f32[2,3,16,18], index: 0, kind: input, shape index: {}]   ;;  %s1124_s1 = inlined_call_operand.vmem [shape: f32[3,1,1], index: 1, kind: input, shape index: {}]   ;;  %s1125_s2 = inlined_call_operand.vmem [shape: f32[3,1,1], index: 2, kind: input, shape index: {}]   ;;  %s1126_s3 = inlined_call_operand.vmem [shape: bf16[18,32], index: 3, kind: input, shape index: {}]   ;;  %s1127_s4 = inlined_call_operand.vmem [shape: bf16[32,16], index: 4, kind: input, shape index: {}]   ;;  %s1128_s5 = inlined_call_operand.hbm [shape: f32[2,3,32,32], index: 5, kind: output, shape index: {}]  }
   0x1   :  { %12 = vsyncpa [#allocation3 + $0x1], 0  ;;  %s927_s18 = smov 0   ;;  %s929_s19 = smov 0  }
   0x2   :  { %s931_s20 = smov 0   ;;  %s933_s21 = smov 0  }
   0x3 LB: > { %s948_s22 = sadd.s32 4294967295, %s892_s21   ;;  %s715_s23 = sadd.s32 4294967294, %s892_s21   ;;  %s892_s21 = sphi %s933_s21, %s1134_s21   ;;  %s888_s20 = sphi %s931_s20, %s1133_s20   ;;  %s884_s19 = sphi %s929_s19, %s1132_s19   ;;  %s880_s18 = sphi %s927_s18, %s1131_s18  }
   0x4   : > { %s952_s24 = sadd.s32 1, %s892_s21   ;;  %s135_s25 = sadd.s32 1, %s888_s20 }
   0x5   : > { %s132_s26 = ssub.s32 %s892_s21, %s952_s24  ;;  %p145_p0 = scmp.ne.s32.totalorder %s888_s20, %s884_s19 }
   0x6   : > { %p133_p1 = scmp.eq.s32.totalorder %s132_s26, 0  ;;  %p146_p2 = scmp.eq.s32.totalorder %s948_s22, 1 }
   0x7   : > { %p151_p3 = scmp.ne.s32.totalorder %s884_s19, %s880_s18  ;;  %p152_p4 = scmp.eq.s32.totalorder %s715_s23, 1 }
   0x8   : > { %s963_s27 = scalar_select %p133_p1, %s888_s20, %s135_s25  }
   0x9   : > { %p965_p5 = por %p146_p2, %p145_p0  ;;  %p969_p6 = por %p152_p4, %p151_p3 }
   0xa   : > { %p718_p7 = scmp.ge.s32.totalorder %s892_s21, 1  ;;  %p190_p8 = scmp.lt.s32.totalorder %s892_s21, 3 }
   0xc   : > { %p191_p9 = pnand %p718_p7, %p190_p8 }
   0xd   : > { %p218_p10 = scmp.lt.s32.totalorder (!%p191_p9), %s948_s22, 1 }
   0xe   : > { %194 = sbr.rel (%p191_p9) target bundleno = 650 (0x28a), region = 40 }
  0x13   : > { %v812_v0 = vld [vmem:[%s1124_s1] ss:$0 sm:$0xff]  ;;  %v894_v1 = vmov 0   ;;  %v334_v3 = vld [vmem:[%s1126_s3 + $0x8] sm:$0x1]  ;;  %vm357_vm0 = vcmask 1040384  }
  0x14   : > { %809 = vset.pattern.permute.xlu0 %v894_v1  ;;  %810 = vset.pattern.permute.xlu1 %v894_v1  ;;  %v813_v2 = vld [vmem:[%s1125_s2] ss:$0 sm:$0xff]  ;;  %v349_v4 = vunpack.c.l.b16 %v334_v3  ;;  %s219_s11 = scalar_select %p218_p10, %s948_s22, 1  ;;  %v814_v11 = vld [vmem:[%s1124_s1 + $0x1] ss:$0 sm:$0xff]  ;;  %vm353_vm1 = vcmask 146432  }
  0x15   : > { %240 = vperm.xlu0 %809, %v812_v0   ;;  %811 = vset.pattern.permute.xlu2 %v894_v1  ;;  %v993_v7 = vld [vmem:[%s1126_s3] sm:$0xff]  ;;  %vm409_vm2 = vcmask 130048   ;;  %vm454_vm3 = vcmask 261120  }
  0x16   : > { %v351_v5 = vpack.c.b16 %v349_v4, %v349_v4  ;;  %s765_s14 = smul.u32 48, %s219_s11  ;;  %v816_v12 = vld [vmem:[%s1124_s1 + $0x2] ss:$0 sm:$0xff]  ;;  %244 = vperm.xlu1 %810, %v814_v11   ;;  %v815_v20 = vld [vmem:[%s1125_s2 + $0x1] ss:$0 sm:$0xff]  ;;  %s850_s11 = scalar_lea.hbm %s1128_s5, 192 }
  0x17   : > { %248 = vperm.xlu2 %811, %v816_v12   ;;  %v817_v21 = vld [vmem:[%s1125_s2 + $0x2] ss:$0 sm:$0xff] }
  0x18   : > { %v985_v6 = vsel %vm357_vm0, %v351_v5, 0  ;;  %s1002_s17 = scalar_lea.vmem %s1123_s0, %s765_s14  ;;  %s215_s14 = sand.u32 1, %s884_s19  }
  0x19   : > { %367 = vmatpush.bf16.msra.mxu0 %v985_v6  ;;  %390 = vmatpush.bf16.msra.mxu1 %v985_v6  ;;  %v224_v9 = vld [vmem:[%s1002_s17] sm:$0xff]  ;;  %v225_v10 = vld [vmem:[%s1002_s17 + $0x8] sm:$0xff]  ;;  %v226_v53 = vld [vmem:[%s1002_s17 + $0x10] sm:$0xff]  ;;  %s764_s15 = smul.u32 96, %s215_s14 }
  0x1a   : > { %v228_v43 = vld [vmem:[%s1002_s17 + $0x20] sm:$0xff]  ;;  %v229_v44 = vld [vmem:[%s1002_s17 + $0x28] sm:$0xff]  ;;  %v227_v54 = vld [vmem:[%s1002_s17 + $0x18] sm:$0xff]  ;;  %s766_s17 = smul.u32 96, %s948_s22  ;;  %s638_s22 = scalar_lea.sflag [#allocation3], %s215_s14 }
  0x1b   : > { %s1055_s16 = scalar_lea.vmem [#allocation2], %s764_s15 }
  0x1c   : > { %s649_s26 = scalar_lea.hbm %s1128_s5, %s766_s17  ;;  %s650_s30 = sshll.u32 %s1055_s16, 4  ;;  %s651_s30 = int_to_ptr.vmem [resolvable:$true] %s650_s30 }
  0x1d   : > { %267 = vperm.xlu0 %809, %v813_v2   ;;  %368 = vmatpush.bf16.msra.mxu0 %v993_v7  ;;  %s652_s6 = sshll.u32 %s649_s26, 4  ;;  %s653_s6 = int_to_ptr.hbm [resolvable:$true] %s652_s6 }
  0x1e   : > { %391 = vmatpush.bf16.msra.mxu1 %v993_v7  ;;  %271 = vperm.xlu1 %810, %v815_v20   ;;  %s844_s7 = sshra.s32 %s653_s6, 4  ;;  %s845_s7 = int_to_ptr.hbm [resolvable:$true] %s844_s7 }
  0x1f   : > { %275 = vperm.xlu2 %811, %v817_v21   ;;  %s846_s8 = scalar_lea.hbm %s845_s7, 96  ;;  %p851_p0 = scmp.lt.s32.totalorder %s845_s7, %s1128_s5 }
  0x20   : > { %p847_p11 = scmp.ne.s32.totalorder %s845_s7, %s846_s8  ;;  %p852_p1 = scmp.lt.s32.totalorder %s850_s11, %s846_s8 }
  0x21   : > { %562 = vmatpush.bf16.msrb.mxu0 %v985_v6 }
  0x22   : > { %585 = vmatpush.bf16.msrb.mxu1 %v985_v6  ;;  %p848_p12 = pnand %p847_p11, %p965_p5  ;;  %p853_p2 = por %p852_p1, %p851_p0 }
  0x24   : > { %p849_p13 = pneg %p848_p12 }
  0x25   : > { %563 = vmatpush.bf16.msrb.mxu0 %v993_v7 }
  0x26   : > { %586 = vmatpush.bf16.msrb.mxu1 %v993_v7  ;;  %p854_p3 = pnand %p853_p2, %p849_p13 }
  0x71   : > { %v249_v42 = vpop.permute.xlu2 %248 }
  0x72   : > { %v255_v45 = vmul.f32 %v249_v42, %v228_v43  ;;  %v256_v46 = vmul.f32 %v249_v42, %v229_v44 }
  0x79   : > { %v276_v47 = vpop.permute.xlu2 %275 }
  0x7a   : > { %v282_v48 = vadd.f32 %v276_v47, %v255_v45  ;;  %v283_v49 = vadd.f32 %v276_v47, %v256_v46 }
  0x7c   : > { %v288_v51 = vmul.f32 0.5, %v282_v48  ;;  %v289_v52 = vmul.f32 0.5, %v283_v49 }
  0x87   : > { %v241_v8 = vpop.permute.xlu0 %240 }
  0x88   : > { %v251_v13 = vmul.f32 %v241_v8, %v224_v9  ;;  %v252_v14 = vmul.f32 %v241_v8, %v225_v10  ;;  %v245_v50 = vpop.permute.xlu1 %244 }
  0x89   : > { %v253_v57 = vmul.f32 %v245_v50, %v226_v53  ;;  %v254_v59 = vmul.f32 %v245_v50, %v227_v54 }
  0x8f   : > { %v268_v15 = vpop.permute.xlu0 %267 }
  0x90   : > { %v278_v16 = vadd.f32 %v268_v15, %v251_v13  ;;  %v279_v17 = vadd.f32 %v268_v15, %v252_v14  ;;  %v272_v60 = vpop.permute.xlu1 %271 }
  0x91   : > { %v280_v0 = vadd.f32 %v272_v60, %v253_v57  ;;  %v281_v2 = vadd.f32 %v272_v60, %v254_v59 }
  0x92   : > { %v284_v18 = vmul.f32 0.5, %v278_v16  ;;  %v285_v19 = vmul.f32 0.5, %v279_v17 }
  0x93   : > { %v286_v11 = vmul.f32 0.5, %v280_v0  ;;  %v287_v13 = vmul.f32 0.5, %v281_v2 }
  0x94   : > { %818 = vtanh.f32 %v284_v18 }
  0x95   : > { %820 = vtanh.f32 %v285_v19 }
  0x96   : > { %822 = vtanh.f32 %v288_v51 }
  0x97   : > { %824 = vtanh.f32 %v289_v52 }
  0x98   : > { %826 = vtanh.f32 %v286_v11 }
  0x99   : > { %828 = vtanh.f32 %v287_v13 }
  0x9a   : > { %v819_v22 = vpop.eup %818 }
  0x9b   : > { %v821_v23 = vpop.eup %820  ;;  %v296_v24 = vmul.f32 0.5, %v819_v22 }
  0x9c   : > { %v297_v25 = vmul.f32 0.5, %v821_v23  ;;  %v823_v55 = vpop.eup %822 }
  0x9d   : > { %v302_v26 = vadd.f32 0.5, %v296_v24  ;;  %v825_v56 = vpop.eup %824  ;;  %v300_v58 = vmul.f32 0.5, %v823_v55  ;;  %v1030_v24 = vld [vmem:[%s1127_s4] sm:$0xff] }
  0x9e   : > { %v303_v27 = vadd.f32 0.5, %v297_v25  ;;  %v301_v61 = vmul.f32 0.5, %v825_v56  ;;  %v827_v25 = vpop.eup %826 }
  0x9f   : > { %v308_v28 = vpack.c.bf16 %v302_v26, %v302_v26  ;;  %v306_v62 = vadd.f32 0.5, %v300_v58 }
  0xa0   : > { %v309_v29 = vpack.c.bf16 %v303_v27, %v303_v27  ;;  %v307_v63 = vadd.f32 0.5, %v301_v61 }
  0xa1   : > { %v314_v30 = vunpack.c.l.bf16 %v308_v28  ;;  %v341_v31 = vunpack.c.l.b16 %v308_v28  ;;  %v312_v1 = vpack.c.bf16 %v306_v62, %v306_v62 }
  0xa2   : > { %v315_v32 = vunpack.c.l.bf16 %v309_v29  ;;  %v342_v33 = vunpack.c.l.b16 %v309_v29  ;;  %v313_v3 = vpack.c.bf16 %v307_v63, %v307_v63  ;;  %v298_v29 = vmul.f32 0.5, %v827_v25 }
  0xa3   : > { %v320_v34 = vsub.f32 %v302_v26, %v314_v30  ;;  %v318_v5 = vunpack.c.l.bf16 %v312_v1  ;;  %v550_v8 = vunpack.c.l.b16 %v312_v1  ;;  %v829_v26 = vpop.eup %828 }
  0xa4   : > { %v321_v35 = vsub.f32 %v303_v27, %v315_v32  ;;  %v343_v36 = vpack.c.b16 %v342_v33, %v341_v31  ;;  %v319_v9 = vunpack.c.l.bf16 %v313_v3  ;;  %v551_v10 = vunpack.c.l.b16 %v313_v3 }
  0xa5   : > { %v326_v37 = vpack.c.bf16 %v320_v34, %v320_v34  ;;  %v324_v12 = vsub.f32 %v306_v62, %v318_v5  ;;  %v299_v30 = vmul.f32 0.5, %v829_v26  ;;  %v304_v31 = vadd.f32 0.5, %v298_v29 }
  0xa6   : > { %v327_v38 = vpack.c.bf16 %v321_v35, %v321_v35  ;;  %724 = vmatmul.msk.bf16.vlgmr.msra.gmra.mxu0 %vm353_vm1, %v343_v36  ;;  %v325_v14 = vsub.f32 %v307_v63, %v319_v9  ;;  %v552_v16 = vpack.c.b16 %v551_v10, %v550_v8  ;;  %v763_v35 = vld [vmem:[%s1127_s4 + $0x8] sm:$0xff] }
  0xa7   : > { %v378_v39 = vunpack.c.l.b16 %v326_v37  ;;  %v330_v15 = vpack.c.bf16 %v324_v12, %v324_v12  ;;  %v305_v32 = vadd.f32 0.5, %v299_v30  ;;  %v310_v33 = vpack.c.bf16 %v304_v31, %v304_v31 }
  0xa8   : > { %v379_v40 = vunpack.c.l.b16 %v327_v38  ;;  %v331_v17 = vpack.c.bf16 %v325_v14, %v325_v14 }
  0xa9   : > { %v573_v19 = vunpack.c.l.b16 %v330_v15  ;;  %v311_v34 = vpack.c.bf16 %v305_v32, %v305_v32  ;;  %v316_v36 = vunpack.c.l.bf16 %v310_v33  ;;  %v461_v43 = vunpack.c.l.b16 %v310_v33 }
  0xaa   : > { %v380_v41 = vpack.c.b16 %v379_v40, %v378_v39  ;;  %v574_v20 = vunpack.c.l.b16 %v331_v17 }
  0xab   : > { %v317_v37 = vunpack.c.l.bf16 %v311_v34  ;;  %v322_v38 = vsub.f32 %v304_v31, %v316_v36  ;;  %v462_v44 = vunpack.c.l.b16 %v311_v34 }
  0xac   : > { %725 = vmatmul.msk.bf16.vlgmr.msra.gmra.mxu1 %vm353_vm1, %v380_v41  ;;  %v575_v23 = vpack.c.b16 %v574_v20, %v573_v19 }
  0xad   : > { %v328_v39 = vpack.c.bf16 %v322_v38, %v322_v38  ;;  %v463_v45 = vpack.c.b16 %v462_v44, %v461_v43 }
  0xaf   : > { %v484_v41 = vunpack.c.l.b16 %v328_v39 }
  0xb6   : > { %748 = vmatmul.msk.bf16.vlgmr.msrb.gmra.mxu0 %vm353_vm1, %v552_v16 }
  0xbc   : > { %749 = vmatmul.msk.bf16.vlgmr.msrb.gmra.mxu1 %vm353_vm1, %v575_v23 }
 0x123   : > { %v370_v4 = vpop.f32.mrf.mxu0 }
 0x129   : > { %v393_v18 = vpop.f32.mrf.mxu1 }
 0x12b   : > { %v372_v21 = vpop.f32.mrf.mxu0 }
 0x12c   : > { %v375_v22 = vpack.c.bf16 %v372_v21, %v370_v4 }
 0x12e   : > { %442 = vmatpush.bf16.msra.mxu3 %v375_v22 }
 0x131   : > { %v395_v27 = vpop.f32.mrf.mxu1  ;;  %736 = vmatmul.msk.bf16.vlgmr.msra.gmra.mxu3 %vm409_vm2, %v1030_v24 }
 0x132   : > { %496 = vmatpush.bf16.msrb.mxu3 %v985_v6  ;;  %v398_v28 = vpack.c.bf16 %v395_v27, %v393_v18 }
 0x133   : > { %v565_v46 = vpop.f32.mrf.mxu0 }
 0x134   : > { %423 = vmatpush.bf16.msra.mxu2 %v398_v28 }
 0x136   : > { %497 = vmatpush.bf16.msrb.mxu3 %v993_v7 }
 0x137   : > { %734 = vmatmul.msk.bf16.vlgmr.msra.gmra.mxu2 %vm409_vm2, %v1030_v24 }
 0x138   : > { %473 = vmatpush.bf16.msrb.mxu2 %v985_v6  ;;  %v323_v6 = vsub.f32 %v305_v32, %v317_v37 }
 0x139   : > { %v588_v47 = vpop.f32.mrf.mxu1 }
 0x13a   : > { %v329_v40 = vpack.c.bf16 %v323_v6, %v323_v6 }
 0x13b   : > { %v567_v48 = vpop.f32.mrf.mxu0 }
 0x13c   : > { %474 = vmatpush.bf16.msrb.mxu2 %v993_v7  ;;  %v485_v42 = vunpack.c.l.b16 %v329_v40  ;;  %v570_v49 = vpack.c.bf16 %v567_v48, %v565_v46 }
 0x13e   : > { %v486_v7 = vpack.c.b16 %v485_v42, %v484_v41  ;;  %620 = vmatpush.bf16.msra.mxu1 %v570_v49 }
 0x141   : > { %737 = vmatmul.msk.bf16.gmra.mxu3 %vm409_vm2, %v763_v35  ;;  %v590_v51 = vpop.f32.mrf.mxu1  ;;  %752 = vmatmul.msk.bf16.vlgmr.msra.gmra.mxu1 %vm409_vm2, %v1030_v24 }
 0x142   : > { %v593_v52 = vpack.c.bf16 %v590_v51, %v588_v47 }
 0x144   : > { %601 = vmatpush.bf16.msra.mxu0 %v593_v52 }
 0x147   : > { %735 = vmatmul.msk.bf16.gmra.mxu2 %vm409_vm2, %v763_v35  ;;  %750 = vmatmul.msk.bf16.vlgmr.msra.gmra.mxu0 %vm409_vm2, %v1030_v24 }
 0x151   : > { %739 = vmatmul.msk.bf16.vlgmr.msrb.gmra.mxu3 %vm353_vm1, %v486_v7  ;;  %753 = vmatmul.msk.bf16.gmra.mxu1 %vm409_vm2, %v763_v35 }
 0x157   : > { %738 = vmatmul.msk.bf16.vlgmr.msrb.gmra.mxu2 %vm353_vm1, %v463_v45  ;;  %751 = vmatmul.msk.bf16.gmra.mxu0 %vm409_vm2, %v763_v35 }
 0x1b4   : > { %v444_v50 = vpop.f32.mrf.mxu3 }
 0x1ba   : > { %v425_v53 = vpop.f32.mrf.mxu2 }
 0x1bb   : > { %v445_v54 = vadd.f32 %v444_v50, %v425_v53 }
 0x1bc   : > { %v446_v55 = vpop.f32.mrf.mxu3 }
 0x1bd   : > { %455 = vst.msk [vmem:[%s1055_s16] sm:$0xff] %vm454_vm3, %v445_v54 }
 0x1be   : > { %v622_v9 = vpop.f32.mrf.mxu1 }
 0x1c2   : > { %v427_v56 = vpop.f32.mrf.mxu2 }
 0x1c3   : > { %v447_v57 = vadd.f32 %v446_v55, %v427_v56 }
 0x1c4   : > { %v449_v58 = vpop.f32.mrf.mxu3  ;;  %v603_v8 = vpop.f32.mrf.mxu0 }
 0x1c5   : > { %456 = vst.msk [vmem:[%s1055_s16 + $0x8] sm:$0xff] %vm454_vm3, %v447_v57  ;;  %v623_v12 = vadd.f32 %v622_v9, %v603_v8 }
 0x1c6   : > { %v624_v11 = vpop.f32.mrf.mxu1 }
 0x1c7   : > { %754 = vst.msk [vmem:[%s1055_s16 + $0x40] sm:$0xff] %vm454_vm3, %v623_v12 }
 0x1ca   : > { %v430_v59 = vpop.f32.mrf.mxu2 }
 0x1cb   : > { %v450_v60 = vadd.f32 %v449_v58, %v430_v59 }
 0x1cc   : > { %v451_v61 = vpop.f32.mrf.mxu3  ;;  %v605_v10 = vpop.f32.mrf.mxu0 }
 0x1cd   : > { %457 = vst.msk [vmem:[%s1055_s16 + $0x10] sm:$0xff] %vm454_vm3, %v450_v60  ;;  %v625_v13 = vadd.f32 %v624_v11, %v605_v10 }
 0x1ce   : > { %v627_v15 = vpop.f32.mrf.mxu1 }
 0x1cf   : > { %755 = vst.msk [vmem:[%s1055_s16 + $0x48] sm:$0xff] %vm454_vm3, %v625_v13 }
 0x1d2   : > { %v432_v62 = vpop.f32.mrf.mxu2 }
 0x1d3   : > { %v452_v63 = vadd.f32 %v451_v61, %v432_v62 }
 0x1d4   : > { %v499_v0 = vpop.f32.mrf.mxu3  ;;  %v608_v14 = vpop.f32.mrf.mxu0 }
 0x1d5   : > { %458 = vst.msk [vmem:[%s1055_s16 + $0x18] sm:$0xff] %vm454_vm3, %v452_v63  ;;  %v628_v18 = vadd.f32 %v627_v15, %v608_v14 }
 0x1d6   : > { %v629_v17 = vpop.f32.mrf.mxu1 }
 0x1d7   : > { %756 = vst.msk [vmem:[%s1055_s16 + $0x50] sm:$0xff] %vm454_vm3, %v628_v18 }
 0x1da   : > { %v476_v1 = vpop.f32.mrf.mxu2 }
 0x1dc   : > { %v501_v2 = vpop.f32.mrf.mxu3  ;;  %v610_v16 = vpop.f32.mrf.mxu0 }
 0x1dd   : > { %v504_v3 = vpack.c.bf16 %v501_v2, %v499_v0  ;;  %v630_v19 = vadd.f32 %v629_v17, %v610_v16 }
 0x1df   : > { %512 = vmatpush.bf16.msra.mxu2 %v504_v3  ;;  %757 = vst.msk [vmem:[%s1055_s16 + $0x58] sm:$0xff] %vm454_vm3, %v630_v19 }
 0x1e2   : > { %v478_v4 = vpop.f32.mrf.mxu2  ;;  %740 = vmatmul.msk.bf16.vlgmr.msra.gmra.mxu2 %vm409_vm2, %v1030_v24 }
 0x1e3   : > { %v481_v5 = vpack.c.bf16 %v478_v4, %v476_v1 }
 0x1e5   : > { %531 = vmatpush.bf16.msra.mxu3 %v481_v5 }
 0x1e8   : > { %742 = vmatmul.msk.bf16.vlgmr.msra.gmra.mxu3 %vm409_vm2, %v1030_v24 }
 0x1f2   : > { %741 = vmatmul.msk.bf16.gmra.mxu2 %vm409_vm2, %v763_v35 }
 0x1f8   : > { %743 = vmatmul.msk.bf16.gmra.mxu3 %vm409_vm2, %v763_v35 }
 0x265   : > { %v514_v20 = vpop.f32.mrf.mxu2 }
 0x26b   : > { %v533_v21 = vpop.f32.mrf.mxu3 }
 0x26c   : > { %v534_v22 = vadd.f32 %v533_v21, %v514_v20 }
 0x26d   : > { %v516_v23 = vpop.f32.mrf.mxu2 }
 0x26e   : > { %744 = vst.msk [vmem:[%s1055_s16 + $0x20] sm:$0xff] %vm454_vm3, %v534_v22 }
 0x273   : > { %v535_v24 = vpop.f32.mrf.mxu3 }
 0x274   : > { %v536_v25 = vadd.f32 %v535_v24, %v516_v23 }
 0x275   : > { %v519_v26 = vpop.f32.mrf.mxu2 }
 0x276   : > { %745 = vst.msk [vmem:[%s1055_s16 + $0x28] sm:$0xff] %vm454_vm3, %v536_v25 }
 0x27b   : > { %v538_v27 = vpop.f32.mrf.mxu3 }
 0x27c   : > { %v539_v28 = vadd.f32 %v538_v27, %v519_v26 }
 0x27d   : > { %v521_v29 = vpop.f32.mrf.mxu2 }
 0x27e   : > { %746 = vst.msk [vmem:[%s1055_s16 + $0x30] sm:$0xff] %vm454_vm3, %v539_v28 }
 0x283   : > { %v540_v30 = vpop.f32.mrf.mxu3 }
 0x284   : > { %v541_v31 = vadd.f32 %v540_v30, %v521_v29 }
 0x286   : > { %747 = vst.msk [vmem:[%s1055_s16 + $0x38] sm:$0xff] %vm454_vm3, %v541_v31 }
 0x287   : > { %857 = shalt.err (!%p854_p3)
}
 0x288   : > { %s895_s14 = smov 128   ;;  %s896_s15 = smov 8  }
 0x289   : > { %767 = dma.vmem_to_hbm [thread:$0]  (%p965_p5), %s651_s30, 1536, %s653_s6, %s638_s22, %s895_s14, %s895_s14, %s896_s15  }
 0x28a PF: > { %p773_p4 = scmp.ge.s32.totalorder %s892_s21, 2  ;;  %s667_s16 = sand.u32 1, %s880_s18  }
 0x28b   : > { %s668_s17 = scalar_lea.sflag [#allocation3], %s667_s16 }
 0x28c   : > { %p770_p7 = pnand %p773_p4, %p969_p6 }
 0x28e   : > { %p771_p8 = pneg %p770_p7 }
 0x290   : > { %875 = dma.done.wait (%p771_p8), %s668_s17, 1536  }
 0x291   : > { %877 = vsyncadd (%p771_p8), %s668_s17, 4294965760  ;;  %p15_p9 = scmp.ge.s32.totalorder %s952_s24, 4   ;;  %s1131_s18 = smov %s884_s19 }
 0x292   : > { %s1132_s19 = smov %s888_s20  ;;  %s1133_s20 = smov %s963_s27 }
 0x293   : > { %s1134_s21 = smov %s952_s24  ;;  %17 = sbr.rel (!%p15_p9) target bundleno = 3 (0x3), region = 77 }
 0x298   :  { %674 = vsyncpa [#allocation3], 1 }
 0x299   :  { %676 = vsyncpa [#allocation3 + $0x1], 1 }

// kernel: upscaler_forward.5
= control target key start
LH: loop header
LB: loop body
LE: loop exit
PB: predicated region body
PF: predicated region fallthrough
CT: control target
= control target key end

     0   :  { %s1708_s30 = smov 0   ;;  %s2253_s0 = inlined_call_operand.vmem [shape: f32[2,3,384], index: 0, kind: input, shape index: {}]   ;;  %s2254_s1 = inlined_call_operand.vmem [shape: bf16[2,24,27], index: 1, kind: input, shape index: {}]   ;;  %s2255_s2 = inlined_call_operand.vmem [shape: f32[24,1], index: 2, kind: input, shape index: {}]   ;;  %s2256_s3 = inlined_call_operand.vmem [shape: f32[3,1], index: 3, kind: input, shape index: {}]   ;;  %s2257_s4 = inlined_call_operand.vmem [shape: f32[3,1], index: 4, kind: input, shape index: {}]   ;;  %s2258_s5 = inlined_call_operand.vmem [shape: f32[1,384], index: 5, kind: input, shape index: {}]   ;;  %s2259_s6 = inlined_call_operand.vmem [shape: f32[2,288], index: 6, kind: input, shape index: {}]   ;;  %s2260_s7 = inlined_call_operand.vmem [shape: f32[2,24,384], index: 7, kind: output, shape index: {0}]   ;;  %s2261_s8 = inlined_call_operand.vmem [shape: f32[2,24,1], index: 8, kind: output, shape index: {1}]   ;;  %s2262_s9 = inlined_call_operand.vmem [shape: f32[2,24,1], index: 9, kind: output, shape index: {2}]  }
   0x1 LB: > { %s1537_s10 = sadd.s32 4294967295, %s1638_s30   ;;  %p1541_p0 = scmp.ge.s32.totalorder %s1638_s30, 1  ;;  %s1638_s30 = sphi %s1708_s30, %s20_s30  }
   0x2   : > { %p292_p1 = scmp.lt.s32.totalorder %s1638_s30, 3 }
   0x4   : > { %p293_p2 = pnand %p1541_p0, %p292_p1 }
   0x5   : > { %p338_p3 = scmp.lt.s32.totalorder (!%p293_p2), %s1537_s10, 1  ;;  %s1642_s21 = smov (!%p293_p2), 90  }
   0x6   : > { %296 = sbr.rel (%p293_p2) target bundleno = 1226 (0x4ca), region = 48  ;;  %s1643_s22 = smov (!%p293_p2), 92  }
   0x7   : > { %s1644_s23 = smov (!%p293_p2), 108   ;;  %s1645_s24 = smov (!%p293_p2), 91  }
   0x8   : > { %s1646_s25 = smov (!%p293_p2), 127   ;;  %s1647_s26 = smov (!%p293_p2), 126  }
   0x9   : > { %s1648_s27 = smov (!%p293_p2), 110   ;;  %s1649_s28 = smov (!%p293_p2), 109  }
   0xa   : > { %s1653_s29 = smov (!%p293_p2), 114   ;;  %s1655_s13 = smov (!%p293_p2), 31  }
   0xb   : > { %v363_v0 = vld [vmem:[%s2256_s3] sm:$0x7]  ;;  %v1640_v1 = vmov 0   ;;  %s2282_s10 = smov (!%p338_p3, %s1537_s10), 1  ;;  %v1641_v3 = vmov 839922192  }
   0xc   : > { %1611 = vset.pattern.permute.xlu0 %v1640_v1  ;;  %1613 = vset.pattern.permute.xlu1 %v1640_v1  ;;  %v375_v2 = vld [vmem:[%s2257_s4] sm:$0x7]  ;;  %v369_v4 = vunpack.c.l.s4 %v1641_v3  ;;  %s1582_s15 = smul.u32 12, %s2282_s10  ;;  %vm410_vm4 = vcmask 256000   ;;  %v880_v48 = vld [vmem:[%s2255_s2 + $0x8] sm:$0xff]  ;;  %vm512_vm5 = vcmask 261127  }
   0xd   : > { %366 = vperm.xlu0 %1611, %v363_v0   ;;  %1612 = vset.pattern.permute.xlu2 %v1640_v1  ;;  %v361_v7 = vld [vmem:[%s2258_s5] sm:$0x7]  ;;  %vm516_vm6 = vcmask 254976   ;;  %vm562_vm7 = vcmask 736256   ;;  %vm527_vm8 = vcmask 752640   ;;  %vm546_vm9 = vcmask 744448  }
   0xe   : > { %v370_v6 = vunpack.c.0.s8 %v369_v4  ;;  %s342_s18 = scalar_lea.vmem %s2253_s0, %s1582_s15  ;;  %vm362_vm0 = vcmp.ne.f32.partialorder %v361_v7, 0.0  ;;  %vm504_vm10 = vcmask 883712   ;;  %vm424_vm11 = vcmask 1039360   ;;  %s1656_s14 = smov 97  }
   0xf   : > { %v359_v9 = vld [vmem:[%s342_s18] sm:$0x77]  ;;  %v360_v10 = vld [vmem:[%s342_s18 + $0x8] sm:$0x7]  ;;  %v387_v15 = vsel %vm362_vm0, 1, %v1640_v1  ;;  %vm535_vm12 = vcmask 258050  }
  0x10   : > { %v388_v18 = vperm.slane %v387_v15, 0  ;;  %v389_v19 = vperm.slane %v387_v15, 1  ;;  %v390_v20 = vperm.slane %v387_v15, 2  ;;  %vm443_vm13 = vcmask 1031168   ;;  %s1583_s17 = smul.u32 72, %s2282_s10 }
  0x11   : > { %vm554_vm14 = vcmask 261125   ;;  %vm466_vm15 = vcmask 900096   ;;  %vm432_vm0 = vcmask 259075  }
  0x12   : > { %vm1735_vm1 = vcmp.eq.s32.totalorder %v388_v18, 1  ;;  %vm1739_vm2 = vcmp.eq.s32.totalorder %v389_v19, 1  ;;  %vm1743_vm3 = vcmp.eq.s32.totalorder %v390_v20, 1  ;;  %s2160_s20 = scalar_lea.vmem %s2260_s7, %s1583_s17 }
  0x15   : > { %378 = vperm.xlu0 %1611, %v375_v2  }
  0x7f   : > { %v367_v5 = vpop.permute.xlu0 %366 }
  0x80   : > { %v371_v8 = vperm.slane %v367_v5, %v370_v6 }
  0x82   : > { %v373_v12 = vmul.f32 %v371_v8, %v359_v9  ;;  %v374_v13 = vmul.f32 %v371_v8, %v360_v10 }
  0x87   : > { %v379_v11 = vpop.permute.xlu0 %378 }
  0x88   : > { %v383_v14 = vperm.slane %v379_v11, %v370_v6 }
  0x8a   : > { %v385_v16 = vadd.f32 %v383_v14, %v373_v12  ;;  %v386_v17 = vadd.f32 %v383_v14, %v374_v13 }
  0x8c   : > { %396 = vst [vmem:[#allocation1] ss:$2 sm:$0xff] %v385_v16 }
  0x8d   : > { %398 = vst [vmem:[#allocation1 + $0x10] ss:$2 sm:$0xff] %v386_v17 }
  0x93   : > { %v400_v24 = vld.sshfl [vmem:[#allocation1 + $0x8] sm:$0xff pattern:$0x75316420]  ;;  %v399_v25 = vld.sshfl [vmem:[#allocation1] sm:$0xff pattern:$0x75316420] }
  0x94   : > { %v401_v26 = vld.sshfl [vmem:[#allocation1 + $0x10] sm:$0xff pattern:$0x75316420]  ;;  %v406_v27 = vsel %vm1739_vm2, %v400_v24, 0.0  ;;  %v405_v28 = vsel %vm1735_vm1, %v399_v25, 0.0 }
  0x95   : > { %v407_v29 = vsel %vm1743_vm3, %v401_v26, 0.0  ;;  %558 = vrot.lane.b32.xlu0 %v406_v27, %s1642_s21  ;;  %409 = vst [vmem:[#allocation2 + $0x8] sm:$0x7] %v406_v27  ;;  %556 = vrot.lane.b32.xlu2 %v405_v28, %s1642_s21  ;;  %v519_v30 = vrot.slane %v406_v27, 6  ;;  %v495_v32 = vrot.slane %v405_v28, 1  ;;  %v538_v33 = vrot.slane %v406_v27, 3 }
  0x96   : > { %560 = vrot.lane.b32.xlu1 %v407_v29, %s1642_s21  ;;  %408 = vst [vmem:[#allocation2] sm:$0x7] %v405_v28  ;;  %v497_v31 = vrot.slane %v407_v29, 1  ;;  %v518_v34 = vrot.slane %v405_v28, 6  ;;  %v496_v35 = vrot.slane %v406_v27, 1  ;;  %v416_v36 = vrot.slane %v406_v27, 5 }
  0x97   : > { %411 = vst.msk [vmem:[#allocation2 + $0x10] sm:$0x7] %vm410_vm4, %v407_v29  ;;  %v537_v37 = vrot.slane %v405_v28, 3  ;;  %v520_v38 = vrot.slane %v407_v29, 6  ;;  %v435_v39 = vrot.slane %v406_v27, 2  ;;  %v415_v40 = vrot.slane %v405_v28, 5 }
  0x98   : > { %v539_v41 = vrot.slane %v407_v29, 3  ;;  %v458_v42 = vrot.slane %v406_v27, 7  ;;  %v434_v43 = vrot.slane %v405_v28, 2  ;;  %v417_v44 = vrot.slane %v407_v29, 5 }
  0x99   : > { %v477_v45 = vrot.slane %v406_v27, 4  ;;  %v457_v46 = vrot.slane %v405_v28, 7  ;;  %v436_v47 = vrot.slane %v407_v29, 2  ;;  %v476_v49 = vrot.slane %v405_v28, 4 }
  0x9a   : > { %v459_v50 = vrot.slane %v407_v29, 7  ;;  %v478_v51 = vrot.slane %v407_v29, 4 }
  0x9d   : > { %523 = vrot.lane.b32.xlu0 %v519_v30, %s1643_s22  ;;  %502 = vrot.lane.b32.xlu2 %v497_v31, %s1644_s23  ;;  %v1650_v31 = vmov 65535  }
  0x9e   : > { %498 = vrot.lane.b32.xlu1 %v495_v32, %s1644_s23 }
  0xa5   : > { %542 = vrot.lane.b32.xlu0 %v538_v33, %s1645_s24  ;;  %521 = vrot.lane.b32.xlu2 %v518_v34, %s1643_s22 }
  0xa6   : > { %500 = vrot.lane.b32.xlu1 %v496_v35, %s1644_s23 }
  0xad   : > { %420 = vrot.lane.b32.xlu0 %v416_v36, %s1646_s25  ;;  %540 = vrot.lane.b32.xlu2 %v537_v37, %s1645_s24 }
  0xae   : > { %525 = vrot.lane.b32.xlu1 %v520_v38, %s1643_s22 }
  0xb5   : > { %439 = vrot.lane.b32.xlu0 %v435_v39, %s1647_s26  ;;  %418 = vrot.lane.b32.xlu2 %v415_v40, %s1646_s25 }
  0xb6   : > { %544 = vrot.lane.b32.xlu1 %v539_v41, %s1645_s24  ;;  %s1651_s24 = smov 18  }
  0xbd   : > { %462 = vrot.lane.b32.xlu0 %v458_v42, %s1648_s27  ;;  %437 = vrot.lane.b32.xlu2 %v434_v43, %s1647_s26 }
  0xbe   : > { %422 = vrot.lane.b32.xlu1 %v417_v44, %s1646_s25 }
  0xc5   : > { %481 = vrot.lane.b32.xlu0 %v477_v45, %s1649_s28  ;;  %460 = vrot.lane.b32.xlu2 %v457_v46, %s1648_s27 }
  0xc6   : > { %441 = vrot.lane.b32.xlu1 %v436_v47, %s1647_s26  ;;  %s1652_s26 = smov 14  }
  0xcd   : > { %889 = vperm.xlu0 %1611, %v880_v48   ;;  %479 = vrot.lane.b32.xlu2 %v476_v49, %s1649_s28 }
  0xce   : > { %464 = vrot.lane.b32.xlu1 %v459_v50, %s1648_s27 }
  0xd6   : > { %483 = vrot.lane.b32.xlu1 %v478_v51, %s1649_s28 }
  0xef   : > { %v557_v52 = vpop.permute.xlu2 %556 }
  0xf7   : > { %v503_v53 = vpop.permute.xlu2 %502 }
  0xf8   : > { %513 = vst.msk [vmem:[#allocation2 + $0x28] sm:$0x80] %vm512_vm5, %v503_v53  ;;  %vm644_vm5 = vcmask 1045504  }
  0xf9   : > { %517 = vst.msk [vmem:[#allocation2 + $0x40] sm:$0x3] %vm516_vm6, %v503_v53  ;;  %vm485_vm6 = vcmask 891904  }
  0xff   : > { %v522_v54 = vpop.permute.xlu2 %521 }
 0x107   : > { %v559_v55 = vpop.permute.xlu0 %558  ;;  %v541_v59 = vpop.permute.xlu2 %540 }
 0x108   : > { %v561_v56 = vpop.permute.xlu1 %560  ;;  %v563_v57 = vsel %vm562_vm7, %v557_v52, %v559_v55 }
 0x109   : > { %570 = vst.msk [vmem:[#allocation2 + $0x58] sm:$0x7] %vm410_vm4, %v561_v56  ;;  %v564_v58 = vsel %vm562_vm7, %v559_v55, %v561_v56  ;;  %vm643_vm4 = vcmask 1044480   ;;  %vm451_vm7 = vcmask 261126  }
 0x10a   : > { %568 = vst [vmem:[#allocation2 + $0x48] sm:$0x7] %v563_v57  ;;  %v645_v32 = vsel %vm643_vm4, 4294967295, %v1650_v31  ;;  %vm998_vm4 = vcmask 113664  }
 0x10b   : > { %569 = vst [vmem:[#allocation2 + $0x50] sm:$0x7] %v564_v58  ;;  %v1794_v40 = vsel %vm644_vm5, %v645_v32, 0 }
 0x10f   : > { %v524_v60 = vpop.permute.xlu0 %523  ;;  %v419_v3 = vpop.permute.xlu2 %418 }
 0x110   : > { %v528_v61 = vsel %vm527_vm8, %v522_v54, %v524_v60  ;;  %v499_v62 = vpop.permute.xlu1 %498  ;;  %v582_v18 = vld [vmem:[#allocation2 + $0x58] sm:$0x7] }
 0x111   : > { %533 = vst [vmem:[#allocation2 + $0x30] sm:$0x1c] %v528_v61  ;;  %v580_v15 = vld [vmem:[#allocation2 + $0x48] sm:$0x7]  ;;  %v1779_v26 = vpack.c.bf16 %v582_v18, %v582_v18 }
 0x112   : > { %v1773_v16 = vld [vmem:[#allocation2 + $0x50] sm:$0x7] }
 0x113   : > { %v1776_v20 = vpack.c.bf16 %v1773_v16, %v580_v15  ;;  %v602_v36 = vunpack.c.l.bf16 %v1779_v26 }
 0x115   : > { %v600_v34 = vunpack.c.l.bf16 %v1776_v20  ;;  %v727_v38 = vunpack.c.l.b16 %v1776_v20  ;;  %v614_v50 = vsub.f32 %v582_v18, %v602_v36 }
 0x117   : > { %v543_v63 = vpop.permute.xlu0 %542  ;;  %v438_v10 = vpop.permute.xlu2 %437  ;;  %v612_v46 = vsub.f32 %v580_v15, %v600_v34 }
 0x118   : > { %v547_v0 = vsel %vm546_vm9, %v541_v59, %v543_v63  ;;  %v501_v2 = vpop.permute.xlu1 %500 }
 0x119   : > { %552 = vst [vmem:[#allocation2 + $0x30] sm:$0xe0] %v547_v0  ;;  %v505_v4 = vsel %vm504_vm10, %v499_v62, %v501_v2  ;;  %v506_v5 = vsel %vm504_vm10, %v501_v2, %v503_v53  ;;  %vm493_vm10 = vcmask 260100  }
 0x11a   : > { %510 = vst [vmem:[#allocation2 + $0x18] sm:$0x80] %v505_v4 }
 0x11b   : > { %511 = vst [vmem:[#allocation2 + $0x20] sm:$0x80] %v506_v5 }
 0x11c   : > { %514 = vst [vmem:[#allocation2 + $0x30] sm:$0x3] %v505_v4 }
 0x11d   : > { %515 = vst [vmem:[#allocation2 + $0x38] sm:$0x3] %v506_v5  ;;  %v601_v5 = vunpack.c.h.bf16 %v1776_v20 }
 0x11f   : > { %v421_v6 = vpop.permute.xlu0 %420  ;;  %v461_v17 = vpop.permute.xlu2 %460  ;;  %v613_v18 = vsub.f32 %v1773_v16, %v601_v5 }
 0x120   : > { %v425_v7 = vsel %vm424_vm11, %v419_v3, %v421_v6  ;;  %v526_v8 = vpop.permute.xlu1 %525 }
 0x121   : > { %430 = vst [vmem:[#allocation2] sm:$0x38] %v425_v7  ;;  %v529_v9 = vsel %vm527_vm8, %v524_v60, %v526_v8  ;;  %vm455_vm8 = vcmask 253952  }
 0x122   : > { %534 = vst [vmem:[#allocation2 + $0x38] sm:$0x1c] %v529_v9 }
 0x123   : > { %536 = vst.msk [vmem:[#allocation2 + $0x40] sm:$0x1c] %vm535_vm12, %v526_v8  ;;  %v577_v28 = vld [vmem:[#allocation2 + $0x30] sm:$0xff]  ;;  %vm636_vm12 = vcmask 220160  }
 0x127   : > { %v440_v11 = vpop.permute.xlu0 %439  ;;  %v480_v42 = vpop.permute.xlu2 %479 }
 0x128   : > { %v444_v12 = vsel %vm443_vm13, %v438_v10, %v440_v11  ;;  %v545_v13 = vpop.permute.xlu1 %544 }
 0x129   : > { %449 = vst [vmem:[#allocation2] sm:$0xc0] %v444_v12  ;;  %v548_v14 = vsel %vm546_vm9, %v543_v63, %v545_v13  ;;  %vm474_vm9 = vcmask 257025  }
 0x12a   : > { %453 = vst [vmem:[#allocation2 + $0x18] sm:$0x1] %v444_v12 }
 0x12b   : > { %553 = vst [vmem:[#allocation2 + $0x38] sm:$0xe0] %v548_v14 }
 0x12c   : > { %555 = vst.msk [vmem:[#allocation2 + $0x40] sm:$0xe0] %vm554_vm14, %v545_v13  ;;  %vm1038_vm14 = vcmask 146432  }
 0x12f   : > { %v463_v19 = vpop.permute.xlu0 %462 }
 0x130   : > { %v467_v24 = vsel %vm466_vm15, %v461_v17, %v463_v19  ;;  %v423_v25 = vpop.permute.xlu1 %422  ;;  %v571_v63 = vld [vmem:[#allocation2] sm:$0xff] }
 0x131   : > { %472 = vst [vmem:[#allocation2 + $0x18] sm:$0xe] %v467_v24  ;;  %v426_v27 = vsel %vm424_vm11, %v421_v6, %v423_v25 }
 0x132   : > { %431 = vst [vmem:[#allocation2 + $0x8] sm:$0x38] %v426_v27  ;;  %v1782_v29 = vld [vmem:[#allocation2 + $0x38] sm:$0xff] }
 0x133   : > { %433 = vst.msk [vmem:[#allocation2 + $0x10] sm:$0x38] %vm432_vm0, %v423_v25  ;;  %v1785_v30 = vpack.c.bf16 %v1782_v29, %v577_v28  ;;  %v579_v33 = vld [vmem:[#allocation2 + $0x40] sm:$0xff] }
 0x134   : > { %v1788_v35 = vpack.c.bf16 %v579_v33, %v579_v33 }
 0x135   : > { %v724_v37 = vunpack.c.l.b16 %v1785_v30  ;;  %v597_v39 = vunpack.c.l.bf16 %v1785_v30  ;;  %v598_v2 = vunpack.c.h.bf16 %v1785_v30  ;;  %v725_v4 = vunpack.c.h.b16 %v1785_v30 }
 0x136   : > { %v599_v41 = vunpack.c.l.bf16 %v1788_v35  ;;  %v726_v24 = vunpack.c.l.b16 %v1788_v35  ;;  %v1578_v35 = vld [vmem:[%s2254_s1] sm:$0xff] }
 0x137   : > { %v482_v43 = vpop.permute.xlu0 %481  ;;  %v733_v44 = vpack.c.b16 %v727_v38, %v724_v37  ;;  %v609_v45 = vsub.f32 %v577_v28, %v597_v39  ;;  %v610_v12 = vsub.f32 %v1782_v29, %v598_v2  ;;  %v729_v39 = vunpack.c.l.b16 %v1779_v26 }
 0x138   : > { %v486_v47 = vsel %vm485_vm6, %v480_v42, %v482_v43  ;;  %v442_v48 = vpop.permute.xlu1 %441  ;;  %v611_v49 = vsub.f32 %v579_v33, %v599_v41 }
 0x139   : > { %491 = vst [vmem:[#allocation2 + $0x18] sm:$0x70] %v486_v47  ;;  %v445_v51 = vsel %vm443_vm13, %v440_v11, %v442_v48  ;;  %v1800_v52 = vand.u32 %v733_v44, %v1794_v40  ;;  %v618_v53 = vpack.c.bf16 %v612_v46, %v609_v45  ;;  %v728_v11 = vunpack.c.h.b16 %v1776_v20 }
 0x13a   : > { %450 = vst [vmem:[#allocation2 + $0x8] sm:$0xc0] %v445_v51  ;;  %v620_v54 = vpack.c.bf16 %v614_v50, %v611_v49  ;;  %v619_v20 = vpack.c.bf16 %v613_v18, %v610_v12  ;;  %v735_v47 = vpack.c.b16 %v729_v39, %v726_v24 }
 0x13b   : > { %452 = vst.msk [vmem:[#allocation2 + $0x10] sm:$0xc0] %vm451_vm7, %v442_v48  ;;  %754 = vmatpush.bf16.msra.mxu3 %v1800_v52  ;;  %v648_v55 = vand.u32 %v1794_v40, %v618_v53  ;;  %v734_v17 = vpack.c.b16 %v728_v11, %v725_v4 }
 0x13c   : > { %454 = vst [vmem:[#allocation2 + $0x20] sm:$0x1] %v445_v51  ;;  %v654_v56 = vand.u32 %v1794_v40, %v620_v54  ;;  %v746_v50 = vand.u32 %v735_v47, %v1794_v40  ;;  %v881_v54 = vld [vmem:[%s2255_s2 + $0x10] sm:$0xff] }
 0x13d   : > { %456 = vst.msk [vmem:[#allocation2 + $0x28] sm:$0x1] %vm455_vm8, %v442_v48  ;;  %662 = vmatpush.bf16.msra.mxu0 %v648_v55  ;;  %1580 = vmatpush.bf16.msra.mxu1 %v648_v55  ;;  %v743_v16 = vand.u32 %v734_v17, %v1794_v40  ;;  %v879_v55 = vld [vmem:[%s2255_s2] sm:$0xff]  ;;  %vm1173_vm8 = vcmask 7168  }
 0x13e   : > { %698 = vmatpush.bf16.msra.mxu2 %v654_v56  ;;  %894 = vperm.xlu1 %1613, %v881_v54   ;;  %v1548_v56 = vld [vmem:[%s2254_s1 + $0x14] sm:$0xf] }
 0x13f   : > { %884 = vperm.xlu2 %1612, %v879_v55  }
 0x140   : > { %v465_v57 = vpop.permute.xlu1 %464  ;;  %v574_v7 = vld [vmem:[#allocation2 + $0x18] sm:$0xff] }
 0x141   : > { %v468_v58 = vsel %vm466_vm15, %v463_v19, %v465_v57  ;;  %475 = vst.msk [vmem:[#allocation2 + $0x28] sm:$0xe] %vm474_vm9, %v465_v57  ;;  %v572_v62 = vld [vmem:[#allocation2 + $0x8] sm:$0xff]  ;;  %v623_v19 = vld [vmem:[%s2254_s1 + $0x8] sm:$0xf]  ;;  %v807_v57 = vunpack.c.l.b16 %v1548_v56 }
 0x142   : > { %473 = vst [vmem:[#allocation2 + $0x20] sm:$0xe] %v468_v58  ;;  %v573_v61 = vld [vmem:[#allocation2 + $0x10] sm:$0xff]  ;;  %v583_v3 = vpack.c.bf16 %v572_v62, %v571_v63  ;;  %v633_v36 = vunpack.c.l.b16 %v623_v19 }
 0x143   : > { %v1807_v0 = vpack.c.bf16 %v573_v61, %v573_v61  ;;  %v809_v58 = vpack.c.b16 %v807_v57, %v807_v57 }
 0x144   : > { %v591_v14 = vunpack.c.l.bf16 %v583_v3  ;;  %v718_v25 = vunpack.c.l.b16 %v583_v3  ;;  %v592_v38 = vunpack.c.h.bf16 %v583_v3  ;;  %v635_v45 = vpack.c.b16 %v633_v36, %v633_v36 }
 0x145   : > { %v593_v10 = vunpack.c.l.bf16 %v1807_v0  ;;  %v719_v46 = vunpack.c.h.b16 %v583_v3 }
 0x146   : > { %v603_v33 = vsub.f32 %v571_v63, %v591_v14  ;;  %v604_v26 = vsub.f32 %v572_v62, %v592_v38 }
 0x147   : > { %v605_v30 = vsub.f32 %v573_v61, %v593_v10 }
 0x148   : > { %v484_v59 = vpop.permute.xlu1 %483 }
 0x149   : > { %v487_v60 = vsel %vm485_vm6, %v482_v43, %v484_v59  ;;  %494 = vst.msk [vmem:[#allocation2 + $0x28] sm:$0x70] %vm493_vm10, %v484_v59  ;;  %v651_v43 = vand.u32 %v1794_v40, %v619_v20  ;;  %v1579_v40 = vld [vmem:[%s2254_s1 + $0xc] sm:$0xff] }
 0x14a   : > { %492 = vst [vmem:[#allocation2 + $0x20] sm:$0x70] %v487_v60 }
 0x150   : > { %v576_v6 = vld [vmem:[#allocation2 + $0x28] sm:$0xff] }
 0x151   : > { %v575_v8 = vld [vmem:[#allocation2 + $0x20] sm:$0xff]  ;;  %v586_v9 = vpack.c.bf16 %v576_v6, %v576_v6 }
 0x152   : > { %v585_v13 = vpack.c.bf16 %v575_v8, %v574_v7 }
 0x153   : > { %v596_v15 = vunpack.c.l.bf16 %v586_v9  ;;  %v723_v51 = vunpack.c.l.b16 %v586_v9 }
 0x154   : > { %v721_v27 = vunpack.c.l.b16 %v585_v13  ;;  %v594_v28 = vunpack.c.l.bf16 %v585_v13  ;;  %v595_v32 = vunpack.c.h.bf16 %v585_v13  ;;  %v722_v42 = vunpack.c.h.b16 %v585_v13 }
 0x155   : > { %v608_v31 = vsub.f32 %v576_v6, %v596_v15 }
 0x156   : > { %v730_v29 = vpack.c.b16 %v721_v27, %v718_v25  ;;  %v606_v34 = vsub.f32 %v574_v7, %v594_v28  ;;  %v607_v44 = vsub.f32 %v575_v8, %v595_v32  ;;  %v731_v48 = vpack.c.b16 %v722_v42, %v719_v46 }
 0x157   : > { %v617_v37 = vpack.c.bf16 %v608_v31, %v605_v30 }
 0x158   : > { %755 = vmatpush.bf16.msra.mxu3 %v730_v29  ;;  %v615_v41 = vpack.c.bf16 %v606_v34, %v603_v33  ;;  %v616_v49 = vpack.c.bf16 %v607_v44, %v604_v26 }
 0x159   : > { %699 = vmatpush.bf16.msra.mxu2 %v617_v37  ;;  %v890_v37 = vpop.permute.xlu0 %889 }
 0x15a   : > { %663 = vmatpush.bf16.msra.mxu0 %v615_v41  ;;  %1581 = vmatpush.bf16.msra.mxu1 %v615_v41 }
 0x15b   : > { %1559 = vmatmul.msk.bf16.vlgmr.msra.gmra.mxu3 %vm636_vm12, %v1578_v35 }
 0x15c   : > { %840 = vmatpush.bf16.msrb.mxu3 %v743_v16  ;;  %1557 = vmatmul.msk.bf16.vlgmr.msra.gmra.mxu2 %vm636_vm12, %v1578_v35 }
 0x15d   : > { %822 = vmatpush.bf16.msrb.mxu2 %v1800_v52  ;;  %1553 = vmatmul.msk.bf16.vlgmr.msra.gmra.mxu0 %vm636_vm12, %v1578_v35  ;;  %v720_v52 = vunpack.c.l.b16 %v1807_v0 }
 0x15e   : > { %680 = vmatpush.bf16.msrb.mxu1 %v651_v43  ;;  %772 = vmatpush.bf16.msrb.mxu0 %v743_v16 }
 0x15f   : > { %1554 = vmatmul.msk.bf16.vlgmr.msra.gmra.mxu1 %vm636_vm12, %v635_v45  ;;  %v732_v53 = vpack.c.b16 %v723_v51, %v720_v52 }
 0x160   : > { %841 = vmatpush.bf16.msrb.mxu3 %v731_v48 }
 0x161   : > { %823 = vmatpush.bf16.msrb.mxu2 %v730_v29 }
 0x162   : > { %681 = vmatpush.bf16.msrb.mxu1 %v616_v49  ;;  %773 = vmatpush.bf16.msrb.mxu0 %v731_v48 }
 0x166   : > { %790 = vmatpush.bf16.msra.mxu1 %v746_v50  ;;  %858 = vmatpush.bf16.msra.mxu0 %v746_v50 }
 0x16a   : > { %791 = vmatpush.bf16.msra.mxu1 %v732_v53  ;;  %859 = vmatpush.bf16.msra.mxu0 %v732_v53 }
 0x16b   : > { %1560 = vmatmul.msk.bf16.gmra.mxu3 %vm636_vm12, %v635_v45 }
 0x16c   : > { %1558 = vmatmul.msk.bf16.gmra.mxu2 %vm636_vm12, %v635_v45 }
 0x16d   : > { %1561 = vmatmul.msk.bf16.vlgmr.msrb.gmra.mxu0 %vm636_vm12, %v1578_v35 }
 0x16f   : > { %1555 = vmatmul.msk.bf16.vlgmr.msrb.gmra.mxu1 %vm636_vm12, %v1578_v35 }
 0x17b   : > { %1571 = vmatmul.msk.bf16.vlgmr.msrb.gmra.mxu3 %vm636_vm12, %v1579_v40 }
 0x17c   : > { %1569 = vmatmul.msk.bf16.vlgmr.msrb.gmra.mxu2 %vm636_vm12, %v1579_v40 }
 0x17d   : > { %1562 = vmatmul.msk.bf16.gmra.mxu0 %vm636_vm12, %v635_v45 }
 0x17f   : > { %1556 = vmatmul.msk.bf16.gmra.mxu1 %vm636_vm12, %v635_v45 }
 0x18b   : > { %1572 = vmatmul.msk.bf16.gmra.mxu3 %vm636_vm12, %v809_v58 }
 0x18c   : > { %1570 = vmatmul.msk.bf16.gmra.mxu2 %vm636_vm12, %v809_v58 }
 0x18d   : > { %1573 = vmatmul.msk.bf16.vlgmr.msra.gmra.mxu0 %vm636_vm12, %v1579_v40 }
 0x18f   : > { %1563 = vmatmul.msk.bf16.vlgmr.msra.gmra.mxu1 %vm636_vm12, %v1578_v35 }
 0x199   : > { %v885_v18 = vpop.permute.xlu2 %884 }
 0x19d   : > { %1574 = vmatmul.msk.bf16.gmra.mxu0 %vm636_vm12, %v809_v58 }
 0x19f   : > { %1564 = vmatmul.msk.bf16.gmra.mxu1 %vm636_vm12, %v635_v45  ;;  %vm1133_vm12 = vcmask 252928  }
 0x1b0   : > { %v895_v58 = vpop.permute.xlu1 %894 }
 0x1da   : > { %v665_v59 = vpop.f32.mrf.mxu0 }
 0x1dc   : > { %v670_v60 = vpop.f32.mrf.mxu1 }
 0x1de   : > { %v757_v61 = vpop.f32.mrf.mxu3 }
 0x1df   : > { %v701_v62 = vpop.f32.mrf.mxu2  ;;  %v758_v15 = vadd.f32 %v757_v61, %v665_v59 }
 0x1e2   : > { %v667_v63 = vpop.f32.mrf.mxu0 }
 0x1e4   : > { %v672_v0 = vpop.f32.mrf.mxu1 }
 0x1e6   : > { %v759_v2 = vpop.f32.mrf.mxu3 }
 0x1e7   : > { %v1859_v3 = vpop.f32.mrf.mxu2  ;;  %v760_v43 = vadd.f32 %v759_v2, %v667_v63 }
 0x1ea   : > { %v775_v4 = vpop.f32.mrf.mxu0 }
 0x1ec   : > { %v683_v5 = vpop.f32.mrf.mxu1 }
 0x1ed   : > { %v776_v14 = vadd.f32 %v775_v4, %v683_v5 }
 0x1ee   : > { %v762_v6 = vpop.f32.mrf.mxu3 }
 0x1ef   : > { %v1861_v7 = vpop.f32.mrf.mxu2  ;;  %v763_v53 = vadd.f32 %v762_v6, %v670_v60 }
 0x1f2   : > { %v777_v8 = vpop.f32.mrf.mxu0 }
 0x1f4   : > { %v685_v9 = vpop.f32.mrf.mxu1 }
 0x1f5   : > { %v778_v29 = vadd.f32 %v777_v8, %v685_v9 }
 0x1f6   : > { %v764_v10 = vpop.f32.mrf.mxu3 }
 0x1f7   : > { %v708_v11 = vpop.f32.mrf.mxu2 }
 0x1fa   : > { %v1863_v12 = vpop.f32.mrf.mxu0 }
 0x1fc   : > { %v1865_v13 = vpop.f32.mrf.mxu1 }
 0x1fd   : > { %v781_v9 = vadd.f32 %v1863_v12, %v1865_v13 }
 0x1fe   : > { %v843_v17 = vpop.f32.mrf.mxu3 }
 0x1ff   : > { %v871_v19 = vadd.f32 %v843_v17, %v776_v14  ;;  %v825_v24 = vpop.f32.mrf.mxu2 }
 0x200   : > { %v870_v25 = vadd.f32 %v825_v24, %v758_v15 }
 0x201   : > { %v898_v27 = vadd.f32 %v885_v18, %v871_v19 }
 0x202   : > { %v782_v28 = vpop.f32.mrf.mxu0  ;;  %v897_v30 = vadd.f32 %v885_v18, %v870_v25 }
 0x203   : > { %v907_v20 = vmul.f32 0.5, %v898_v27 }
 0x204   : > { %v690_v31 = vpop.f32.mrf.mxu1  ;;  %v906_v32 = vmul.f32 0.5, %v897_v30 }
 0x205   : > { %1614 = vtanh.f32 %v907_v20 }
 0x206   : > { %1616 = vtanh.f32 %v906_v32  ;;  %v845_v33 = vpop.f32.mrf.mxu3 }
 0x207   : > { %v874_v34 = vadd.f32 %v845_v33, %v778_v29  ;;  %v827_v36 = vpop.f32.mrf.mxu2 }
 0x208   : > { %v873_v48 = vadd.f32 %v827_v36, %v760_v43 }
 0x209   : > { %v901_v16 = vadd.f32 %v890_v37, %v874_v34 }
 0x20a   : > { %v861_v38 = vpop.f32.mrf.mxu0  ;;  %v900_v55 = vadd.f32 %v890_v37, %v873_v48  ;;  %v942_v48 = vld [vmem:[%s2259_s6] ss:$2 sm:$0x7] }
 0x20b   : > { %v1615_v41 = vpop.eup %1614  ;;  %v910_v46 = vmul.f32 0.5, %v901_v16  ;;  %vm943_vm13 = vcmp.ne.f32.partialorder %v942_v48, 0.0 }
 0x20c   : > { %v793_v39 = vpop.f32.mrf.mxu1  ;;  %v1617_v42 = vpop.eup %1616  ;;  %v925_v44 = vmul.f32 0.5, %v1615_v41  ;;  %v909_v59 = vmul.f32 0.5, %v900_v55 }
 0x20d   : > { %v794_v35 = vadd.f32 %v793_v39, %v701_v62  ;;  %v924_v45 = vmul.f32 0.5, %v1617_v42  ;;  %1618 = vtanh.f32 %v910_v46 }
 0x20e   : > { %v1867_v26 = vadd.f32 0.5, %v925_v44  ;;  %v848_v49 = vpop.f32.mrf.mxu3 }
 0x20f   : > { %v872_v47 = vadd.f32 %v861_v38, %v794_v35  ;;  %v1869_v50 = vadd.f32 0.5, %v924_v45  ;;  %v830_v52 = vpop.f32.mrf.mxu2  ;;  %v877_v14 = vadd.f32 %v848_v49, %v781_v9 }
 0x210   : > { %958 = vrot.lane.b32.xlu0 %v1867_v26, %s1648_s27  ;;  %v876_v57 = vadd.f32 %v830_v52, %v763_v53 }
 0x211   : > { %v899_v51 = vadd.f32 %v885_v18, %v872_v47  ;;  %956 = vrot.lane.b32.xlu2 %v1869_v50, %s1648_s27  ;;  %v904_v19 = vadd.f32 %v895_v58, %v877_v14 }
 0x212   : > { %v863_v54 = vpop.f32.mrf.mxu0  ;;  %v903_v63 = vadd.f32 %v895_v58, %v876_v57 }
 0x213   : > { %v908_v40 = vmul.f32 0.5, %v899_v51  ;;  %v1619_v62 = vpop.eup %1618  ;;  %v913_v28 = vmul.f32 0.5, %v904_v19  ;;  %v1066_v51 = vsel %vm943_vm13, 1, %v1640_v1 }
 0x214   : > { %v795_v56 = vpop.f32.mrf.mxu1  ;;  %v928_v5 = vmul.f32 0.5, %v1619_v62  ;;  %v912_v10 = vmul.f32 0.5, %v903_v63  ;;  %v1068_v53 = vperm.slane %v1066_v51, 1  ;;  %v1067_v55 = vperm.slane %v1066_v51, 0 }
 0x215   : > { %1620 = vtanh.f32 %v908_v40  ;;  %v796_v0 = vadd.f32 %v795_v56, %v1859_v3 }
 0x216   : > { %v850_v61 = vpop.f32.mrf.mxu3  ;;  %1622 = vtanh.f32 %v909_v59  ;;  %v1884_v15 = vadd.f32 0.5, %v928_v5  ;;  %vm1944_vm0 = vcmp.eq.s32.totalorder %v1068_v53, 1  ;;  %vm1956_vm5 = vcmp.eq.s32.totalorder %v1067_v55, 1 }
 0x217   : > { %v832_v2 = vpop.f32.mrf.mxu2  ;;  %v875_v3 = vadd.f32 %v863_v54, %v796_v0  ;;  %1624 = vtanh.f32 %v912_v10 }
 0x218   : > { %1022 = vrot.lane.b32.xlu0 %v1867_v26, %s1651_s24 }
 0x219   : > { %989 = vrot.lane.b32.xlu2 %v1869_v50, %s1652_s26  ;;  %v902_v17 = vadd.f32 %v890_v37, %v875_v3 }
 0x21a   : > { %v866_v4 = vpop.f32.mrf.mxu0 }
 0x21b   : > { %v1621_v60 = vpop.eup %1620  ;;  %v911_v25 = vmul.f32 0.5, %v902_v17 }
 0x21c   : > { %v926_v6 = vmul.f32 0.5, %v1621_v60  ;;  %v798_v8 = vpop.f32.mrf.mxu1  ;;  %v1623_v18 = vpop.eup %1622 }
 0x21d   : > { %v927_v24 = vmul.f32 0.5, %v1623_v18  ;;  %v1625_v27 = vpop.eup %1624  ;;  %1626 = vtanh.f32 %v911_v25  ;;  %v799_v31 = vadd.f32 %v798_v8, %v1861_v7 }
 0x21e   : > { %v1882_v11 = vadd.f32 0.5, %v926_v6  ;;  %v930_v20 = vmul.f32 0.5, %v1625_v27  ;;  %1628 = vtanh.f32 %v913_v28 }
 0x21f   : > { %v1894_v30 = vadd.f32 0.5, %v927_v24  ;;  %v878_v32 = vadd.f32 %v866_v4, %v799_v31 }
 0x220   : > { %960 = vrot.lane.b32.xlu1 %v1882_v11, %s1648_s27  ;;  %964 = vrot.lane.b32.xlu0 %v1884_v15, %s1648_s27  ;;  %v1901_v29 = vadd.f32 0.5, %v930_v20 }
 0x221   : > { %1020 = vrot.lane.b32.xlu2 %v1869_v50, %s1651_s24  ;;  %v905_v36 = vadd.f32 %v895_v58, %v878_v32 }
 0x222   : > { %v868_v12 = vpop.f32.mrf.mxu0 }
 0x223   : > { %v1627_v33 = vpop.eup %1626  ;;  %v914_v16 = vmul.f32 0.5, %v905_v36 }
 0x224   : > { %v800_v13 = vpop.f32.mrf.mxu1  ;;  %v1629_v34 = vpop.eup %1628  ;;  %v929_v37 = vmul.f32 0.5, %v1627_v33 }
 0x225   : > { %v931_v7 = vmul.f32 0.5, %v1629_v34  ;;  %1630 = vtanh.f32 %v914_v16 }
 0x226   : > { %v1909_v38 = vadd.f32 0.5, %v929_v37 }
 0x227   : > { %v1911_v39 = vadd.f32 0.5, %v931_v7 }
 0x228   : > { %1024 = vrot.lane.b32.xlu1 %v1882_v11, %s1651_s24  ;;  %1028 = vrot.lane.b32.xlu0 %v1884_v15, %s1651_s24 }
 0x229   : > { %962 = vrot.lane.b32.xlu2 %v1894_v30, %s1648_s27 }
 0x22b   : > { %v1631_v41 = vpop.eup %1630 }
 0x22c   : > { %v932_v35 = vmul.f32 0.5, %v1631_v41 }
 0x22e   : > { %v1924_v42 = vadd.f32 0.5, %v932_v35 }
 0x230   : > { %993 = vrot.lane.b32.xlu1 %v1901_v29, %s1652_s26  ;;  %991 = vrot.lane.b32.xlu0 %v1894_v30, %s1652_s26 }
 0x231   : > { %1026 = vrot.lane.b32.xlu2 %v1894_v30, %s1651_s24 }
 0x238   : > { %966 = vrot.lane.b32.xlu1 %v1909_v38, %s1648_s27  ;;  %970 = vrot.lane.b32.xlu0 %v1911_v39, %s1648_s27 }
 0x239   : > { %1011 = vrot.lane.b32.xlu2 %v1882_v11, %s1653_s29 }
 0x240   : > { %1030 = vrot.lane.b32.xlu1 %v1909_v38, %s1651_s24  ;;  %1034 = vrot.lane.b32.xlu0 %v1911_v39, %s1651_s24 }
 0x241   : > { %968 = vrot.lane.b32.xlu2 %v1901_v29, %s1648_s27 }
 0x248   : > { %972 = vrot.lane.b32.xlu1 %v1924_v42, %s1648_s27  ;;  %1013 = vrot.lane.b32.xlu0 %v1909_v38, %s1653_s29  ;;  %s1654_s27 = smov 1  }
 0x249   : > { %1032 = vrot.lane.b32.xlu2 %v1901_v29, %s1651_s24 }
 0x250   : > { %1015 = vrot.lane.b32.xlu1 %v1924_v42, %s1653_s29 }
 0x258   : > { %1036 = vrot.lane.b32.xlu1 %v1924_v42, %s1651_s24 }
 0x26b   : > { %v957_v43 = vpop.permute.xlu2 %956 }
 0x273   : > { %v990_v44 = vpop.permute.xlu2 %989 }
 0x27b   : > { %v1021_v45 = vpop.permute.xlu2 %1020 }
 0x282   : > { %v959_v46 = vpop.permute.xlu0 %958 }
 0x283   : > { %v1934_v47 = vpop.permute.xlu2 %962  ;;  %v974_v58 = vsel %vm466_vm15, %v957_v43, %v959_v46 }
 0x284   : > { %v1002_v4 = vmax.f32 %v1869_v50, %v974_v58 }
 0x28a   : > { %v1023_v49 = vpop.permute.xlu0 %1022 }
 0x28b   : > { %v1940_v52 = vpop.permute.xlu2 %1026  ;;  %v1039_v40 = vsel %vm1038_vm14, %v1021_v45, %v1023_v49 }
 0x28c   : > { %v1058_v59 = vmax.f32 %v1867_v26, %v1039_v40 }
 0x292   : > { %v961_v54 = vpop.permute.xlu1 %960  ;;  %v965_v62 = vpop.permute.xlu0 %964 }
 0x293   : > { %v975_v56 = vsel %vm466_vm15, %v959_v46, %v961_v54  ;;  %v1012_v63 = vpop.permute.xlu2 %1011  ;;  %v999_v6 = vsel %vm998_vm4, %v961_v54, %v990_v44  ;;  %v976_v43 = vsel %vm466_vm15, %v1934_v47, %v965_v62 }
 0x294   : > { %v1003_v61 = vmax.f32 %v1867_v26, %v975_v56  ;;  %v1054_v0 = vsel %vm1038_vm14, %v1012_v63, %v1021_v45  ;;  %v1069_v26 = vperm.slane %v1066_v51, 2  ;;  %v1575_v63 = vld [vmem:[%s2259_s6 + $0x1] ss:$2 sm:$0x7] }
 0x295   : > { %v1057_v5 = vmax.f32 %v1869_v50, %v1054_v0  ;;  %v1004_v50 = vmax.f32 %v1882_v11, %v999_v6 }
 0x296   : > { %v1954_v2 = vsel %vm1944_vm0, %v1003_v61, %v1058_v59  ;;  %vm1972_vm7 = vcmp.eq.s32.totalorder %v1069_v26, 1 }
 0x297   : > { %1093 = vrot.lane.b32.xlu0 %v1954_v2, %s1646_s25  ;;  %v1967_v8 = vsel %vm1956_vm5, %v1002_v4, %v1057_v5 }
 0x298   : > { %1091 = vrot.lane.b32.xlu2 %v1967_v8, %s1646_s25 }
 0x29a   : > { %v1025_v9 = vpop.permute.xlu1 %1024  ;;  %v1029_v17 = vpop.permute.xlu0 %1028 }
 0x29b   : > { %v1040_v10 = vsel %vm1038_vm14, %v1023_v49, %v1025_v9  ;;  %v969_v31 = vpop.permute.xlu2 %968  ;;  %v1005_v49 = vmax.f32 %v1894_v30, %v976_v43 }
 0x29c   : > { %v1059_v14 = vmax.f32 %v1882_v11, %v1040_v10  ;;  %v1041_v11 = vsel %vm1038_vm14, %v1940_v52, %v1029_v17 }
 0x29d   : > { %v1061_v25 = vmax.f32 %v1884_v15, %v1041_v11 }
 0x29e   : > { %v1980_v18 = vsel %vm1972_vm7, %v1004_v50, %v1059_v14 }
 0x29f   : > { %1095 = vrot.lane.b32.xlu1 %v1980_v18, %s1646_s25  ;;  %1157 = vrot.lane.b32.xlu0 %v1954_v2, %s1654_s27 }
 0x2a0   : > { %1124 = vrot.lane.b32.xlu2 %v1967_v8, %s1655_s13 }
 0x2a2   : > { %v994_v19 = vpop.permute.xlu1 %993  ;;  %v992_v12 = vpop.permute.xlu0 %991 }
 0x2a3   : > { %v1033_v16 = vpop.permute.xlu2 %1032 }
 0x2a7   : > { %1159 = vrot.lane.b32.xlu1 %v1980_v18, %s1654_s27 }
 0x2a8   : > { %1146 = vrot.lane.b32.xlu2 %v1980_v18, %s1656_s14 }
 0x2aa   : > { %v967_v13 = vpop.permute.xlu1 %966  ;;  %v971_v28 = vpop.permute.xlu0 %970 }
 0x2ab   : > { %v977_v24 = vsel %vm466_vm15, %v965_v62, %v967_v13  ;;  %v1000_v32 = vsel %vm998_vm4, %v967_v13, %v992_v12  ;;  %v978_v54 = vsel %vm466_vm15, %v969_v31, %v971_v28 }
 0x2ac   : > { %v1006_v27 = vmax.f32 %v1884_v15, %v977_v24  ;;  %v1007_v36 = vmax.f32 %v1909_v38, %v1000_v32  ;;  %v1008_v59 = vmax.f32 %v1901_v29, %v978_v54 }
 0x2ae   : > { %v1999_v20 = vsel %vm1944_vm0, %v1006_v27, %v1061_v25 }
 0x2af   : > { %1099 = vrot.lane.b32.xlu0 %v1999_v20, %s1646_s25 }
 0x2b0   : > { %1155 = vrot.lane.b32.xlu2 %v1967_v8, %s1654_s27 }
 0x2b2   : > { %v1031_v33 = vpop.permute.xlu1 %1030  ;;  %v1035_v37 = vpop.permute.xlu0 %1034 }
 0x2b3   : > { %v1042_v34 = vsel %vm1038_vm14, %v1029_v17, %v1031_v33  ;;  %v1043_v41 = vsel %vm1038_vm14, %v1033_v16, %v1035_v37 }
 0x2b4   : > { %v1062_v15 = vmax.f32 %v1909_v38, %v1042_v34  ;;  %v1064_v45 = vmax.f32 %v1911_v39, %v1043_v41 }
 0x2b6   : > { %v2011_v7 = vsel %vm1972_vm7, %v1007_v36, %v1062_v15 }
 0x2b7   : > { %1101 = vrot.lane.b32.xlu1 %v2011_v7, %s1646_s25 }
 0x2ba   : > { %v973_v35 = vpop.permute.xlu1 %972  ;;  %v1014_v46 = vpop.permute.xlu0 %1013 }
 0x2bb   : > { %v979_v44 = vsel %vm466_vm15, %v971_v28, %v973_v35  ;;  %v1055_v48 = vsel %vm1038_vm14, %v1014_v46, %v1940_v52  ;;  %vm946_vm15 = vcmp.ne.f32.partialorder %v1575_v63, 0.0 }
 0x2bc   : > { %v1009_v38 = vmax.f32 %v1911_v39, %v979_v44  ;;  %v1060_v51 = vmax.f32 %v1894_v30, %v1055_v48  ;;  %v1001_v30 = vsel %vm998_vm4, %v973_v35, %v994_v19  ;;  %v1201_v60 = vsel %vm946_vm15, 1, %v1640_v1 }
 0x2bd   : > { %v1010_v56 = vmax.f32 %v1924_v42, %v1001_v30  ;;  %v1202_v5 = vperm.slane %v1201_v60, 0  ;;  %v1203_v14 = vperm.slane %v1201_v60, 1  ;;  %v1204_v27 = vperm.slane %v1201_v60, 2 }
 0x2be   : > { %v2027_v53 = vsel %vm1944_vm0, %v1009_v38, %v1064_v45  ;;  %v2033_v47 = vsel %vm1956_vm5, %v1005_v49, %v1060_v51  ;;  %vm1263_vm0 = vcmask 416768  }
 0x2bf   : > { %1165 = vrot.lane.b32.xlu1 %v2011_v7, %s1654_s27  ;;  %1126 = vrot.lane.b32.xlu0 %v2033_v47, %s1655_s13  ;;  %vm2083_vm9 = vcmp.eq.s32.totalorder %v1202_v5, 1  ;;  %vm2094_vm10 = vcmp.eq.s32.totalorder %v1203_v14, 1  ;;  %vm2105_vm13 = vcmp.eq.s32.totalorder %v1204_v27, 1 }
 0x2c0   : > { %1097 = vrot.lane.b32.xlu2 %v2033_v47, %s1646_s25 }
 0x2c2   : > { %v1016_v39 = vpop.permute.xlu1 %1015 }
 0x2c3   : > { %v1056_v52 = vsel %vm1038_vm14, %v1016_v39, %v1033_v16 }
 0x2c4   : > { %v1063_v57 = vmax.f32 %v1901_v29, %v1056_v52 }
 0x2c6   : > { %v2059_v62 = vsel %vm1956_vm5, %v1008_v59, %v1063_v57 }
 0x2c7   : > { %1148 = vrot.lane.b32.xlu0 %v2011_v7, %s1656_s14 }
 0x2c8   : > { %1161 = vrot.lane.b32.xlu2 %v2033_v47, %s1654_s27 }
 0x2ca   : > { %v1037_v40 = vpop.permute.xlu1 %1036 }
 0x2cb   : > { %v1044_v55 = vsel %vm1038_vm14, %v1035_v37, %v1037_v40  ;;  %vm1244_vm14 = vcmask 154624  }
 0x2cc   : > { %v1065_v58 = vmax.f32 %v1924_v42, %v1044_v55 }
 0x2ce   : > { %v2053_v61 = vsel %vm1972_vm7, %v1010_v56, %v1065_v58 }
 0x2cf   : > { %1107 = vrot.lane.b32.xlu1 %v2053_v61, %s1646_s25  ;;  %1163 = vrot.lane.b32.xlu0 %v1999_v20, %s1654_s27 }
 0x2d0   : > { %1103 = vrot.lane.b32.xlu2 %v2059_v62, %s1646_s25 }
 0x2d7   : > { %1128 = vrot.lane.b32.xlu1 %v2059_v62, %s1655_s13  ;;  %1105 = vrot.lane.b32.xlu0 %v2027_v53, %s1646_s25  ;;  %s1657_s25 = smov 19  }
 0x2d8   : > { %1167 = vrot.lane.b32.xlu2 %v2059_v62, %s1654_s27 }
 0x2df   : > { %1150 = vrot.lane.b32.xlu1 %v2053_v61, %s1656_s14  ;;  %1169 = vrot.lane.b32.xlu0 %v2027_v53, %s1654_s27 }
 0x2e7   : > { %1171 = vrot.lane.b32.xlu1 %v2053_v61, %s1654_s27 }
 0x2f2   : > { %v1092_v29 = vpop.permute.xlu2 %1091 }
 0x2fa   : > { %v1125_v42 = vpop.permute.xlu2 %1124 }
 0x302   : > { %v1147_v0 = vpop.permute.xlu2 %1146 }
 0x309   : > { %v1094_v4 = vpop.permute.xlu0 %1093 }
 0x30a   : > { %v1109_v26 = vsel %vm424_vm11, %v1092_v29, %v1094_v4  ;;  %v1156_v6 = vpop.permute.xlu2 %1155 }
 0x30b   : > { %v1189_v9 = vsel %vm1173_vm8, %v1147_v0, %v1156_v6  ;;  %v1137_v3 = vmax.f32 %v1967_v8, %v1109_v26 }
 0x30c   : > { %v1192_v50 = vmax.f32 %v1967_v8, %v1189_v9 }
 0x30e   : > { %v1208_v1 = vsel %vm2083_vm9, %v1137_v3, %v1192_v50 }
 0x30f   : > { %1226 = vrot.lane.b32.xlu2 %v1208_v1, %s1657_s25 }
 0x311   : > { %v1096_v17 = vpop.permute.xlu1 %1095  ;;  %v1158_v19 = vpop.permute.xlu0 %1157 }
 0x312   : > { %v1110_v12 = vsel %vm424_vm11, %v1094_v4, %v1096_v17  ;;  %v1174_v11 = vsel %vm1173_vm8, %v1156_v6, %v1158_v19  ;;  %v1134_v28 = vsel %vm1133_vm12, %v1096_v17, %v1125_v42 }
 0x313   : > { %v1138_v24 = vmax.f32 %v1954_v2, %v1110_v12  ;;  %v1193_v8 = vmax.f32 %v1954_v2, %v1174_v11  ;;  %v1139_v34 = vmax.f32 %v1980_v18, %v1134_v28 }
 0x315   : > { %v1209_v25 = vsel %vm2094_vm10, %v1138_v24, %v1193_v8 }
 0x316   : > { %1228 = vrot.lane.b32.xlu0 %v1209_v25, %s1657_s25 }
 0x319   : > { %v1160_v31 = vpop.permute.xlu1 %1159 }
 0x31a   : > { %v1175_v32 = vsel %vm1173_vm8, %v1158_v19, %v1160_v31  ;;  %v1098_v16 = vpop.permute.xlu2 %1097 }
 0x31b   : > { %v1194_v2 = vmax.f32 %v1980_v18, %v1175_v32 }
 0x31d   : > { %v1210_v36 = vsel %vm2105_vm13, %v1139_v34, %v1194_v2 }
 0x31e   : > { %1230 = vrot.lane.b32.xlu1 %v1210_v36, %s1657_s25 }
 0x321   : > { %v1100_v15 = vpop.permute.xlu0 %1099 }
 0x322   : > { %v1111_v43 = vsel %vm424_vm11, %v1098_v16, %v1100_v15  ;;  %v1162_v44 = vpop.permute.xlu2 %1161 }
 0x323   : > { %v1140_v46 = vmax.f32 %v2033_v47, %v1111_v43 }
 0x329   : > { %v1102_v37 = vpop.permute.xlu1 %1101 }
 0x32a   : > { %v1112_v51 = vsel %vm424_vm11, %v1100_v15, %v1102_v37  ;;  %v1104_v57 = vpop.permute.xlu2 %1103 }
 0x32b   : > { %v1141_v54 = vmax.f32 %v1999_v20, %v1112_v51 }
 0x331   : > { %v1127_v41 = vpop.permute.xlu0 %1126  ;;  %v1166_v35 = vpop.permute.xlu1 %1165 }
 0x332   : > { %v1135_v39 = vsel %vm1133_vm12, %v1102_v37, %v1127_v41  ;;  %v1168_v0 = vpop.permute.xlu2 %1167 }
 0x333   : > { %v1142_v55 = vmax.f32 %v2011_v7, %v1135_v39 }
 0x339   : > { %v1149_v45 = vpop.permute.xlu0 %1148 }
 0x33a   : > { %v1190_v38 = vsel %vm1173_vm8, %v1149_v45, %v1162_v44 }
 0x33b   : > { %v1195_v18 = vmax.f32 %v2033_v47, %v1190_v38 }
 0x33d   : > { %v1211_v48 = vsel %vm2083_vm9, %v1140_v46, %v1195_v18 }
 0x33e   : > { %1232 = vrot.lane.b32.xlu2 %v1211_v48, %s1657_s25 }
 0x341   : > { %v1108_v49 = vpop.permute.xlu1 %1107  ;;  %v1164_v30 = vpop.permute.xlu0 %1163 }
 0x342   : > { %v1176_v52 = vsel %vm1173_vm8, %v1162_v44, %v1164_v30  ;;  %v1177_v40 = vsel %vm1173_vm8, %v1164_v30, %v1166_v35 }
 0x343   : > { %v1196_v47 = vmax.f32 %v1999_v20, %v1176_v52  ;;  %v1197_v56 = vmax.f32 %v2011_v7, %v1177_v40 }
 0x345   : > { %v1213_v58 = vsel %vm2105_vm13, %v1142_v55, %v1197_v56  ;;  %v1212_v59 = vsel %vm2094_vm10, %v1141_v54, %v1196_v47 }
 0x346   : > { %1236 = vrot.lane.b32.xlu1 %v1213_v58, %s1657_s25  ;;  %1234 = vrot.lane.b32.xlu0 %v1212_v59, %s1657_s25 }
 0x349   : > { %v1129_v29 = vpop.permute.xlu1 %1128  ;;  %v1106_v42 = vpop.permute.xlu0 %1105 }
 0x34a   : > { %v1113_v63 = vsel %vm424_vm11, %v1104_v57, %v1106_v42  ;;  %v1114_v20 = vsel %vm424_vm11, %v1106_v42, %v1108_v49  ;;  %v1136_v1 = vsel %vm1133_vm12, %v1108_v49, %v1129_v29  ;;  %vm1260_vm11 = vcmask 1047704  }
 0x34b   : > { %v1143_v4 = vmax.f32 %v2059_v62, %v1113_v63  ;;  %v1144_v9 = vmax.f32 %v2027_v53, %v1114_v20  ;;  %v1145_v19 = vmax.f32 %v2053_v61, %v1136_v1 }
 0x351   : > { %v1151_v60 = vpop.permute.xlu1 %1150  ;;  %v1170_v26 = vpop.permute.xlu0 %1169 }
 0x352   : > { %v1191_v7 = vsel %vm1173_vm8, %v1151_v60, %v1168_v0  ;;  %v1178_v6 = vsel %vm1173_vm8, %v1168_v0, %v1170_v26 }
 0x353   : > { %v1198_v5 = vmax.f32 %v2059_v62, %v1191_v7  ;;  %v1199_v3 = vmax.f32 %v2027_v53, %v1178_v6 }
 0x355   : > { %v1214_v50 = vsel %vm2083_vm9, %v1143_v4, %v1198_v5  ;;  %v1215_v14 = vsel %vm2094_vm10, %v1144_v9, %v1199_v3 }
 0x356   : > { %1238 = vrot.lane.b32.xlu2 %v1214_v50, %s1657_s25  ;;  %1240 = vrot.lane.b32.xlu0 %v1215_v14, %s1657_s25 }
 0x359   : > { %v1172_v62 = vpop.permute.xlu1 %1171 }
 0x35a   : > { %v1179_v17 = vsel %vm1173_vm8, %v1170_v26, %v1172_v62 }
 0x35b   : > { %v1200_v12 = vmax.f32 %v2053_v61, %v1179_v17 }
 0x35d   : > { %v1216_v53 = vsel %vm2105_vm13, %v1145_v19, %v1200_v12 }
 0x35e   : > { %1242 = vrot.lane.b32.xlu1 %v1216_v53, %s1657_s25 }
 0x369   : > { %v1227_v10 = vpop.permute.xlu2 %1226 }
 0x36a   : > { %1261 = vst.msk [vmem:[%s2160_s20] sm:$0xff] %vm1260_vm11, %v1227_v10  ;;  %v1271_v61 = vsel %vm1735_vm1, %v1227_v10, 0.0 }
 0x36b   : > { %1289 = vrot.lane.b32.xlu2 %v1271_v61, %s1649_s28  ;;  %v1344_v11 = vmul.f32 %v1271_v61, %v1271_v61 }
 0x373   : > { %1362 = vrot.lane.b32.xlu2 %v1344_v11, %s1649_s28 }
 0x388   : > { %v1229_v13 = vpop.permute.xlu0 %1228 }
 0x389   : > { %v1245_v24 = vsel %vm1244_vm14, %v1227_v10, %v1229_v13 }
 0x38a   : > { %1262 = vst [vmem:[%s2160_s20 + $0x8] sm:$0xff] %v1245_v24  ;;  %v1272_v8 = vsel %vm1739_vm2, %v1245_v24, 0.0 }
 0x38b   : > { %1291 = vrot.lane.b32.xlu0 %v1272_v8, %s1649_s28  ;;  %v1345_v27 = vmul.f32 %v1272_v8, %v1272_v8 }
 0x390   : > { %v1231_v25 = vpop.permute.xlu1 %1230 }
 0x391   : > { %v1246_v28 = vsel %vm1244_vm14, %v1229_v13, %v1231_v25 }
 0x392   : > { %1264 = vst.msk [vmem:[%s2160_s20 + $0x10] sm:$0xff] %vm1263_vm0, %v1246_v28  ;;  %v1273_v31 = vsel %vm1743_vm3, %v1246_v28, 0.0 }
 0x393   : > { %1293 = vrot.lane.b32.xlu1 %v1273_v31, %s1649_s28  ;;  %1364 = vrot.lane.b32.xlu0 %v1345_v27, %s1649_s28  ;;  %v1346_v32 = vmul.f32 %v1273_v31, %v1273_v31 }
 0x398   : > { %v1233_v33 = vpop.permute.xlu2 %1232 }
 0x399   : > { %1265 = vst.msk [vmem:[%s2160_s20 + $0x18] sm:$0xff] %vm1260_vm11, %v1233_v33  ;;  %v1274_v34 = vsel %vm1735_vm1, %v1233_v33, 0.0 }
 0x39a   : > { %1295 = vrot.lane.b32.xlu2 %v1274_v34, %s1649_s28  ;;  %v1347_v2 = vmul.f32 %v1274_v34, %v1274_v34 }
 0x39b   : > { %1366 = vrot.lane.b32.xlu1 %v1346_v32, %s1649_s28 }
 0x3a2   : > { %1368 = vrot.lane.b32.xlu2 %v1347_v2, %s1649_s28 }
 0x3b0   : > { %v1239_v36 = vpop.permute.xlu2 %1238 }
 0x3b1   : > { %1268 = vst.msk [vmem:[%s2160_s20 + $0x30] sm:$0xff] %vm1260_vm11, %v1239_v36  ;;  %v1277_v15 = vsel %vm1735_vm1, %v1239_v36, 0.0  ;;  %vm1323_vm1 = vcmask 261120  }
 0x3b2   : > { %1301 = vrot.lane.b32.xlu2 %v1277_v15, %s1649_s28  ;;  %v1350_v37 = vmul.f32 %v1277_v15, %v1277_v15 }
 0x3b8   : > { %v1237_v16 = vpop.permute.xlu1 %1236  ;;  %v1235_v41 = vpop.permute.xlu0 %1234 }
 0x3b9   : > { %v1247_v35 = vsel %vm1244_vm14, %v1233_v33, %v1235_v41  ;;  %v1248_v43 = vsel %vm1244_vm14, %v1235_v41, %v1237_v16 }
 0x3ba   : > { %1374 = vrot.lane.b32.xlu2 %v1350_v37, %s1649_s28  ;;  %1266 = vst [vmem:[%s2160_s20 + $0x20] sm:$0xff] %v1247_v35  ;;  %v1276_v44 = vsel %vm1743_vm3, %v1248_v43, 0.0  ;;  %v1275_v21 = vsel %vm1739_vm2, %v1247_v35, 0.0 }
 0x3bb   : > { %1267 = vst.msk [vmem:[%s2160_s20 + $0x28] sm:$0xff] %vm1263_vm0, %v1248_v43  ;;  %1299 = vrot.lane.b32.xlu1 %v1276_v44, %s1649_s28  ;;  %1297 = vrot.lane.b32.xlu0 %v1275_v21, %s1649_s28  ;;  %v1349_v45 = vmul.f32 %v1276_v44, %v1276_v44  ;;  %v1348_v38 = vmul.f32 %v1275_v21, %v1275_v21 }
 0x3c3   : > { %1372 = vrot.lane.b32.xlu1 %v1349_v45, %s1649_s28  ;;  %1370 = vrot.lane.b32.xlu0 %v1348_v38, %s1649_s28 }
 0x3c5   : > { %v1290_v40 = vpop.permute.xlu2 %1289 }
 0x3c8   : > { %v1241_v46 = vpop.permute.xlu0 %1240 }
 0x3c9   : > { %v1249_v18 = vsel %vm1244_vm14, %v1239_v36, %v1241_v46 }
 0x3ca   : > { %1269 = vst [vmem:[%s2160_s20 + $0x38] sm:$0xff] %v1249_v18  ;;  %v1278_v48 = vsel %vm1739_vm2, %v1249_v18, 0.0 }
 0x3cb   : > { %1303 = vrot.lane.b32.xlu0 %v1278_v48, %s1649_s28  ;;  %v1351_v30 = vmul.f32 %v1278_v48, %v1278_v48 }
 0x3cd   : > { %v1363_v59 = vpop.permute.xlu2 %1362 }
 0x3d0   : > { %v1243_v49 = vpop.permute.xlu1 %1242 }
 0x3d1   : > { %v1250_v51 = vsel %vm1244_vm14, %v1241_v46, %v1243_v49 }
 0x3d2   : > { %1270 = vst.msk [vmem:[%s2160_s20 + $0x40] sm:$0xff] %vm1263_vm0, %v1250_v51  ;;  %v1279_v39 = vsel %vm1743_vm3, %v1250_v51, 0.0 }
 0x3d3   : > { %1305 = vrot.lane.b32.xlu1 %v1279_v39, %s1649_s28  ;;  %1376 = vrot.lane.b32.xlu0 %v1351_v30, %s1649_s28  ;;  %v1352_v52 = vmul.f32 %v1279_v39, %v1279_v39 }
 0x3db   : > { %1378 = vrot.lane.b32.xlu1 %v1352_v52, %s1649_s28  ;;  %s1584_s28 = smul.u32 24, %s2282_s10 }
 0x3dd   : > { %s352_s23 = scalar_lea.vmem %s2261_s8, %s1584_s28  ;;  %s357_s29 = scalar_lea.vmem %s2262_s9, %s1584_s28 }
 0x3f4   : > { %v1296_v7 = vpop.permute.xlu2 %1295 }
 0x3fc   : > { %v1369_v14 = vpop.permute.xlu2 %1368 }
 0x3fd   : > { %v1292_v22 = vpop.permute.xlu0 %1291 }
 0x3fe   : > { %v1307_v55 = vsel %vm485_vm6, %v1290_v40, %v1292_v22 }
 0x405   : > { %v1294_v54 = vpop.permute.xlu1 %1293  ;;  %v1365_v58 = vpop.permute.xlu0 %1364 }
 0x406   : > { %v1308_v47 = vsel %vm485_vm6, %v1292_v22, %v1294_v54  ;;  %v1324_v23 = vsel %vm1323_vm1, %v1294_v54, 0.0  ;;  %v1380_v42 = vsel %vm485_vm6, %v1363_v59, %v1365_v58 }
 0x407   : > { %v1322_v56 = vadd.f32 %v1308_v47, %v1307_v55 }
 0x409   : > { %v1325_v57 = vadd.f32 %v1324_v23, %v1322_v56 }
 0x40b   : > { %1326 = vadd.xlane.f32.xlu2 %v1325_v57 }
 0x40c   : > { %v1302_v11 = vpop.permute.xlu2 %1301 }
 0x40d   : > { %v1367_v29 = vpop.permute.xlu1 %1366 }
 0x40e   : > { %v1381_v63 = vsel %vm485_vm6, %v1365_v58, %v1367_v29  ;;  %v1396_v60 = vsel %vm1323_vm1, %v1367_v29, 0.0 }
 0x40f   : > { %v1395_v0 = vadd.f32 %v1381_v63, %v1380_v42 }
 0x411   : > { %v1397_v20 = vadd.f32 %v1396_v60, %v1395_v0 }
 0x413   : > { %1398 = vadd.xlane.f32.xlu2 %v1397_v20 }
 0x414   : > { %v1375_v32 = vpop.permute.xlu2 %1374 }
 0x42d   : > { %v1300_v4 = vpop.permute.xlu1 %1299  ;;  %v1298_v5 = vpop.permute.xlu0 %1297 }
 0x42e   : > { %v1309_v26 = vsel %vm485_vm6, %v1296_v7, %v1298_v5  ;;  %v1310_v6 = vsel %vm485_vm6, %v1298_v5, %v1300_v4  ;;  %v1329_v3 = vsel %vm1323_vm1, %v1300_v4, 0.0 }
 0x42f   : > { %v1328_v9 = vadd.f32 %v1310_v6, %v1309_v26 }
 0x431   : > { %v1330_v50 = vadd.f32 %v1329_v3, %v1328_v9 }
 0x433   : > { %1331 = vadd.xlane.f32.xlu0 %v1330_v50 }
 0x435   : > { %v1373_v1 = vpop.permute.xlu1 %1372  ;;  %v1371_v62 = vpop.permute.xlu0 %1370 }
 0x436   : > { %v1382_v17 = vsel %vm485_vm6, %v1369_v14, %v1371_v62  ;;  %v1383_v19 = vsel %vm485_vm6, %v1371_v62, %v1373_v1  ;;  %v1401_v53 = vsel %vm1323_vm1, %v1373_v1, 0.0 }
 0x437   : > { %v1400_v12 = vadd.f32 %v1383_v19, %v1382_v17 }
 0x439   : > { %v1402_v10 = vadd.f32 %v1401_v53, %v1400_v12 }
 0x43b   : > { %1403 = vadd.xlane.f32.xlu2 %v1402_v10 }
 0x43d   : > { %v1304_v61 = vpop.permute.xlu0 %1303 }
 0x43e   : > { %v1311_v24 = vsel %vm485_vm6, %v1302_v11, %v1304_v61 }
 0x445   : > { %v1306_v13 = vpop.permute.xlu1 %1305  ;;  %v1377_v31 = vpop.permute.xlu0 %1376 }
 0x446   : > { %v1312_v8 = vsel %vm485_vm6, %v1304_v61, %v1306_v13  ;;  %v1334_v27 = vsel %vm1323_vm1, %v1306_v13, 0.0  ;;  %v1384_v34 = vsel %vm485_vm6, %v1375_v32, %v1377_v31 }
 0x447   : > { %v1333_v25 = vadd.f32 %v1312_v8, %v1311_v24 }
 0x449   : > { %v1335_v28 = vadd.f32 %v1334_v27, %v1333_v25 }
 0x44b   : > { %1336 = vadd.xlane.f32.xlu1 %v1335_v28 }
 0x44d   : > { %v1379_v33 = vpop.permute.xlu1 %1378 }
 0x44e   : > { %v1385_v2 = vsel %vm485_vm6, %v1377_v31, %v1379_v33  ;;  %v1406_v15 = vsel %vm1323_vm1, %v1379_v33, 0.0 }
 0x44f   : > { %v1405_v36 = vadd.f32 %v1385_v2, %v1384_v34 }
 0x451   : > { %v1407_v37 = vadd.f32 %v1406_v15, %v1405_v36 }
 0x453   : > { %1408 = vadd.xlane.f32.xlu0 %v1407_v37 }
 0x47e   : > { %v1327_v16 = vpop.xlane.xlu2 %1326 }
 0x47f   : > { %v1338_v41 = vmul.f32 0.25, %v1327_v16 }
 0x481   : > { %1341 = vst.msk [vmem:[%s352_s23] sm:$0xff] %vm1173_vm8, %v1338_v41 }
 0x486   : > { %v1399_v35 = vpop.xlane.xlu2 %1398 }
 0x487   : > { %v1410_v43 = vmul.f32 0.25, %v1399_v35 }
 0x489   : > { %1413 = vst.msk [vmem:[%s357_s29] sm:$0xff] %vm1173_vm8, %v1410_v43 }
 0x4a6   : > { %v1332_v44 = vpop.xlane.xlu0 %1331 }
 0x4a7   : > { %v1339_v21 = vmul.f32 0.25, %v1332_v44 }
 0x4a9   : > { %1342 = vst.msk [vmem:[%s352_s23 + $0x8] sm:$0xff] %vm1173_vm8, %v1339_v21 }
 0x4ae   : > { %v1404_v45 = vpop.xlane.xlu2 %1403 }
 0x4af   : > { %v1411_v38 = vmul.f32 0.25, %v1404_v45 }
 0x4b1   : > { %1414 = vst.msk [vmem:[%s357_s29 + $0x8] sm:$0xff] %vm1173_vm8, %v1411_v38 }
 0x4be   : > { %v1337_v46 = vpop.xlane.xlu1 %1336 }
 0x4bf   : > { %v1340_v18 = vmul.f32 0.25, %v1337_v46 }
 0x4c1   : > { %1343 = vst.msk [vmem:[%s352_s23 + $0x10] sm:$0xff] %vm1173_vm8, %v1340_v18 }
 0x4c6   : > { %v1409_v48 = vpop.xlane.xlu0 %1408 }
 0x4c7   : > { %v1412_v49 = vmul.f32 0.25, %v1409_v48 }
 0x4c9   : > { %1415 = vst.msk [vmem:[%s357_s29 + $0x10] sm:$0xff] %vm1173_vm8, %v1412_v49 }
 0x4ca PF: > { %s20_s30 = sadd.s32 1, %s1638_s30  }
 0x4cb   : > { %p17_p4 = scmp.ge.s32.totalorder %s20_s30, 4  }
 0x4cd   :  { %19 = sbr.rel (!%p17_p4) target bundleno = 1 (0x1), region = 105 }

// kernel: upscaler_forward.6
= control target key start
LH: loop header
LB: loop body
LE: loop exit
PB: predicated region body
PF: predicated region fallthrough
CT: control target
= control target key end

     0   :  { %s1933_s27 = smov 0   ;;  %s2821_s0 = inlined_call_operand.vmem [shape: f32[2,24,384], index: 0, kind: input, shape index: {}]   ;;  %s2822_s1 = inlined_call_operand.vmem [shape: bf16[2,3,216], index: 1, kind: input, shape index: {}]   ;;  %s2823_s2 = inlined_call_operand.vmem [shape: f32[3,1], index: 2, kind: input, shape index: {}]   ;;  %s2824_s3 = inlined_call_operand.vmem [shape: f32[24,1], index: 3, kind: input, shape index: {}]   ;;  %s2825_s4 = inlined_call_operand.vmem [shape: f32[24,1], index: 4, kind: input, shape index: {}]   ;;  %s2826_s5 = inlined_call_operand.vmem [shape: f32[1,384], index: 5, kind: input, shape index: {}]   ;;  %s2827_s6 = inlined_call_operand.vmem [shape: f32[2,3,288], index: 6, kind: output, shape index: {0}]   ;;  %s2828_s7 = inlined_call_operand.vmem [shape: f32[2,3,1], index: 7, kind: output, shape index: {1}]   ;;  %s2829_s8 = inlined_call_operand.vmem [shape: f32[2,3,1], index: 8, kind: output, shape index: {2}]  }
   0x1 LB: > { %s1818_s28 = sadd.s32 4294967295, %s1876_s27   ;;  %p1822_p0 = scmp.ge.s32.totalorder %s1876_s27, 1  ;;  %s1876_s27 = sphi %s1933_s27, %s19_s27  }
   0x2   : > { %p267_p1 = scmp.lt.s32.totalorder %s1876_s27, 3 }
   0x4   : > { %p268_p2 = pnand %p1822_p0, %p267_p1 }
   0x6   : > { %271 = sbr.rel (%p268_p2) target bundleno = 1037 (0x40d), region = 44 }
   0xb   : > { %v341_v0 = vld [vmem:[%s2824_s3 + $0x10] sm:$0xff]  ;;  %v339_v1 = vld [vmem:[%s2824_s3] sm:$0xff]  ;;  %v1878_v2 = vmov 0   ;;  %v340_v5 = vld [vmem:[%s2824_s3 + $0x8] sm:$0xff]  ;;  %p309_p3 = scmp.lt.s32.totalorder %s1818_s28, 1  ;;  %v2870_v27 = vmov 0 }
   0xc   : > { %1859 = vset.pattern.permute.xlu0 %v1878_v2  ;;  %1860 = vset.pattern.permute.xlu1 %v1878_v2  ;;  %v366_v3 = vld [vmem:[%s2825_s4] sm:$0xff]  ;;  %v368_v4 = vld [vmem:[%s2825_s4 + $0x10] sm:$0xff]  ;;  %v367_v6 = vld [vmem:[%s2825_s4 + $0x8] sm:$0xff]  ;;  %v2873_v28 = vmov 0  ;;  %v2876_v29 = vmov 0  ;;  %vm411_vm4 = vcmask 261120  }
   0xd   : > { %354 = vperm.xlu0 %1859, %v341_v0   ;;  %344 = vperm.xlu1 %1860, %v339_v1   ;;  %s2955_s28 = smov (!%p309_p3, %s1818_s28), 1  ;;  %v337_v7 = vld [vmem:[%s2826_s5] sm:$0x7]  ;;  %s1879_s25 = smov 90   ;;  %vm747_vm5 = vcmask 736256   ;;  %vm1122_vm6 = vcmask 1043456  }
   0xe   : > { %1861 = vset.pattern.permute.xlu2 %v1878_v2  ;;  %s1839_s21 = smul.u32 72, %s2955_s28  ;;  %vm338_vm0 = vcmp.ne.f32.partialorder %v337_v7, 0.0  ;;  %s1880_s26 = smov 109   ;;  %vm575_vm7 = vcmask 891904   ;;  %vm618_vm8 = vcmask 883712   ;;  %vm704_vm9 = vcmask 744448  }
   0xf   : > { %371 = vperm.xlu2 %1861, %v366_v3   ;;  %v393_v8 = vsel %vm338_vm0, 1, %v1878_v2  ;;  %s1881_s29 = smov 108   ;;  %s1882_s30 = smov 91   ;;  %vm661_vm10 = vcmask 752640   ;;  %vm532_vm11 = vcmask 900096   ;;  %vm489_vm12 = vcmask 1031168  }
  0x10   : > { %s1968_s24 = scalar_lea.vmem %s2821_s0, %s1839_s21  ;;  %v394_v13 = vperm.slane %v393_v8, 0  ;;  %v395_v16 = vperm.slane %v393_v8, 1  ;;  %v396_v17 = vperm.slane %v393_v8, 2  ;;  %s1883_s9 = smov 92   ;;  %vm1119_vm13 = vcmask 719872  }
  0x11   : > { %v328_v10 = vld [vmem:[%s1968_s24] sm:$0xff]  ;;  %v329_v11 = vld [vmem:[%s1968_s24 + $0x8] sm:$0xff]  ;;  %v330_v12 = vld [vmem:[%s1968_s24 + $0x10] sm:$0xff]  ;;  %s1884_s10 = smov 110   ;;  %s1885_s11 = smov 126   ;;  %vm446_vm14 = vcmask 1039360  }
  0x12   : > { %v334_v22 = vld [vmem:[%s1968_s24 + $0x30] sm:$0xff]  ;;  %v335_v23 = vld [vmem:[%s1968_s24 + $0x38] sm:$0xff]  ;;  %v336_v24 = vld [vmem:[%s1968_s24 + $0x40] sm:$0xff]  ;;  %vm1976_vm1 = vcmp.eq.s32.totalorder %v394_v13, 1  ;;  %vm1980_vm2 = vcmp.eq.s32.totalorder %v395_v16, 1  ;;  %vm1984_vm3 = vcmp.eq.s32.totalorder %v396_v17, 1 }
  0x13   : > { %v2871_v27 = vsel %vm1976_vm1, 4294967295, %v2870_v27  ;;  %v2874_v28 = vsel %vm1980_vm2, 4294967295, %v2873_v28  ;;  %v2877_v29 = vsel %vm1984_vm3, 4294967295, %v2876_v29  ;;  %v331_v33 = vld [vmem:[%s1968_s24 + $0x18] sm:$0xff]  ;;  %v332_v37 = vld [vmem:[%s1968_s24 + $0x20] sm:$0xff]  ;;  %v333_v38 = vld [vmem:[%s1968_s24 + $0x28] sm:$0xff] }
  0x14   : > { %2872 = vst [vmem:[#allocation3_spill] sm:$0xff] %v2871_v27  ;;  %s1886_s12 = smov 127   ;;  %s1887_s19 = smov 19   ;;  %vm1634_vm15 = vcmask 256000   ;;  %vm1643_vm0 = vcmask 154624  }
  0x15   : > { %381 = vperm.xlu0 %1859, %v368_v4   ;;  %349 = vperm.xlu1 %1860, %v340_v5   ;;  %2875 = vst [vmem:[#allocation4_spill] sm:$0xff] %v2874_v28  ;;  %s1840_s20 = smul.u32 12, %s2955_s28  ;;  %s1825_s24 = sshll.u32 %s2955_s28, 2 }
  0x16   : > { %2878 = vst [vmem:[#allocation5_spill] sm:$0xff] %v2877_v29 }
  0x17   : > { %376 = vperm.xlu2 %1861, %v367_v6   ;;  %s318_s23 = scalar_lea.vmem %s2827_s6, %s1840_s20 }
  0x69   : > { %v372_v9 = vpop.permute.xlu2 %371 }
  0x71   : > { %v377_v39 = vpop.permute.xlu2 %376 }
  0x7f   : > { %v355_v14 = vpop.permute.xlu0 %354  ;;  %v345_v15 = vpop.permute.xlu1 %344 }
  0x80   : > { %v357_v18 = vmul.f32 %v345_v15, %v328_v10  ;;  %v358_v19 = vmul.f32 %v345_v15, %v329_v11  ;;  %v359_v20 = vmul.f32 %v345_v15, %v330_v12  ;;  %v363_v34 = vmul.f32 %v355_v14, %v334_v22 }
  0x81   : > { %v364_v35 = vmul.f32 %v355_v14, %v335_v23  ;;  %v365_v36 = vmul.f32 %v355_v14, %v336_v24 }
  0x82   : > { %v384_v21 = vadd.f32 %v372_v9, %v357_v18  ;;  %v385_v25 = vadd.f32 %v372_v9, %v358_v19  ;;  %v386_v26 = vadd.f32 %v372_v9, %v359_v20 }
  0x84   : > { %v1990_v30 = vsel %vm1976_vm1, %v384_v21, 0.0  ;;  %v1994_v31 = vsel %vm1980_vm2, %v385_v25, 0.0  ;;  %v1998_v32 = vsel %vm1984_vm3, %v386_v26, 0.0 }
  0x85   : > { %409 = vst [vmem:[#allocation2] sm:$0xff] %v1990_v30 }
  0x86   : > { %410 = vst [vmem:[#allocation2 + $0x8] sm:$0xff] %v1994_v31 }
  0x87   : > { %412 = vst.msk [vmem:[#allocation2 + $0x10] sm:$0xff] %vm411_vm4, %v1998_v32  ;;  %v382_v40 = vpop.permute.xlu0 %381  ;;  %v350_v41 = vpop.permute.xlu1 %349 }
  0x88   : > { %v390_v42 = vadd.f32 %v382_v40, %v363_v34  ;;  %v391_v43 = vadd.f32 %v382_v40, %v364_v35  ;;  %v392_v44 = vadd.f32 %v382_v40, %v365_v36  ;;  %v360_v45 = vmul.f32 %v350_v41, %v331_v33 }
  0x89   : > { %v361_v46 = vmul.f32 %v350_v41, %v332_v37  ;;  %v362_v47 = vmul.f32 %v350_v41, %v333_v38 }
  0x8a   : > { %v2009_v48 = vsel %vm1976_vm1, %v390_v42, 0.0  ;;  %v2013_v49 = vsel %vm1980_vm2, %v391_v43, 0.0  ;;  %v2017_v50 = vsel %vm1984_vm3, %v392_v44, 0.0  ;;  %v387_v51 = vadd.f32 %v377_v39, %v360_v45 }
  0x8b   : > { %416 = vst [vmem:[#allocation2 + $0x30] sm:$0xff] %v2009_v48  ;;  %v388_v52 = vadd.f32 %v377_v39, %v361_v46  ;;  %v389_v53 = vadd.f32 %v377_v39, %v362_v47  ;;  %745 = vrot.lane.b32.xlu2 %v2017_v50, %s1879_s25  ;;  %743 = vrot.lane.b32.xlu1 %v2013_v49, %s1879_s25 }
  0x8c   : > { %417 = vst [vmem:[#allocation2 + $0x38] sm:$0xff] %v2013_v49  ;;  %v2025_v54 = vsel %vm1976_vm1, %v387_v51, 0.0  ;;  %741 = vrot.lane.b32.xlu0 %v2009_v48, %s1879_s25 }
  0x8d   : > { %418 = vst.msk [vmem:[#allocation2 + $0x40] sm:$0xff] %vm411_vm4, %v2017_v50  ;;  %v2032_v55 = vsel %vm1980_vm2, %v388_v52, 0.0  ;;  %v2036_v56 = vsel %vm1984_vm3, %v389_v53, 0.0 }
  0x8e   : > { %413 = vst [vmem:[#allocation2 + $0x18] sm:$0xff] %v2025_v54  ;;  %v774_v57 = vld [vmem:[#allocation2 + $0x10] sm:$0xff] }
  0x8f   : > { %414 = vst [vmem:[#allocation2 + $0x20] sm:$0xff] %v2032_v55  ;;  %v2045_v58 = vpack.c.bf16 %v774_v57, %v774_v57 }
  0x90   : > { %415 = vst.msk [vmem:[#allocation2 + $0x28] sm:$0xff] %vm411_vm4, %v2036_v56 }
  0x91   : > { %2879 = vst [vmem:[#allocation6_spill] sm:$0xff] %v2045_v58  ;;  %v1270_v61 = vunpack.c.l.b16 %v2045_v58 }
  0x93   : > { %733 = vrot.lane.b32.xlu2 %v1998_v32, %s1879_s25  ;;  %731 = vrot.lane.b32.xlu1 %v1994_v31, %s1879_s25 }
  0x94   : > { %729 = vrot.lane.b32.xlu0 %v1990_v30, %s1879_s25 }
  0x97   : > { %v777_v59 = vld [vmem:[#allocation2 + $0x28] sm:$0xff] }
  0x98   : > { %v2047_v60 = vpack.c.bf16 %v777_v59, %v777_v59 }
  0x9a   : > { %2880 = vst [vmem:[#allocation7_spill] sm:$0xff] %v2047_v60  ;;  %v1273_v62 = vunpack.c.l.b16 %v2047_v60 }
  0x9b   : > { %739 = vrot.lane.b32.xlu2 %v2036_v56, %s1879_s25  ;;  %737 = vrot.lane.b32.xlu1 %v2032_v55, %s1879_s25 }
  0x9c   : > { %735 = vrot.lane.b32.xlu0 %v2025_v54, %s1879_s25  ;;  %v2054_v63 = vpack.c.b16 %v1273_v62, %v1270_v61 }
  0x9e   : > { %2881 = vst [vmem:[#allocation8_spill] sm:$0xff] %v2054_v63 }
  0xa3   : > { %573 = vrot.lane.b32.xlu2 %v2017_v50, %s1880_s26  ;;  %571 = vrot.lane.b32.xlu1 %v2013_v49, %s1880_s26 }
  0xa4   : > { %569 = vrot.lane.b32.xlu0 %v2009_v48, %s1880_s26 }
  0xab   : > { %604 = vrot.lane.b32.xlu2 %v1998_v32, %s1881_s29  ;;  %602 = vrot.lane.b32.xlu1 %v1994_v31, %s1881_s29 }
  0xac   : > { %600 = vrot.lane.b32.xlu0 %v1990_v30, %s1881_s29 }
  0xb3   : > { %696 = vrot.lane.b32.xlu2 %v2036_v56, %s1882_s30  ;;  %694 = vrot.lane.b32.xlu1 %v2032_v55, %s1882_s30 }
  0xb4   : > { %692 = vrot.lane.b32.xlu0 %v2025_v54, %s1882_s30 }
  0xbb   : > { %702 = vrot.lane.b32.xlu2 %v2017_v50, %s1882_s30  ;;  %700 = vrot.lane.b32.xlu1 %v2013_v49, %s1882_s30 }
  0xbc   : > { %698 = vrot.lane.b32.xlu0 %v2009_v48, %s1882_s30 }
  0xc3   : > { %561 = vrot.lane.b32.xlu2 %v1998_v32, %s1880_s26  ;;  %559 = vrot.lane.b32.xlu1 %v1994_v31, %s1880_s26 }
  0xc4   : > { %557 = vrot.lane.b32.xlu0 %v1990_v30, %s1880_s26 }
  0xcb   : > { %567 = vrot.lane.b32.xlu2 %v2036_v56, %s1880_s26  ;;  %565 = vrot.lane.b32.xlu1 %v2032_v55, %s1880_s26 }
  0xcc   : > { %563 = vrot.lane.b32.xlu0 %v2025_v54, %s1880_s26 }
  0xd3   : > { %659 = vrot.lane.b32.xlu2 %v2017_v50, %s1883_s9  ;;  %657 = vrot.lane.b32.xlu1 %v2013_v49, %s1883_s9 }
  0xd4   : > { %655 = vrot.lane.b32.xlu0 %v2009_v48, %s1883_s9 }
  0xdb   : > { %690 = vrot.lane.b32.xlu2 %v1998_v32, %s1882_s30  ;;  %688 = vrot.lane.b32.xlu1 %v1994_v31, %s1882_s30 }
  0xdc   : > { %686 = vrot.lane.b32.xlu0 %v1990_v30, %s1882_s30 }
  0xe3   : > { %524 = vrot.lane.b32.xlu2 %v2036_v56, %s1884_s10  ;;  %522 = vrot.lane.b32.xlu1 %v2032_v55, %s1884_s10 }
  0xe4   : > { %520 = vrot.lane.b32.xlu0 %v2025_v54, %s1884_s10 }
  0xe5   : > { %v746_v0 = vpop.permute.xlu2 %745 }
  0xe6   : > { %771 = vst.msk [vmem:[#allocation2 + $0x280] sm:$0xff] %vm411_vm4, %v746_v0 }
  0xeb   : > { %530 = vrot.lane.b32.xlu2 %v2017_v50, %s1884_s10  ;;  %528 = vrot.lane.b32.xlu1 %v2013_v49, %s1884_s10 }
  0xec   : > { %526 = vrot.lane.b32.xlu0 %v2009_v48, %s1884_s10 }
  0xed   : > { %v734_v1 = vpop.permute.xlu2 %733 }
  0xee   : > { %765 = vst.msk [vmem:[#allocation2 + $0x250] sm:$0xff] %vm411_vm4, %v734_v1 }
  0xf3   : > { %647 = vrot.lane.b32.xlu2 %v1998_v32, %s1883_s9  ;;  %645 = vrot.lane.b32.xlu1 %v1994_v31, %s1883_s9 }
  0xf4   : > { %643 = vrot.lane.b32.xlu0 %v1990_v30, %s1883_s9 }
  0xf5   : > { %v740_v2 = vpop.permute.xlu2 %739  ;;  %v2110_v3 = vld [vmem:[#allocation2 + $0x250] sm:$0xff] }
  0xf6   : > { %768 = vst.msk [vmem:[#allocation2 + $0x268] sm:$0xff] %vm411_vm4, %v740_v2  ;;  %v2121_v7 = vpack.c.bf16 %v2110_v3, %v2110_v3 }
  0xf8   : > { %v1342_v14 = vunpack.c.l.b16 %v2121_v7 }
  0xfb   : > { %653 = vrot.lane.b32.xlu2 %v2036_v56, %s1883_s9  ;;  %651 = vrot.lane.b32.xlu1 %v2032_v55, %s1883_s9 }
  0xfc   : > { %649 = vrot.lane.b32.xlu0 %v2025_v54, %s1883_s9 }
  0xfd   : > { %v744_v4 = vpop.permute.xlu1 %743  ;;  %v2115_v5 = vpop.permute.xlu2 %573  ;;  %v2117_v6 = vld [vmem:[#allocation2 + $0x268] sm:$0xff] }
  0xfe   : > { %v753_v8 = vsel %vm747_vm5, %v744_v4, %v746_v0  ;;  %v742_v9 = vpop.permute.xlu0 %741  ;;  %599 = vst.msk [vmem:[#allocation2 + $0x160] sm:$0xff] %vm411_vm4, %v2115_v5  ;;  %v2128_v10 = vpack.c.bf16 %v2117_v6, %v2117_v6 }
  0xff   : > { %v752_v11 = vsel %vm747_vm5, %v742_v9, %v744_v4 }
 0x100   : > { %v2131_v12 = vpack.c.bf16 %v753_v8, %v752_v11  ;;  %v1345_v13 = vunpack.c.l.b16 %v2128_v10 }
 0x102   : > { %2882 = vst [vmem:[#allocation9_spill] sm:$0xff] %v2131_v12  ;;  %v985_v15 = vunpack.c.l.bf16 %v2131_v12  ;;  %v986_v16 = vunpack.c.h.bf16 %v2131_v12  ;;  %v2141_v17 = vpack.c.b16 %v1345_v13, %v1342_v14 }
 0x103   : > { %487 = vrot.lane.b32.xlu2 %v2017_v50, %s1885_s11  ;;  %485 = vrot.lane.b32.xlu1 %v2013_v49, %s1885_s11 }
 0x104   : > { %2883 = vst [vmem:[#allocation10_spill] sm:$0xff] %v2141_v17  ;;  %483 = vrot.lane.b32.xlu0 %v2009_v48, %s1885_s11  ;;  %v1066_v18 = vsub.f32 %v752_v11, %v985_v15  ;;  %v1067_v19 = vsub.f32 %v753_v8, %v986_v16 }
 0x105   : > { %v2145_v20 = vpop.permute.xlu2 %604  ;;  %v732_v21 = vpop.permute.xlu1 %731  ;;  %v2153_v35 = vld [vmem:[#allocation2 + $0x160] sm:$0xff] }
 0x106   : > { %636 = vst.msk [vmem:[#allocation2 + $0x178] sm:$0xff] %vm411_vm4, %v2145_v20  ;;  %v749_v22 = vsel %vm747_vm5, %v732_v21, %v734_v1  ;;  %v730_v23 = vpop.permute.xlu0 %729  ;;  %v1108_v24 = vpack.c.bf16 %v1066_v18, %v1066_v18  ;;  %v1109_v25 = vpack.c.bf16 %v1067_v19, %v1067_v19  ;;  %v2167_v40 = vpack.c.bf16 %v2153_v35, %v2153_v35 }
 0x107   : > { %v748_v26 = vsel %vm747_vm5, %v730_v23, %v732_v21 }
 0x108   : > { %v1124_v33 = vsel %vm1122_vm6, %v1108_v24, 0  ;;  %v1127_v34 = vsel %vm1122_vm6, %v1109_v25, 0  ;;  %v901_v36 = vpack.c.bf16 %v749_v22, %v748_v26  ;;  %v1312_v52 = vunpack.c.l.b16 %v2167_v40 }
 0x109   : > { %1147 = vmatpush.bf16.msra.mxu1 %v1124_v33  ;;  %1173 = vmatpush.bf16.msra.mxu3 %v1127_v34 }
 0x10a   : > { %v979_v45 = vunpack.c.l.bf16 %v901_v36  ;;  %v980_v47 = vunpack.c.h.bf16 %v901_v36  ;;  %v1341_v59 = vunpack.c.h.b16 %v901_v36  ;;  %v1340_v0 = vunpack.c.l.b16 %v901_v36 }
 0x10b   : > { %518 = vrot.lane.b32.xlu2 %v1998_v32, %s1884_s10  ;;  %516 = vrot.lane.b32.xlu1 %v1994_v31, %s1884_s10 }
 0x10c   : > { %514 = vrot.lane.b32.xlu0 %v1990_v30, %s1884_s10  ;;  %v1060_v62 = vsub.f32 %v748_v26, %v979_v45  ;;  %v1061_v8 = vsub.f32 %v749_v22, %v980_v47  ;;  %s326_s10 = scalar_lea.vmem %s2829_s8, %s1825_s24 }
 0x10d   : > { %v2161_v37 = vpop.permute.xlu2 %696  ;;  %v738_v38 = vpop.permute.xlu1 %737  ;;  %v2163_v39 = vld [vmem:[#allocation2 + $0x178] sm:$0xff] }
 0x10e   : > { %725 = vst.msk [vmem:[#allocation2 + $0x220] sm:$0xff] %vm411_vm4, %v2161_v37  ;;  %v751_v41 = vsel %vm747_vm5, %v738_v38, %v740_v2  ;;  %v736_v42 = vpop.permute.xlu0 %735  ;;  %v2174_v43 = vpack.c.bf16 %v2163_v39, %v2163_v39 }
 0x10f   : > { %v750_v44 = vsel %vm747_vm5, %v736_v42, %v738_v38 }
 0x110   : > { %v903_v46 = vpack.c.bf16 %v751_v41, %v750_v44  ;;  %v1315_v51 = vunpack.c.l.b16 %v2174_v43 }
 0x112   : > { %v982_v53 = vunpack.c.l.bf16 %v903_v46  ;;  %v983_v57 = vunpack.c.h.bf16 %v903_v46  ;;  %v1344_v61 = vunpack.c.h.b16 %v903_v46  ;;  %v1343_v1 = vunpack.c.l.b16 %v903_v46 }
 0x113   : > { %610 = vrot.lane.b32.xlu2 %v2036_v56, %s1881_s29  ;;  %608 = vrot.lane.b32.xlu1 %v2032_v55, %s1881_s29  ;;  %v2183_v2 = vpack.c.b16 %v1315_v51, %v1312_v52 }
 0x114   : > { %606 = vrot.lane.b32.xlu0 %v2025_v54, %s1881_s29  ;;  %v1063_v4 = vsub.f32 %v750_v44, %v982_v53  ;;  %v1064_v9 = vsub.f32 %v751_v41, %v983_v57  ;;  %v2187_v11 = vpack.c.b16 %v1344_v61, %v1341_v59  ;;  %v2191_v15 = vpack.c.b16 %v1343_v1, %v1340_v0 }
 0x115   : > { %2884 = vst [vmem:[#allocation11_spill] sm:$0xff] %v2183_v2  ;;  %v2189_v13 = vpop.permute.xlu2 %702  ;;  %v572_v14 = vpop.permute.xlu1 %571  ;;  %v2198_v22 = vld [vmem:[#allocation2 + $0x220] sm:$0xff] }
 0x116   : > { %2885 = vst [vmem:[#allocation12_spill] sm:$0xff] %v2187_v11  ;;  %v581_v16 = vsel %vm575_vm7, %v572_v14, %v2115_v5  ;;  %v570_v18 = vpop.permute.xlu0 %569  ;;  %v1105_v19 = vpack.c.bf16 %v1063_v4, %v1060_v62  ;;  %v1106_v21 = vpack.c.bf16 %v1064_v9, %v1061_v8  ;;  %v2212_v33 = vpack.c.bf16 %v2198_v22, %v2198_v22 }
 0x117   : > { %2886 = vst [vmem:[#allocation13_spill] sm:$0xff] %v2191_v15  ;;  %v580_v23 = vsel %vm575_vm7, %v570_v18, %v572_v14 }
 0x118   : > { %728 = vst.msk [vmem:[#allocation2 + $0x238] sm:$0xff] %vm411_vm4, %v2189_v13  ;;  %1148 = vmatpush.bf16.msra.mxu1 %v1105_v19  ;;  %1174 = vmatpush.bf16.msra.mxu3 %v1106_v21  ;;  %v881_v24 = vpack.c.bf16 %v581_v16, %v580_v23  ;;  %v1336_v47 = vunpack.c.l.b16 %v2212_v33 }
 0x11a   : > { %v949_v42 = vunpack.c.l.bf16 %v881_v24  ;;  %v950_v45 = vunpack.c.h.bf16 %v881_v24  ;;  %v1311_v53 = vunpack.c.h.b16 %v881_v24  ;;  %v1310_v59 = vunpack.c.l.b16 %v881_v24 }
 0x11b   : > { %616 = vrot.lane.b32.xlu2 %v2017_v50, %s1881_s29  ;;  %614 = vrot.lane.b32.xlu1 %v2013_v49, %s1881_s29 }
 0x11c   : > { %612 = vrot.lane.b32.xlu0 %v2009_v48, %s1881_s29  ;;  %v1031_v1 = vsub.f32 %v581_v16, %v950_v45  ;;  %s322_s29 = scalar_lea.vmem %s2828_s7, %s1825_s24 }
 0x11d   : > { %v2206_v5 = vpop.permute.xlu2 %561  ;;  %v603_v25 = vpop.permute.xlu1 %602 }
 0x11e   : > { %593 = vst.msk [vmem:[#allocation2 + $0x130] sm:$0xff] %vm411_vm4, %v2206_v5  ;;  %v620_v34 = vsel %vm618_vm8, %v603_v25, %v2145_v20  ;;  %v601_v36 = vpop.permute.xlu0 %600  ;;  %v1030_v20 = vsub.f32 %v580_v23, %v949_v42 }
 0x11f   : > { %v2208_v26 = vld [vmem:[#allocation2 + $0x238] sm:$0xff]  ;;  %v619_v41 = vsel %vm618_vm8, %v601_v36, %v603_v25 }
 0x120   : > { %v2220_v38 = vpack.c.bf16 %v2208_v26, %v2208_v26  ;;  %v883_v44 = vpack.c.bf16 %v620_v34, %v619_v41 }
 0x122   : > { %v1339_v46 = vunpack.c.l.b16 %v2220_v38  ;;  %v952_v51 = vunpack.c.l.bf16 %v883_v44  ;;  %v953_v52 = vunpack.c.h.bf16 %v883_v44  ;;  %v1314_v57 = vunpack.c.h.b16 %v883_v44 }
 0x123   : > { %475 = vrot.lane.b32.xlu2 %v1998_v32, %s1885_s11  ;;  %473 = vrot.lane.b32.xlu1 %v1994_v31, %s1885_s11  ;;  %v1313_v61 = vunpack.c.l.b16 %v883_v44 }
 0x124   : > { %v2229_v62 = vpack.c.b16 %v1339_v46, %v1336_v47  ;;  %471 = vrot.lane.b32.xlu0 %v1990_v30, %s1885_s11  ;;  %v1033_v0 = vsub.f32 %v619_v41, %v952_v51  ;;  %v1034_v4 = vsub.f32 %v620_v34, %v953_v52  ;;  %v2233_v8 = vpack.c.b16 %v1314_v57, %v1311_v53 }
 0x125   : > { %v2235_v9 = vpop.permute.xlu2 %567  ;;  %v695_v14 = vpop.permute.xlu1 %694  ;;  %v2237_v18 = vpack.c.b16 %v1313_v61, %v1310_v59  ;;  %v2244_v16 = vld [vmem:[#allocation2 + $0x130] sm:$0xff] }
 0x126   : > { %2887 = vst [vmem:[#allocation14_spill] sm:$0xff] %v2229_v62  ;;  %v708_v19 = vsel %vm704_vm9, %v695_v14, %v2161_v37  ;;  %v693_v21 = vpop.permute.xlu0 %692  ;;  %v1090_v23 = vpack.c.bf16 %v1033_v0, %v1030_v20  ;;  %v1091_v24 = vpack.c.bf16 %v1034_v4, %v1031_v1  ;;  %v2258_v42 = vpack.c.bf16 %v2244_v16, %v2244_v16 }
 0x127   : > { %2888 = vst [vmem:[#allocation15_spill] sm:$0xff] %v2233_v8  ;;  %v707_v25 = vsel %vm704_vm9, %v693_v21, %v695_v14 }
 0x128   : > { %2889 = vst [vmem:[#allocation16_spill] sm:$0xff] %v2237_v18  ;;  %1132 = vmatpush.bf16.msra.mxu0 %v1090_v23  ;;  %1158 = vmatpush.bf16.msra.mxu2 %v1091_v24  ;;  %v897_v34 = vpack.c.bf16 %v708_v19, %v707_v25  ;;  %v1306_v20 = vunpack.c.l.b16 %v2258_v42 }
 0x129   : > { %596 = vst.msk [vmem:[#allocation2 + $0x148] sm:$0xff] %vm411_vm4, %v2235_v9 }
 0x12a   : > { %v973_v51 = vunpack.c.l.bf16 %v897_v34  ;;  %v974_v53 = vunpack.c.h.bf16 %v897_v34  ;;  %v1335_v0 = vunpack.c.h.b16 %v897_v34  ;;  %v1334_v4 = vunpack.c.l.b16 %v897_v34 }
 0x12b   : > { %481 = vrot.lane.b32.xlu2 %v2036_v56, %s1885_s11  ;;  %479 = vrot.lane.b32.xlu1 %v2032_v55, %s1885_s11 }
 0x12c   : > { %477 = vrot.lane.b32.xlu0 %v2025_v54, %s1885_s11  ;;  %v1055_v24 = vsub.f32 %v708_v19, %v974_v53 }
 0x12d   : > { %v2252_v37 = vpop.permute.xlu2 %659  ;;  %v701_v36 = vpop.permute.xlu1 %700 }
 0x12e   : > { %685 = vst.msk [vmem:[#allocation2 + $0x1f0] sm:$0xff] %vm411_vm4, %v2252_v37  ;;  %v710_v44 = vsel %vm704_vm9, %v701_v36, %v2189_v13  ;;  %v699_v45 = vpop.permute.xlu0 %698  ;;  %v1054_v13 = vsub.f32 %v707_v25, %v973_v51 }
 0x12f   : > { %v709_v47 = vsel %vm704_vm9, %v699_v45, %v701_v36 }
 0x130   : > { %v2254_v41 = vld [vmem:[#allocation2 + $0x148] sm:$0xff]  ;;  %v899_v52 = vpack.c.bf16 %v710_v44, %v709_v47 }
 0x131   : > { %v2266_v46 = vpack.c.bf16 %v2254_v41, %v2254_v41 }
 0x132   : > { %v976_v59 = vunpack.c.l.bf16 %v899_v52  ;;  %v977_v61 = vunpack.c.h.bf16 %v899_v52  ;;  %v1338_v1 = vunpack.c.h.b16 %v899_v52  ;;  %v1337_v14 = vunpack.c.l.b16 %v899_v52 }
 0x133   : > { %v1309_v57 = vunpack.c.l.b16 %v2266_v46  ;;  %438 = vrot.lane.b32.xlu2 %v2036_v56, %s1886_s12  ;;  %436 = vrot.lane.b32.xlu1 %v2032_v55, %s1886_s12 }
 0x134   : > { %434 = vrot.lane.b32.xlu0 %v2025_v54, %s1886_s12  ;;  %v1057_v23 = vsub.f32 %v709_v47, %v976_v59  ;;  %v1058_v36 = vsub.f32 %v710_v44, %v977_v61  ;;  %v2279_v45 = vpack.c.b16 %v1338_v1, %v1335_v0  ;;  %v2283_v56 = vpack.c.b16 %v1337_v14, %v1334_v4 }
 0x135   : > { %v2275_v21 = vpack.c.b16 %v1309_v57, %v1306_v20  ;;  %v2281_v29 = vpop.permute.xlu2 %690  ;;  %v560_v28 = vpop.permute.xlu1 %559  ;;  %v2290_v19 = vld [vmem:[#allocation2 + $0x1f0] sm:$0xff] }
 0x136   : > { %2891 = vst [vmem:[#allocation18_spill] sm:$0xff] %v2279_v45  ;;  %v577_v55 = vsel %vm575_vm7, %v560_v28, %v2206_v5  ;;  %v558_v25 = vpop.permute.xlu0 %557  ;;  %v1102_v34 = vpack.c.bf16 %v1057_v23, %v1054_v13  ;;  %v1103_v51 = vpack.c.bf16 %v1058_v36, %v1055_v24 }
 0x137   : > { %2890 = vst [vmem:[#allocation17_spill] sm:$0xff] %v2275_v21  ;;  %v576_v54 = vsel %vm575_vm7, %v558_v25, %v560_v28  ;;  %v2304_v28 = vpack.c.bf16 %v2290_v19, %v2290_v19 }
 0x138   : > { %2892 = vst [vmem:[#allocation19_spill] sm:$0xff] %v2283_v56  ;;  %1149 = vmatpush.bf16.msra.mxu1 %v1102_v34  ;;  %1175 = vmatpush.bf16.msra.mxu3 %v1103_v51  ;;  %v877_v44 = vpack.c.bf16 %v577_v55, %v576_v54 }
 0x139   : > { %722 = vst.msk [vmem:[#allocation2 + $0x208] sm:$0xff] %vm411_vm4, %v2281_v29  ;;  %v1330_v0 = vunpack.c.l.b16 %v2304_v28 }
 0x13a   : > { %v943_v57 = vunpack.c.l.bf16 %v877_v44  ;;  %v944_v59 = vunpack.c.h.bf16 %v877_v44  ;;  %v1305_v4 = vunpack.c.h.b16 %v877_v44  ;;  %v1304_v23 = vunpack.c.l.b16 %v877_v44 }
 0x13b   : > { %444 = vrot.lane.b32.xlu2 %v2017_v50, %s1886_s12  ;;  %442 = vrot.lane.b32.xlu1 %v2013_v49, %s1886_s12 }
 0x13c   : > { %440 = vrot.lane.b32.xlu0 %v2009_v48, %s1886_s12  ;;  %v1025_v34 = vsub.f32 %v577_v55, %v944_v59 }
 0x13d   : > { %v2298_v5 = vpop.permute.xlu2 %524  ;;  %v566_v47 = vpop.permute.xlu1 %565 }
 0x13e   : > { %553 = vst.msk [vmem:[#allocation2 + $0x100] sm:$0xff] %vm411_vm4, %v2298_v5  ;;  %v579_v50 = vsel %vm575_vm7, %v566_v47, %v2235_v9  ;;  %v564_v49 = vpop.permute.xlu0 %563  ;;  %v1024_v9 = vsub.f32 %v576_v54, %v943_v57 }
 0x13f   : > { %v578_v48 = vsel %vm575_vm7, %v564_v49, %v566_v47 }
 0x140   : > { %v2300_v52 = vld [vmem:[#allocation2 + $0x208] sm:$0xff]  ;;  %v879_v20 = vpack.c.bf16 %v579_v50, %v578_v48 }
 0x141   : > { %v2312_v53 = vpack.c.bf16 %v2300_v52, %v2300_v52 }
 0x142   : > { %v946_v1 = vunpack.c.l.bf16 %v879_v20  ;;  %v947_v13 = vunpack.c.h.bf16 %v879_v20  ;;  %v1308_v14 = vunpack.c.h.b16 %v879_v20  ;;  %v1307_v24 = vunpack.c.l.b16 %v879_v20 }
 0x143   : > { %v1333_v61 = vunpack.c.l.b16 %v2312_v53  ;;  %432 = vrot.lane.b32.xlu2 %v1998_v32, %s1886_s12  ;;  %430 = vrot.lane.b32.xlu1 %v1994_v31, %s1886_s12 }
 0x144   : > { %428 = vrot.lane.b32.xlu0 %v1990_v30, %s1886_s12  ;;  %v1027_v25 = vsub.f32 %v578_v48, %v946_v1  ;;  %v1028_v51 = vsub.f32 %v579_v50, %v947_v13  ;;  %v2325_v47 = vpack.c.b16 %v1308_v14, %v1305_v4  ;;  %v2327_v63 = vpack.c.b16 %v1307_v24, %v1304_v23  ;;  %v1607_v30 = vld [vmem:[%s2823_s2] sm:$0x7] }
 0x145   : > { %v2321_v36 = vpack.c.b16 %v1333_v61, %v1330_v0  ;;  %v531_v49 = vpop.permute.xlu2 %530  ;;  %v658_v27 = vpop.permute.xlu1 %657  ;;  %v2336_v55 = vld [vmem:[#allocation2 + $0x100] sm:$0xff] }
 0x146   : > { %2894 = vst [vmem:[#allocation21_spill] sm:$0xff] %v2325_v47  ;;  %v667_v31 = vsel %vm661_vm10, %v658_v27, %v2252_v37  ;;  %v656_v32 = vpop.permute.xlu0 %655  ;;  %v1087_v54 = vpack.c.bf16 %v1027_v25, %v1024_v9  ;;  %v1088_v44 = vpack.c.bf16 %v1028_v51, %v1025_v34  ;;  %v2344_v37 = vpack.c.bf16 %v2336_v55, %v2336_v55 }
 0x147   : > { %2893 = vst [vmem:[#allocation20_spill] sm:$0xff] %v2321_v36  ;;  %v666_v57 = vsel %vm661_vm10, %v656_v32, %v658_v27 }
 0x148   : > { %2895 = vst [vmem:[#allocation22_spill] sm:$0xff] %v2327_v63  ;;  %1133 = vmatpush.bf16.msra.mxu0 %v1087_v54  ;;  %1159 = vmatpush.bf16.msra.mxu2 %v1088_v44  ;;  %v893_v50 = vpack.c.bf16 %v667_v31, %v666_v57  ;;  %v1300_v23 = vunpack.c.l.b16 %v2344_v37 }
 0x149   : > { %556 = vst.msk [vmem:[#allocation2 + $0x118] sm:$0xff] %vm411_vm4, %v531_v49 }
 0x14a   : > { %v967_v13 = vunpack.c.l.bf16 %v893_v50  ;;  %v968_v14 = vunpack.c.h.bf16 %v893_v50  ;;  %v1329_v34 = vunpack.c.h.b16 %v893_v50  ;;  %v1328_v32 = vunpack.c.l.b16 %v893_v50 }
 0x14c   : > { %1610 = vperm.xlu0 %1859, %v1607_v30   ;;  %v1049_v36 = vsub.f32 %v667_v31, %v968_v14 }
 0x14d   : > { %v2338_v48 = vpop.permute.xlu2 %647  ;;  %v689_v20 = vpop.permute.xlu1 %688 }
 0x14e   : > { %679 = vst.msk [vmem:[#allocation2 + $0x1c0] sm:$0xff] %vm411_vm4, %v2338_v48  ;;  %v706_v27 = vsel %vm704_vm9, %v689_v20, %v2281_v29  ;;  %v687_v61 = vpop.permute.xlu0 %686  ;;  %v1048_v29 = vsub.f32 %v666_v57, %v967_v13 }
 0x14f   : > { %v705_v1 = vsel %vm704_vm9, %v687_v61, %v689_v20 }
 0x150   : > { %v2340_v59 = vld [vmem:[#allocation2 + $0x118] sm:$0xff]  ;;  %v895_v4 = vpack.c.bf16 %v706_v27, %v705_v1 }
 0x151   : > { %v2352_v0 = vpack.c.bf16 %v2340_v59, %v2340_v59 }
 0x152   : > { %v970_v24 = vunpack.c.l.bf16 %v895_v4  ;;  %v971_v25 = vunpack.c.h.bf16 %v895_v4  ;;  %v1332_v51 = vunpack.c.h.b16 %v895_v4  ;;  %v1331_v54 = vunpack.c.l.b16 %v895_v4 }
 0x153   : > { %v1303_v9 = vunpack.c.l.b16 %v2352_v0 }
 0x154   : > { %v1051_v30 = vsub.f32 %v705_v1, %v970_v24  ;;  %v1052_v20 = vsub.f32 %v706_v27, %v971_v25  ;;  %v2359_v61 = vpack.c.b16 %v1332_v51, %v1329_v34  ;;  %v2361_v21 = vpack.c.b16 %v1331_v54, %v1328_v32 }
 0x155   : > { %v2357_v44 = vpack.c.b16 %v1303_v9, %v1300_v23  ;;  %v654_v62 = vpop.permute.xlu2 %653  ;;  %v523_v17 = vpop.permute.xlu1 %522  ;;  %v2367_v31 = vld [vmem:[#allocation2 + $0x1c0] sm:$0xff] }
 0x156   : > { %2897 = vst [vmem:[#allocation24_spill] sm:$0xff] %v2359_v61  ;;  %v536_v2 = vsel %vm532_vm11, %v523_v17, %v2298_v5  ;;  %v521_v56 = vpop.permute.xlu0 %520  ;;  %v1099_v57 = vpack.c.bf16 %v1051_v30, %v1048_v29  ;;  %v1100_v50 = vpack.c.bf16 %v1052_v20, %v1049_v36  ;;  %v2375_v9 = vpack.c.bf16 %v2367_v31, %v2367_v31 }
 0x157   : > { %2896 = vst [vmem:[#allocation23_spill] sm:$0xff] %v2357_v44  ;;  %v535_v13 = vsel %vm532_vm11, %v521_v56, %v523_v17 }
 0x158   : > { %2898 = vst [vmem:[#allocation25_spill] sm:$0xff] %v2361_v21  ;;  %1150 = vmatpush.bf16.msra.mxu1 %v1099_v57  ;;  %1176 = vmatpush.bf16.msra.mxu3 %v1100_v50  ;;  %v873_v27 = vpack.c.bf16 %v536_v2, %v535_v13  ;;  %v1324_v51 = vunpack.c.l.b16 %v2375_v9 }
 0x159   : > { %682 = vst.msk [vmem:[#allocation2 + $0x1d8] sm:$0xff] %vm411_vm4, %v654_v62 }
 0x15a   : > { %v937_v23 = vunpack.c.l.bf16 %v873_v27  ;;  %v938_v25 = vunpack.c.h.bf16 %v873_v27  ;;  %v1299_v54 = vunpack.c.h.b16 %v873_v27 }
 0x15c   : > { %v1018_v20 = vsub.f32 %v535_v13, %v937_v23  ;;  %v1019_v21 = vsub.f32 %v536_v2, %v938_v25 }
 0x15d   : > { %v2369_v1 = vpop.permute.xlu2 %487  ;;  %v529_v4 = vpop.permute.xlu1 %528 }
 0x15e   : > { %513 = vst.msk [vmem:[#allocation2 + $0xd0] sm:$0xff] %vm411_vm4, %v2369_v1  ;;  %v538_v5 = vsel %vm532_vm11, %v529_v4, %v531_v49  ;;  %v527_v17 = vpop.permute.xlu0 %526  ;;  %v1298_v49 = vunpack.c.l.b16 %v873_v27 }
 0x15f   : > { %v537_v36 = vsel %vm532_vm11, %v527_v17, %v529_v4 }
 0x160   : > { %v2371_v14 = vld [vmem:[#allocation2 + $0x1d8] sm:$0xff]  ;;  %v875_v24 = vpack.c.bf16 %v538_v5, %v537_v36 }
 0x161   : > { %v2382_v56 = vpack.c.bf16 %v2371_v14, %v2371_v14 }
 0x162   : > { %v940_v29 = vunpack.c.l.bf16 %v875_v24  ;;  %v941_v32 = vunpack.c.h.bf16 %v875_v24  ;;  %v1302_v30 = vunpack.c.h.b16 %v875_v24  ;;  %v1301_v57 = vunpack.c.l.b16 %v875_v24 }
 0x163   : > { %v1327_v34 = vunpack.c.l.b16 %v2382_v56 }
 0x164   : > { %v1021_v44 = vsub.f32 %v537_v36, %v940_v29  ;;  %v1022_v15 = vsub.f32 %v538_v5, %v941_v32  ;;  %v2389_v4 = vpack.c.b16 %v1302_v30, %v1299_v54  ;;  %v2391_v18 = vpack.c.b16 %v1301_v57, %v1298_v49 }
 0x165   : > { %v2387_v50 = vpack.c.b16 %v1327_v34, %v1324_v51  ;;  %v519_v17 = vpop.permute.xlu2 %518  ;;  %v646_v63 = vpop.permute.xlu1 %645  ;;  %v2397_v2 = vld [vmem:[#allocation2 + $0xd0] sm:$0xff] }
 0x166   : > { %2900 = vst [vmem:[#allocation27_spill] sm:$0xff] %v2389_v4  ;;  %v663_v61 = vsel %vm661_vm10, %v646_v63, %v2338_v48  ;;  %v644_v45 = vpop.permute.xlu0 %643  ;;  %v1084_v13 = vpack.c.bf16 %v1021_v44, %v1018_v20  ;;  %v1085_v27 = vpack.c.bf16 %v1022_v15, %v1019_v21  ;;  %v2405_v34 = vpack.c.bf16 %v2397_v2, %v2397_v2 }
 0x167   : > { %2899 = vst [vmem:[#allocation26_spill] sm:$0xff] %v2387_v50  ;;  %v662_v23 = vsel %vm661_vm10, %v644_v45, %v646_v63 }
 0x168   : > { %2901 = vst [vmem:[#allocation28_spill] sm:$0xff] %v2391_v18  ;;  %1134 = vmatpush.bf16.msra.mxu0 %v1084_v13  ;;  %1160 = vmatpush.bf16.msra.mxu2 %v1085_v27  ;;  %v889_v5 = vpack.c.bf16 %v663_v61, %v662_v23  ;;  %v1294_v32 = vunpack.c.l.b16 %v2405_v34 }
 0x169   : > { %550 = vst.msk [vmem:[#allocation2 + $0xe8] sm:$0xff] %vm411_vm4, %v519_v17 }
 0x16a   : > { %v961_v48 = vunpack.c.l.bf16 %v889_v5  ;;  %v962_v51 = vunpack.c.h.bf16 %v889_v5  ;;  %v1323_v20 = vunpack.c.h.b16 %v889_v5  ;;  %v1322_v57 = vunpack.c.l.b16 %v889_v5 }
 0x16c   : > { %v1043_v18 = vsub.f32 %v663_v61, %v962_v51 }
 0x16d   : > { %v2399_v36 = vpop.permute.xlu2 %610  ;;  %v652_v24 = vpop.permute.xlu1 %651 }
 0x16e   : > { %639 = vst.msk [vmem:[#allocation2 + $0x190] sm:$0xff] %vm411_vm4, %v2399_v36  ;;  %v665_v15 = vsel %vm661_vm10, %v652_v24, %v654_v62  ;;  %v650_v63 = vpop.permute.xlu0 %649  ;;  %v1042_v62 = vsub.f32 %v662_v23, %v961_v48 }
 0x16f   : > { %v664_v45 = vsel %vm661_vm10, %v650_v63, %v652_v24 }
 0x170   : > { %v2401_v25 = vld [vmem:[#allocation2 + $0xe8] sm:$0xff]  ;;  %v891_v44 = vpack.c.bf16 %v665_v15, %v664_v45 }
 0x171   : > { %v2412_v21 = vpack.c.bf16 %v2401_v25, %v2401_v25 }
 0x172   : > { %v964_v54 = vunpack.c.l.bf16 %v891_v44  ;;  %v965_v30 = vunpack.c.h.bf16 %v891_v44  ;;  %v1326_v49 = vunpack.c.h.b16 %v891_v44  ;;  %v1325_v13 = vunpack.c.l.b16 %v891_v44 }
 0x173   : > { %v1297_v29 = vunpack.c.l.b16 %v2412_v21 }
 0x174   : > { %v1045_v50 = vsub.f32 %v664_v45, %v964_v54  ;;  %v1046_v24 = vsub.f32 %v665_v15, %v965_v30  ;;  %v2419_v63 = vpack.c.b16 %v1326_v49, %v1323_v20  ;;  %v2421_v47 = vpack.c.b16 %v1325_v13, %v1322_v57  ;;  %v852_v20 = vld [vmem:[#allocation2 + $0x280] sm:$0xff] }
 0x175   : > { %v2417_v27 = vpack.c.b16 %v1297_v29, %v1294_v32  ;;  %v617_v11 = vpop.permute.xlu2 %616  ;;  %v486_v4 = vpop.permute.xlu1 %485  ;;  %v2427_v61 = vld [vmem:[#allocation2 + $0x190] sm:$0xff]  ;;  %v2461_v13 = vpack.c.bf16 %v852_v20, %v852_v20 }
 0x176   : > { %2903 = vst [vmem:[#allocation30_spill] sm:$0xff] %v2419_v63  ;;  %v495_v8 = vsel %vm489_vm12, %v486_v4, %v2369_v1  ;;  %v484_v12 = vpop.permute.xlu0 %483  ;;  %v1096_v23 = vpack.c.bf16 %v1045_v50, %v1042_v62  ;;  %v1097_v5 = vpack.c.bf16 %v1046_v24, %v1043_v18  ;;  %v2437_v29 = vpack.c.bf16 %v2427_v61, %v2427_v61  ;;  %v2445_v1 = vld [vmem:[%s2822_s1] sm:$0xf] }
 0x177   : > { %2902 = vst [vmem:[#allocation29_spill] sm:$0xff] %v2417_v27  ;;  %v494_v48 = vsel %vm489_vm12, %v484_v12, %v486_v4 }
 0x178   : > { %2904 = vst [vmem:[#allocation31_spill] sm:$0xff] %v2421_v47  ;;  %1151 = vmatpush.bf16.msra.mxu1 %v1096_v23  ;;  %1177 = vmatpush.bf16.msra.mxu3 %v1097_v5  ;;  %v2429_v15 = vpack.c.bf16 %v495_v8, %v494_v48  ;;  %v1318_v49 = vunpack.c.l.b16 %v2437_v29 }
 0x179   : > { %642 = vst.msk [vmem:[#allocation2 + $0x1a8] sm:$0xff] %vm411_vm4, %v617_v11 }
 0x17a   : > { %2905 = vst [vmem:[#allocation32_spill] sm:$0xff] %v2427_v61  ;;  %v931_v54 = vunpack.c.l.bf16 %v2429_v15  ;;  %v932_v30 = vunpack.c.h.bf16 %v2429_v15  ;;  %v1292_v24 = vunpack.c.l.b16 %v2429_v15 }
 0x17b   : > { %2906 = vst [vmem:[#allocation33_spill] sm:$0xff] %v2429_v15 }
 0x17c   : > { %2908 = vst [vmem:[#allocation35_spill] sm:$0xff] %v2437_v29  ;;  %v1013_v27 = vsub.f32 %v495_v8, %v932_v30 }
 0x17d   : > { %v2431_v45 = vpop.permute.xlu2 %475  ;;  %v517_v44 = vpop.permute.xlu1 %516  ;;  %2909 = vst [vmem:[#allocation36_spill] sm:$0xff] %v2445_v1 }
 0x17e   : > { %507 = vst.msk [vmem:[#allocation2 + $0xa0] sm:$0xff] %vm411_vm4, %v2431_v45  ;;  %v534_v12 = vsel %vm532_vm11, %v517_v44, %v519_v17  ;;  %v515_v18 = vpop.permute.xlu0 %514 }
 0x17f   : > { %v533_v4 = vsel %vm532_vm11, %v515_v18, %v517_v44  ;;  %1115 = vst [vmem:[#allocation1] ss:$4 sm:$0xff] %v2445_v1  ;;  %v1012_v44 = vsub.f32 %v494_v48, %v931_v54  ;;  %v987_v48 = vunpack.c.l.bf16 %v2461_v13 }
 0x180   : > { %v2433_v51 = vld [vmem:[#allocation2 + $0x1a8] sm:$0xff]  ;;  %v2452_v32 = vpack.c.bf16 %v534_v12, %v533_v4  ;;  %2911 = vst [vmem:[#allocation38_spill] sm:$0xff] %v2461_v13 }
 0x181   : > { %2907 = vst [vmem:[#allocation34_spill] sm:$0xff] %v2433_v51  ;;  %v2449_v50 = vpack.c.bf16 %v2433_v51, %v2433_v51 }
 0x182   : > { %2910 = vst [vmem:[#allocation37_spill] sm:$0xff] %v2452_v32  ;;  %v934_v62 = vunpack.c.l.bf16 %v2452_v32  ;;  %v935_v57 = vunpack.c.h.bf16 %v2452_v32  ;;  %v1295_v23 = vunpack.c.l.b16 %v2452_v32 }
 0x183   : > { %v1321_v17 = vunpack.c.l.b16 %v2449_v50 }
 0x184   : > { %v1015_v18 = vsub.f32 %v533_v4, %v934_v62  ;;  %v1016_v47 = vsub.f32 %v534_v12, %v935_v57  ;;  %v2469_v58 = vpack.c.b16 %v1295_v23, %v1292_v24  ;;  %v1068_v12 = vsub.f32 %v852_v20, %v987_v48 }
 0x185   : > { %v2465_v5 = vpack.c.b16 %v1321_v17, %v1318_v49  ;;  %v2467_v63 = vpop.permute.xlu2 %481  ;;  %v609_v60 = vpop.permute.xlu1 %608  ;;  %v2477_v8 = vld [vmem:[#allocation2 + $0xa0] sm:$0xff]  ;;  %v984_v49 = vunpack.c.l.bf16 %v2128_v10  ;;  %v981_v23 = vunpack.c.l.bf16 %v2121_v7 }
 0x186   : > { %2913 = vst [vmem:[#allocation40_spill] sm:$0xff] %v2469_v58  ;;  %v622_v61 = vsel %vm618_vm8, %v609_v60, %v2399_v36  ;;  %v607_v15 = vpop.permute.xlu0 %606  ;;  %v1081_v51 = vpack.c.bf16 %v1015_v18, %v1012_v44  ;;  %v1082_v32 = vpack.c.bf16 %v1016_v47, %v1013_v27  ;;  %v2488_v47 = vpack.c.bf16 %v2477_v8, %v2477_v8 }
 0x187   : > { %2912 = vst [vmem:[#allocation39_spill] sm:$0xff] %v2465_v5  ;;  %v621_v17 = vsel %vm618_vm8, %v607_v15, %v609_v60  ;;  %v954_v15 = vunpack.c.l.bf16 %v2174_v43  ;;  %v1065_v43 = vsub.f32 %v2117_v6, %v984_v49 }
 0x188   : > { %510 = vst.msk [vmem:[#allocation2 + $0xb8] sm:$0xff] %vm411_vm4, %v2467_v63  ;;  %1135 = vmatpush.bf16.msra.mxu0 %v1081_v51  ;;  %1161 = vmatpush.bf16.msra.mxu2 %v1082_v32  ;;  %v2479_v4 = vpack.c.bf16 %v622_v61, %v621_v17  ;;  %v1110_v32 = vpack.c.bf16 %v1068_v12, %v1068_v12  ;;  %v1288_v44 = vunpack.c.l.b16 %v2488_v47 }
 0x189   : > { %v1035_v12 = vsub.f32 %v2163_v39, %v954_v15  ;;  %v945_v39 = vunpack.c.l.bf16 %v2258_v42 }
 0x18a   : > { %v955_v62 = vunpack.c.l.bf16 %v2479_v4  ;;  %v956_v57 = vunpack.c.h.bf16 %v2479_v4  ;;  %v1316_v5 = vunpack.c.l.b16 %v2479_v4 }
 0x18c   : > { %v1036_v7 = vsub.f32 %v621_v17, %v955_v62  ;;  %v1037_v49 = vsub.f32 %v622_v61, %v956_v57  ;;  %v1130_v62 = vsel %vm1122_vm6, %v1110_v32, 0  ;;  %v969_v57 = vunpack.c.l.bf16 %v2304_v28 }
 0x18d   : > { %v2481_v54 = vpop.permute.xlu2 %438  ;;  %v615_v30 = vpop.permute.xlu1 %614 }
 0x18e   : > { %2914 = vst [vmem:[#allocation41_spill] sm:$0xff] %v2481_v54  ;;  %v624_v60 = vsel %vm618_vm8, %v615_v30, %v617_v11  ;;  %v613_v27 = vpop.permute.xlu0 %612  ;;  %v951_v11 = vunpack.c.l.bf16 %v2167_v40 }
 0x18f   : > { %v2484_v36 = vld [vmem:[#allocation2 + $0xb8] sm:$0xff]  ;;  %467 = vst.msk [vmem:[#allocation2 + $0x70] sm:$0xff] %vm411_vm4, %v2481_v54  ;;  %v623_v10 = vsel %vm618_vm8, %v613_v27, %v615_v30  ;;  %v978_v30 = vunpack.c.l.bf16 %v2220_v38  ;;  %v948_v27 = vunpack.c.l.bf16 %v2266_v46  ;;  %v975_v38 = vunpack.c.l.bf16 %v2212_v33 }
 0x190   : > { %v2496_v51 = vpack.c.bf16 %v2484_v36, %v2484_v36  ;;  %v2499_v20 = vpack.c.bf16 %v624_v60, %v623_v10  ;;  %v1032_v29 = vsub.f32 %v2153_v35, %v951_v11 }
 0x191   : > { %v1029_v33 = vsub.f32 %v2254_v41, %v948_v27  ;;  %v939_v41 = vunpack.c.l.bf16 %v2344_v37 }
 0x192   : > { %v1291_v24 = vunpack.c.l.b16 %v2496_v51  ;;  %v958_v18 = vunpack.c.l.bf16 %v2499_v20  ;;  %v959_v48 = vunpack.c.h.bf16 %v2499_v20  ;;  %v1319_v40 = vunpack.c.l.b16 %v2499_v20 }
 0x193   : > { %v1092_v42 = vpack.c.bf16 %v1035_v12, %v1032_v29  ;;  %v1056_v29 = vsub.f32 %v2198_v22, %v975_v38  ;;  %v1050_v22 = vsub.f32 %v2290_v19, %v969_v57 }
 0x194   : > { %v2515_v13 = vpack.c.b16 %v1291_v24, %v1288_v44  ;;  %v1039_v6 = vsub.f32 %v623_v10, %v958_v18  ;;  %v1040_v58 = vsub.f32 %v624_v60, %v959_v48  ;;  %v2522_v46 = vpack.c.b16 %v1319_v40, %v1316_v5  ;;  %v2539_v24 = vld.sshfl [vmem:[#allocation1 + $0x8] sm:$0xff pattern:$0x73625140] }
 0x195   : > { %v2517_v54 = vpop.permute.xlu2 %444  ;;  %v474_v1 = vpop.permute.xlu1 %473  ;;  %v972_v10 = vunpack.c.l.bf16 %v2312_v53  ;;  %v942_v5 = vunpack.c.l.bf16 %v2352_v0  ;;  %v1062_v53 = vsub.f32 %v2110_v3, %v981_v23  ;;  %v2544_v0 = vld [vmem:[#allocation2 + $0x40] sm:$0xff]  ;;  %v963_v23 = vunpack.c.l.bf16 %v2375_v9 }
 0x196   : > { %470 = vst.msk [vmem:[#allocation2 + $0x88] sm:$0xff] %vm411_vm4, %v2517_v54  ;;  %v2528_v17 = vsel %vm489_vm12, %v474_v1, %v2431_v45  ;;  %v472_v61 = vpop.permute.xlu0 %471  ;;  %v1093_v60 = vpack.c.bf16 %v1039_v6, %v1036_v7  ;;  %v1094_v15 = vpack.c.bf16 %v1040_v58, %v1037_v49  ;;  %v1059_v45 = vsub.f32 %v2208_v26, %v978_v30  ;;  %v2549_v28 = vld [vmem:[#allocation2 + $0x70] sm:$0xff] }
 0x197   : > { %v2532_v35 = vsel %vm489_vm12, %v472_v61, %v474_v1  ;;  %v1026_v58 = vsub.f32 %v2244_v16, %v945_v39  ;;  %v936_v1 = vunpack.c.l.bf16 %v2412_v21  ;;  %v1053_v26 = vsub.f32 %v2300_v52, %v972_v10 }
 0x198   : > { %1152 = vmatpush.bf16.msra.mxu1 %v1093_v60  ;;  %1178 = vmatpush.bf16.msra.mxu3 %v1094_v15  ;;  %v1107_v11 = vpack.c.bf16 %v1065_v43, %v1062_v53  ;;  %v1023_v44 = vsub.f32 %v2340_v59, %v942_v5  ;;  %v933_v16 = vunpack.c.l.bf16 %v2405_v34  ;;  %v1104_v3 = vpack.c.bf16 %v1059_v45, %v1056_v29  ;;  %v2596_v45 = vld.sshfl [vmem:[#allocation1] sm:$0xff pattern:$0x73625140] }
 0x199   : > { %v1089_v32 = vpack.c.bf16 %v1029_v33, %v1026_v58  ;;  %v2560_v52 = vpack.c.bf16 %v2528_v17, %v2532_v35  ;;  %v2564_v37 = vpack.c.bf16 %v2544_v0, %v2544_v0  ;;  %v1020_v21 = vsub.f32 %v2336_v55, %v939_v41  ;;  %v2915_v41 = vld [vmem:[#allocation35_spill] sm:$0xff] }
 0x19a   : > { %v966_v43 = vunpack.c.l.bf16 %v2382_v56  ;;  %v862_v18 = vpack.c.bf16 %v2549_v28, %v2549_v28  ;;  %v1017_v30 = vsub.f32 %v2401_v25, %v936_v1  ;;  %v1101_v27 = vpack.c.bf16 %v1053_v26, %v1050_v22  ;;  %v2916_v1 = vld [vmem:[#allocation36_spill] sm:$0xff]  ;;  %v2917_v26 = vld [vmem:[#allocation41_spill] sm:$0xff] }
 0x19b   : > { %1829 = vmatmul.msk.bf16.vlgmr.msra.gmra.mxu3 %vm1119_vm13, %v2539_v24  ;;  %1828 = vmatmul.msk.bf16.vlgmr.msra.gmra.mxu1 %vm1119_vm13, %v2539_v24  ;;  %v1086_v9 = vpack.c.bf16 %v1023_v44, %v1020_v21  ;;  %v1014_v56 = vsub.f32 %v2397_v2, %v933_v16  ;;  %v930_v7 = vunpack.c.l.bf16 %v2496_v51  ;;  %v925_v49 = vunpack.c.l.bf16 %v2560_v52  ;;  %1210 = vst [vmem:[#allocation1] ss:$4 sm:$0xff] %v2916_v1 }
 0x19c   : > { %1184 = vmatpush.bf16.msrb.mxu1 %v1092_v42  ;;  %1199 = vmatpush.bf16.msrb.mxu3 %v1130_v62  ;;  %v926_v39 = vunpack.c.h.bf16 %v2560_v52  ;;  %v927_v25 = vunpack.c.l.bf16 %v2488_v47  ;;  %v1047_v61 = vsub.f32 %v2371_v14, %v966_v43  ;;  %v1282_v60 = vunpack.c.l.b16 %v862_v18 }
 0x19d   : > { %v2566_v59 = vpop.permute.xlu2 %432  ;;  %v480_v34 = vpop.permute.xlu1 %479  ;;  %v789_v19 = vld [vmem:[#allocation2 + $0x88] sm:$0xff]  ;;  %v1083_v2 = vpack.c.bf16 %v1017_v30, %v1014_v56  ;;  %v1011_v10 = vsub.f32 %v2484_v36, %v930_v7  ;;  %v960_v33 = vunpack.c.l.bf16 %v2449_v50  ;;  %v1006_v47 = vsub.f32 %v2532_v35, %v925_v49 }
 0x19e   : > { %464 = vst.msk [vmem:[#allocation2 + $0x58] sm:$0xff] %vm411_vm4, %v2566_v59  ;;  %v493_v48 = vsel %vm489_vm12, %v480_v34, %v2467_v63  ;;  %v478_v12 = vpop.permute.xlu0 %477  ;;  %v864_v40 = vpack.c.bf16 %v789_v19, %v789_v19  ;;  %v1044_v63 = vsub.f32 %v2367_v31, %v963_v23  ;;  %v1007_v31 = vsub.f32 %v2528_v17, %v926_v39 }
 0x19f   : > { %v492_v55 = vsel %vm489_vm12, %v478_v12, %v480_v34  ;;  %v1008_v58 = vsub.f32 %v2477_v8, %v927_v25  ;;  %v921_v36 = vunpack.c.l.bf16 %v862_v18  ;;  %v957_v29 = vunpack.c.l.bf16 %v2915_v41  ;;  %v2918_v34 = vld [vmem:[#allocation34_spill] sm:$0xff]  ;;  %v2919_v18 = vld [vmem:[#allocation32_spill] sm:$0xff]  ;;  %v2922_v25 = vld [vmem:[#allocation9_spill] sm:$0xff] }
 0x1a0   : > { %1185 = vmatpush.bf16.msrb.mxu1 %v1089_v32  ;;  %1200 = vmatpush.bf16.msrb.mxu3 %v1107_v11  ;;  %v2581_v6 = vpack.c.bf16 %v493_v48, %v492_v55  ;;  %v1285_v38 = vunpack.c.l.b16 %v864_v40  ;;  %v924_v42 = vunpack.c.l.bf16 %v864_v40  ;;  %v1098_v53 = vpack.c.bf16 %v1047_v61, %v1044_v63  ;;  %v773_v41 = vld [vmem:[#allocation2 + $0x8] sm:$0xff] }
 0x1a1   : > { %v1041_v8 = vsub.f32 %v2918_v34, %v960_v33  ;;  %v1002_v43 = vsub.f32 %v2549_v28, %v921_v36  ;;  %v915_v12 = vunpack.c.l.bf16 %v2564_v37  ;;  %v1276_v30 = vunpack.c.l.b16 %v2564_v37 }
 0x1a2   : > { %v928_v51 = vunpack.c.l.bf16 %v2581_v6  ;;  %v929_v15 = vunpack.c.h.bf16 %v2581_v6  ;;  %v2592_v5 = vpack.c.b16 %v1285_v38, %v1282_v60  ;;  %v1005_v22 = vsub.f32 %v789_v19, %v924_v42  ;;  %v2923_v60 = vld [vmem:[#allocation15_spill] sm:$0xff] }
 0x1a3   : > { %v996_v28 = vsub.f32 %v2544_v0, %v915_v12  ;;  %v1347_v63 = vunpack.c.h.b16 %v2922_v25  ;;  %v1869_v42 = vld [vmem:[#allocation2 + $0x28] sm:$0xff] }
 0x1a4   : > { %1186 = vmatpush.bf16.msrb.mxu1 %v1086_v9  ;;  %1201 = vmatpush.bf16.msrb.mxu3 %v1104_v3  ;;  %v1009_v62 = vsub.f32 %v492_v55, %v928_v51  ;;  %v1010_v14 = vsub.f32 %v493_v48, %v929_v15  ;;  %v1080_v3 = vpack.c.bf16 %v1011_v10, %v1008_v58  ;;  %v2921_v55 = vld [vmem:[#allocation7_spill] sm:$0xff]  ;;  %v1868_v15 = vld [vmem:[#allocation2 + $0x10] sm:$0xff]  ;;  %v2924_v58 = vld [vmem:[#allocation21_spill] sm:$0xff] }
 0x1a5   : > { %v437_v57 = vpop.permute.xlu1 %436  ;;  %v783_v50 = vld [vmem:[#allocation2 + $0x58] sm:$0xff]  ;;  %v1038_v48 = vsub.f32 %v2919_v18, %v957_v29  ;;  %v912_v19 = vunpack.c.l.bf16 %v2921_v55  ;;  %v1077_v9 = vpack.c.bf16 %v1005_v22, %v1002_v43 }
 0x1a6   : > { %v450_v35 = vsel %vm446_vm14, %v437_v57, %v2917_v26  ;;  %v435_v32 = vpop.permute.xlu0 %434  ;;  %v1078_v17 = vpack.c.bf16 %v1009_v62, %v1006_v47  ;;  %v1079_v11 = vpack.c.bf16 %v1010_v14, %v1007_v31  ;;  %v860_v44 = vpack.c.bf16 %v783_v50, %v783_v50  ;;  %v779_v31 = vld [vmem:[#allocation2 + $0x38] sm:$0xff] }
 0x1a7   : > { %v449_v16 = vsel %vm446_vm14, %v435_v32, %v437_v57  ;;  %v1095_v56 = vpack.c.bf16 %v1041_v8, %v1038_v48  ;;  %v993_v33 = vsub.f32 %v1869_v42, %v912_v19  ;;  %v1389_v14 = vpack.c.b16 %v1347_v63, %v1347_v63  ;;  %v772_v57 = vld [vmem:[#allocation2] sm:$0xff]  ;;  %v775_v29 = vld [vmem:[#allocation2 + $0x18] sm:$0xff] }
 0x1a8   : > { %1187 = vmatpush.bf16.msrb.mxu1 %v1083_v2  ;;  %1202 = vmatpush.bf16.msrb.mxu3 %v1101_v27  ;;  %v918_v21 = vunpack.c.l.bf16 %v860_v44  ;;  %v1279_v23 = vunpack.c.l.b16 %v860_v44  ;;  %v2920_v27 = vld [vmem:[#allocation6_spill] sm:$0xff]  ;;  %v2613_v39 = vpack.c.bf16 %v450_v35, %v449_v16  ;;  %v2925_v26 = vld [vmem:[#allocation37_spill] sm:$0xff]  ;;  %v2639_v43 = vpack.c.bf16 %v773_v41, %v772_v57 }
 0x1a9   : > { %1136 = vmatpush.bf16.msra.mxu0 %v1078_v17  ;;  %1162 = vmatpush.bf16.msra.mxu2 %v1079_v11  ;;  %v909_v40 = vunpack.c.l.bf16 %v2920_v27  ;;  %v1296_v32 = vunpack.c.h.b16 %v2925_v26  ;;  %v2633_v22 = vld.sshfl [vmem:[#allocation1] sm:$0xff pattern:$0x73625140]  ;;  %v2636_v8 = vsel %vm1122_vm6, %v1389_v14, 0 }
 0x1aa   : > { %v999_v7 = vsub.f32 %v783_v50, %v918_v21  ;;  %v2611_v49 = vpack.c.b16 %v1279_v23, %v1276_v30  ;;  %v919_v62 = vunpack.c.l.bf16 %v2613_v39  ;;  %v920_v0 = vunpack.c.h.bf16 %v2613_v39  ;;  %v776_v50 = vld [vmem:[#allocation2 + $0x20] sm:$0xff]  ;;  %v2926_v21 = vld [vmem:[#allocation33_spill] sm:$0xff]  ;;  %v2927_v30 = vld [vmem:[#allocation27_spill] sm:$0xff] }
 0x1ab   : > { %v990_v10 = vsub.f32 %v1868_v15, %v909_v40  ;;  %v1293_v23 = vunpack.c.h.b16 %v2926_v21  ;;  %v2641_v18 = vpack.c.bf16 %v776_v50, %v775_v29  ;;  %v2646_v48 = vld.sshfl [vmem:[#allocation1 + $0x8] sm:$0xff pattern:$0x73625140]  ;;  %v908_v63 = vunpack.c.h.bf16 %v2639_v43 }
 0x1ac   : > { %1188 = vmatpush.bf16.msrb.mxu1 %v1080_v3  ;;  %1203 = vmatpush.bf16.msrb.mxu3 %v1098_v53  ;;  %v1074_v51 = vpack.c.bf16 %v999_v7, %v996_v28  ;;  %v1001_v44 = vsub.f32 %v450_v35, %v920_v0  ;;  %v1269_v21 = vunpack.c.h.b16 %v2639_v43 }
 0x1ad   : > { %v443_v38 = vpop.permute.xlu1 %442  ;;  %v1071_v1 = vpack.c.bf16 %v993_v33, %v990_v10  ;;  %v910_v28 = vunpack.c.l.bf16 %v2641_v18  ;;  %v911_v15 = vunpack.c.h.bf16 %v2641_v18  ;;  %v1346_v33 = vunpack.c.l.b16 %v2922_v25 }
 0x1ae   : > { %v452_v37 = vsel %vm446_vm14, %v443_v38, %v2517_v54  ;;  %v441_v61 = vpop.permute.xlu0 %440  ;;  %v778_v54 = vld [vmem:[#allocation2 + $0x30] sm:$0xff]  ;;  %v989_v26 = vsub.f32 %v773_v41, %v908_v63  ;;  %v1286_v63 = vunpack.c.l.b16 %v2560_v52 }
 0x1af   : > { %v451_v2 = vsel %vm446_vm14, %v441_v61, %v443_v38  ;;  %v2631_v17 = vpack.c.bf16 %v779_v31, %v778_v54  ;;  %v907_v38 = vunpack.c.l.bf16 %v2639_v43  ;;  %v1287_v61 = vunpack.c.h.b16 %v2560_v52 }
 0x1b0   : > { %1189 = vmatpush.bf16.msrb.mxu1 %v1077_v9  ;;  %1204 = vmatpush.bf16.msrb.mxu3 %v1095_v56  ;;  %v2621_v47 = vpack.c.bf16 %v452_v37, %v451_v2  ;;  %v2655_v56 = vpack.c.b16 %v1296_v32, %v1293_v23  ;;  %v2929_v32 = vld [vmem:[#allocation18_spill] sm:$0xff] }
 0x1b1   : > { %v913_v19 = vunpack.c.l.bf16 %v2631_v17  ;;  %v914_v9 = vunpack.c.h.bf16 %v2631_v17  ;;  %v1274_v52 = vunpack.c.l.b16 %v2631_v17 }
 0x1b2   : > { %v922_v53 = vunpack.c.l.bf16 %v2621_v47  ;;  %v923_v36 = vunpack.c.h.bf16 %v2621_v47 }
 0x1b3   : > { %1830 = vmatmul.msk.bf16.vlgmr.msrb.gmra.mxu3 %vm1119_vm13, %v2539_v24  ;;  %v1000_v24 = vsub.f32 %v449_v16, %v919_v62  ;;  %v1827_v16 = vld [vmem:[%s2822_s1 + $0x4] sm:$0xf]  ;;  %v994_v10 = vsub.f32 %v778_v54, %v913_v19  ;;  %v995_v42 = vsub.f32 %v779_v31, %v914_v9  ;;  %v1281_v54 = vunpack.c.h.b16 %v2613_v39  ;;  %v2933_v9 = vld [vmem:[#allocation22_spill] sm:$0xff] }
 0x1b4   : > { %1467 = vmatpush.bf16.msra.mxu3 %v2923_v60  ;;  %1190 = vmatpush.bf16.msrb.mxu1 %v1074_v51  ;;  %v1003_v11 = vsub.f32 %v451_v2, %v922_v53  ;;  %v1004_v3 = vsub.f32 %v452_v37, %v923_v36  ;;  %1520 = vst [vmem:[#allocation1] ss:$4 sm:$0xff] %v1827_v16  ;;  %v2928_v37 = vld [vmem:[#allocation12_spill] sm:$0xff]  ;;  %v1284_v53 = vunpack.c.h.b16 %v2621_v47  ;;  %v1272_v16 = vunpack.c.h.b16 %v2641_v18 }
 0x1b5   : > { %v431_v34 = vpop.permute.xlu1 %430  ;;  %v988_v36 = vsub.f32 %v772_v57, %v907_v38  ;;  %v992_v31 = vsub.f32 %v776_v50, %v911_v15  ;;  %v2930_v57 = vld [vmem:[#allocation24_spill] sm:$0xff]  ;;  %v1280_v15 = vunpack.c.l.b16 %v2613_v39 }
 0x1b6   : > { %v448_v35 = vsel %vm446_vm14, %v431_v34, %v2566_v59  ;;  %v429_v12 = vpop.permute.xlu0 %428  ;;  %v1075_v27 = vpack.c.bf16 %v1003_v11, %v1000_v24  ;;  %v1076_v40 = vpack.c.bf16 %v1004_v3, %v1001_v44  ;;  %v1290_v59 = vunpack.c.h.b16 %v2581_v6  ;;  %v2937_v38 = vld [vmem:[#allocation40_spill] sm:$0xff] }
 0x1b7   : > { %v447_v55 = vsel %vm446_vm14, %v429_v12, %v431_v34  ;;  %v2677_v25 = vpack.c.b16 %v1284_v53, %v1281_v54  ;;  %v1388_v44 = vpack.c.b16 %v1346_v33, %v1346_v33  ;;  %v1275_v34 = vunpack.c.h.b16 %v2631_v17  ;;  %v2931_v12 = vld [vmem:[#allocation16_spill] sm:$0xff]  ;;  %v2942_v53 = vld [vmem:[#allocation17_spill] sm:$0xff]  ;;  %v2948_v54 = vld [vmem:[#allocation26_spill] sm:$0xff] }
 0x1b8   : > { %1468 = vmatpush.bf16.msra.mxu3 %v2924_v58  ;;  %1191 = vmatpush.bf16.msrb.mxu1 %v1071_v1  ;;  %v2658_v7 = vpack.c.bf16 %v448_v35, %v447_v55  ;;  %v2671_v62 = vpack.c.b16 %v1290_v59, %v1287_v61  ;;  %v991_v1 = vsub.f32 %v775_v29, %v910_v28  ;;  %v2936_v59 = vld [vmem:[#allocation19_spill] sm:$0xff]  ;;  %v2938_v28 = vld [vmem:[#allocation25_spill] sm:$0xff] }
 0x1b9   : > { %1137 = vmatpush.bf16.msra.mxu0 %v1075_v27  ;;  %1163 = vmatpush.bf16.msra.mxu2 %v1076_v40  ;;  %v1070_v29 = vpack.c.bf16 %v992_v31, %v989_v26  ;;  %v1433_v50 = vsel %vm1122_vm6, %v1388_v44, 0  ;;  %v2932_v27 = vld [vmem:[#allocation30_spill] sm:$0xff]  ;;  %v1317_v40 = vunpack.c.h.b16 %v2479_v4  ;;  %v2935_v4 = vld [vmem:[#allocation28_spill] sm:$0xff]  ;;  %v2950_v44 = vld [vmem:[#allocation39_spill] sm:$0xff] }
 0x1ba   : > { %v916_v2 = vunpack.c.l.bf16 %v2658_v7  ;;  %v917_v51 = vunpack.c.h.bf16 %v2658_v7  ;;  %v1278_v3 = vunpack.c.h.b16 %v2658_v7  ;;  %v1069_v41 = vpack.c.bf16 %v991_v1, %v988_v36  ;;  %v2949_v31 = vld [vmem:[#allocation8_spill] sm:$0xff] }
 0x1bb   : > { %1192 = vmatmul.bf16.vlgmr.msrb.gmra.mxu1 %v2596_v45  ;;  %v1522_v36 = vld.sshfl [vmem:[#allocation1 + $0x8] sm:$0xff pattern:$0x73625140]  ;;  %v1521_v26 = vld.sshfl [vmem:[#allocation1] sm:$0xff pattern:$0x73625140] }
 0x1bc   : > { %1469 = vmatpush.bf16.msra.mxu3 %v2927_v30  ;;  %1482 = vmatpush.bf16.msra.mxu1 %v2636_v8  ;;  %v997_v0 = vsub.f32 %v447_v55, %v916_v2  ;;  %v998_v14 = vsub.f32 %v448_v35, %v917_v51  ;;  %v2685_v23 = vpack.c.b16 %v1278_v3, %v1275_v34  ;;  %v1320_v35 = vunpack.c.h.b16 %v2499_v20  ;;  %v2934_v20 = vld [vmem:[#allocation13_spill] sm:$0xff]  ;;  %v2939_v51 = vld [vmem:[#allocation31_spill] sm:$0xff] }
 0x1bd   : > { %v2695_v55 = vpack.c.b16 %v1272_v16, %v1269_v21  ;;  %v1283_v2 = vunpack.c.l.b16 %v2621_v47  ;;  %v2941_v47 = vld [vmem:[#allocation11_spill] sm:$0xff] }
 0x1be   : > { %v1072_v24 = vpack.c.bf16 %v997_v0, %v994_v10  ;;  %v1073_v11 = vpack.c.bf16 %v998_v14, %v995_v42  ;;  %v2697_v19 = vpack.c.b16 %v1320_v35, %v1317_v40  ;;  %v1277_v10 = vunpack.c.l.b16 %v2658_v7  ;;  %v2940_v42 = vld [vmem:[#allocation38_spill] sm:$0xff] }
 0x1bf   : > { %v1348_v33 = vunpack.c.l.b16 %v2940_v42  ;;  %v1268_v0 = vunpack.c.l.b16 %v2639_v43  ;;  %v1271_v14 = vunpack.c.l.b16 %v2641_v18  ;;  %v2943_v43 = vld [vmem:[#allocation23_spill] sm:$0xff]  ;;  %v2944_v18 = vld [vmem:[#allocation29_spill] sm:$0xff] }
 0x1c0   : > { %1470 = vmatpush.bf16.msra.mxu3 %v2655_v56  ;;  %1483 = vmatpush.bf16.msra.mxu1 %v2928_v37  ;;  %v1352_v39 = vpack.c.b16 %v1277_v10, %v1274_v52 }
 0x1c1   : > { %1138 = vmatpush.bf16.msra.mxu0 %v1072_v24  ;;  %1164 = vmatpush.bf16.msra.mxu2 %v1073_v11  ;;  %v1390_v7 = vpack.c.b16 %v1348_v33, %v1348_v33  ;;  %v1349_v17 = vpack.c.b16 %v1271_v14, %v1268_v0  ;;  %v2946_v24 = vld [vmem:[#allocation14_spill] sm:$0xff]  ;;  %v2947_v11 = vld [vmem:[#allocation20_spill] sm:$0xff] }
 0x1c3   : > { %v1439_v1 = vsel %vm1122_vm6, %v1390_v7, 0 }
 0x1c4   : > { %1471 = vmatpush.bf16.msra.mxu3 %v2671_v62  ;;  %1484 = vmatpush.bf16.msra.mxu1 %v2929_v32 }
 0x1c5   : > { %1139 = vmatpush.bf16.msra.mxu0 %v1069_v41  ;;  %1165 = vmatpush.bf16.msra.mxu2 %v1070_v29 }
 0x1c8   : > { %1472 = vmatpush.bf16.msra.mxu3 %v2677_v25  ;;  %1485 = vmatpush.bf16.msra.mxu1 %v2930_v57 }
 0x1c9   : > { %1441 = vmatpush.bf16.msrb.mxu0 %v2931_v12  ;;  %1456 = vmatpush.bf16.msrb.mxu2 %v1433_v50 }
 0x1ca   : > { %1140 = vmatmul.bf16.vlgmr.msra.gmra.mxu0 %v2596_v45  ;;  %1166 = vmatmul.bf16.vlgmr.msra.gmra.mxu2 %v2596_v45  ;;  %v1289_v45 = vunpack.c.l.b16 %v2581_v6  ;;  %v1355_v6 = vpack.c.b16 %v1283_v2, %v1280_v15 }
 0x1cc   : > { %1473 = vmatpush.bf16.msra.mxu3 %v2685_v23  ;;  %1486 = vmatpush.bf16.msra.mxu1 %v2932_v27  ;;  %v1358_v61 = vpack.c.b16 %v1289_v45, %v1286_v63 }
 0x1cd   : > { %1442 = vmatpush.bf16.msrb.mxu0 %v2933_v9  ;;  %1457 = vmatpush.bf16.msrb.mxu2 %v2934_v20 }
 0x1d0   : > { %1474 = vmatpush.bf16.msra.mxu3 %v2695_v55  ;;  %1487 = vmatpush.bf16.msra.mxu1 %v2697_v19 }
 0x1d1   : > { %1443 = vmatpush.bf16.msrb.mxu0 %v2935_v4  ;;  %1458 = vmatpush.bf16.msrb.mxu2 %v2936_v59 }
 0x1d3   : > { %1475 = vmatmul.bf16.vlgmr.msra.gmra.mxu3 %v2633_v22  ;;  %1832 = vmatmul.msk.bf16.vlgmr.msra.gmra.mxu1 %vm1119_vm13, %v2646_v48 }
 0x1d4   : > { %1526 = vmatpush.bf16.msrb.mxu1 %v2931_v12  ;;  %1541 = vmatpush.bf16.msrb.mxu3 %v1433_v50 }
 0x1d5   : > { %1444 = vmatpush.bf16.msrb.mxu0 %v2937_v38  ;;  %1459 = vmatpush.bf16.msrb.mxu2 %v2938_v28 }
 0x1d8   : > { %1527 = vmatpush.bf16.msrb.mxu1 %v2933_v9  ;;  %1542 = vmatpush.bf16.msrb.mxu3 %v2934_v20 }
 0x1d9   : > { %1445 = vmatpush.bf16.msrb.mxu0 %v1358_v61  ;;  %1460 = vmatpush.bf16.msrb.mxu2 %v2939_v51 }
 0x1dc   : > { %1528 = vmatpush.bf16.msrb.mxu1 %v2935_v4  ;;  %1543 = vmatpush.bf16.msrb.mxu3 %v2936_v59  ;;  %v1611_v4 = vpop.permute.xlu0 %1610 }
 0x1dd   : > { %1446 = vmatpush.bf16.msrb.mxu0 %v1355_v6  ;;  %1461 = vmatpush.bf16.msrb.mxu2 %v2522_v46 }
 0x1e0   : > { %1529 = vmatpush.bf16.msrb.mxu1 %v2937_v38  ;;  %1544 = vmatpush.bf16.msrb.mxu3 %v2938_v28 }
 0x1e1   : > { %1493 = vmatpush.bf16.msra.mxu2 %v2941_v47  ;;  %1447 = vmatpush.bf16.msrb.mxu0 %v1352_v39 }
 0x1e2   : > { %1831 = vmatmul.msk.bf16.vlgmr.msrb.gmra.mxu2 %vm1119_vm13, %v2646_v48 }
 0x1e4   : > { %1530 = vmatpush.bf16.msrb.mxu1 %v1358_v61  ;;  %1545 = vmatpush.bf16.msrb.mxu3 %v2939_v51 }
 0x1e5   : > { %1494 = vmatpush.bf16.msra.mxu2 %v2942_v53  ;;  %1448 = vmatpush.bf16.msrb.mxu0 %v1349_v17 }
 0x1e8   : > { %1531 = vmatpush.bf16.msrb.mxu1 %v1355_v6  ;;  %1546 = vmatpush.bf16.msrb.mxu3 %v2522_v46  ;;  %v2945_v46 = vld [vmem:[#allocation10_spill] sm:$0xff] }
 0x1e9   : > { %1495 = vmatpush.bf16.msra.mxu2 %v2943_v43  ;;  %1508 = vmatpush.bf16.msra.mxu0 %v1439_v1 }
 0x1ea   : > { %1449 = vmatmul.bf16.vlgmr.msrb.gmra.mxu0 %v2633_v22 }
 0x1eb   : > { %1834 = vmatmul.msk.bf16.vlgmr.msrb.gmra.mxu3 %vm1119_vm13, %v1522_v36 }
 0x1ec   : > { %1578 = vmatpush.bf16.msra.mxu3 %v2941_v47  ;;  %1532 = vmatpush.bf16.msrb.mxu1 %v1352_v39 }
 0x1ed   : > { %1496 = vmatpush.bf16.msra.mxu2 %v2944_v18  ;;  %1509 = vmatpush.bf16.msra.mxu0 %v2945_v46 }
 0x1f0   : > { %1579 = vmatpush.bf16.msra.mxu3 %v2942_v53  ;;  %1533 = vmatpush.bf16.msrb.mxu1 %v1349_v17 }
 0x1f1   : > { %1497 = vmatpush.bf16.msra.mxu2 %v2515_v13  ;;  %1510 = vmatpush.bf16.msra.mxu0 %v2946_v24 }
 0x1f3   : > { %1534 = vmatmul.bf16.vlgmr.msrb.gmra.mxu1 %v1521_v26 }
 0x1f4   : > { %1580 = vmatpush.bf16.msra.mxu3 %v2943_v43  ;;  %1593 = vmatpush.bf16.msra.mxu1 %v1439_v1 }
 0x1f5   : > { %1498 = vmatpush.bf16.msra.mxu2 %v2592_v5  ;;  %1511 = vmatpush.bf16.msra.mxu0 %v2947_v11 }
 0x1f8   : > { %1581 = vmatpush.bf16.msra.mxu3 %v2944_v18  ;;  %1594 = vmatpush.bf16.msra.mxu1 %v2945_v46 }
 0x1f9   : > { %1499 = vmatpush.bf16.msra.mxu2 %v2611_v49  ;;  %1512 = vmatpush.bf16.msra.mxu0 %v2948_v54 }
 0x1fc   : > { %1582 = vmatpush.bf16.msra.mxu3 %v2515_v13  ;;  %1595 = vmatpush.bf16.msra.mxu1 %v2946_v24 }
 0x1fd   : > { %1500 = vmatpush.bf16.msra.mxu2 %v2949_v31  ;;  %1513 = vmatpush.bf16.msra.mxu0 %v2950_v44 }
 0x200   : > { %1583 = vmatpush.bf16.msra.mxu3 %v2592_v5  ;;  %1596 = vmatpush.bf16.msra.mxu1 %v2947_v11 }
 0x201   : > { %1552 = vmatpush.bf16.msrb.mxu0 %v2923_v60  ;;  %1567 = vmatpush.bf16.msrb.mxu2 %v2636_v8 }
 0x202   : > { %1501 = vmatmul.bf16.vlgmr.msra.gmra.mxu2 %v2633_v22  ;;  %1833 = vmatmul.msk.bf16.vlgmr.msra.gmra.mxu0 %vm1119_vm13, %v2646_v48 }
 0x204   : > { %1584 = vmatpush.bf16.msra.mxu3 %v2611_v49  ;;  %1597 = vmatpush.bf16.msra.mxu1 %v2948_v54 }
 0x205   : > { %1553 = vmatpush.bf16.msrb.mxu0 %v2924_v58  ;;  %1568 = vmatpush.bf16.msrb.mxu2 %v2928_v37 }
 0x208   : > { %1585 = vmatpush.bf16.msra.mxu3 %v2949_v31  ;;  %1598 = vmatpush.bf16.msra.mxu1 %v2950_v44 }
 0x209   : > { %1554 = vmatpush.bf16.msrb.mxu0 %v2927_v30  ;;  %1569 = vmatpush.bf16.msrb.mxu2 %v2929_v32 }
 0x20b   : > { %1586 = vmatmul.bf16.vlgmr.msra.gmra.mxu3 %v1521_v26  ;;  %1836 = vmatmul.msk.bf16.vlgmr.msra.gmra.mxu1 %vm1119_vm13, %v1522_v36 }
 0x20d   : > { %1555 = vmatpush.bf16.msrb.mxu0 %v2655_v56  ;;  %1570 = vmatpush.bf16.msrb.mxu2 %v2930_v57 }
 0x211   : > { %1556 = vmatpush.bf16.msrb.mxu0 %v2671_v62  ;;  %1571 = vmatpush.bf16.msrb.mxu2 %v2932_v27 }
 0x215   : > { %1557 = vmatpush.bf16.msrb.mxu0 %v2677_v25  ;;  %1572 = vmatpush.bf16.msrb.mxu2 %v2697_v19 }
 0x218   : > { %1835 = vmatmul.msk.bf16.vlgmr.msrb.gmra.mxu2 %vm1119_vm13, %v1522_v36  ;;  %v1154_v13 = vpop.f32.mrf.mxu1 }
 0x219   : > { %1558 = vmatpush.bf16.msrb.mxu0 %v2685_v23 }
 0x21d   : > { %1559 = vmatpush.bf16.msrb.mxu0 %v2695_v55 }
 0x21e   : > { %v1180_v5 = vpop.f32.mrf.mxu3 }
 0x220   : > { %1560 = vmatmul.bf16.vlgmr.msrb.gmra.mxu0 %v1521_v26  ;;  %v1156_v49 = vpop.f32.mrf.mxu1 }
 0x226   : > { %v1182_v60 = vpop.f32.mrf.mxu3 }
 0x236   : > { %v1206_v58 = vpop.f32.mrf.mxu3 }
 0x238   : > { %v1193_v22 = vpop.f32.mrf.mxu1 }
 0x239   : > { %v1207_v8 = vadd.f32 %v1206_v58, %v1193_v22 }
 0x23e   : > { %v1208_v48 = vpop.f32.mrf.mxu3 }
 0x240   : > { %v1195_v30 = vpop.f32.mrf.mxu1 }
 0x247   : > { %v1141_v56 = vpop.f32.mrf.mxu0 }
 0x248   : > { %v1155_v16 = vadd.f32 %v1154_v13, %v1141_v56 }
 0x24d   : > { %v1167_v37 = vpop.f32.mrf.mxu2 }
 0x24e   : > { %v1181_v62 = vadd.f32 %v1180_v5, %v1167_v37 }
 0x24f   : > { %v1143_v25 = vpop.f32.mrf.mxu0 }
 0x250   : > { %v1489_v32 = vpop.f32.mrf.mxu1 }
 0x255   : > { %v1169_v41 = vpop.f32.mrf.mxu2 }
 0x256   : > { %v1476_v3 = vpop.f32.mrf.mxu3 }
 0x257   : > { %v1477_v57 = vadd.f32 %v1476_v3, %v1181_v62 }
 0x258   : > { %v1491_v29 = vpop.f32.mrf.mxu1 }
 0x259   : > { %v1490_v34 = vadd.f32 %v1489_v32, %v1477_v57 }
 0x25e   : > { %v1478_v21 = vpop.f32.mrf.mxu3 }
 0x265   : > { %v1463_v50 = vpop.f32.mrf.mxu2 }
 0x267   : > { %v1450_v23 = vpop.f32.mrf.mxu0 }
 0x268   : > { %v1451_v35 = vadd.f32 %v1450_v23, %v1155_v16 }
 0x26a   : > { %v1464_v55 = vadd.f32 %v1463_v50, %v1451_v35 }
 0x26d   : > { %v1465_v27 = vpop.f32.mrf.mxu2 }
 0x26e   : > { %v1548_v12 = vpop.f32.mrf.mxu3 }
 0x26f   : > { %v1452_v9 = vpop.f32.mrf.mxu0 }
 0x270   : > { %v1535_v40 = vpop.f32.mrf.mxu1 }
 0x271   : > { %v1549_v19 = vadd.f32 %v1548_v12, %v1535_v40 }
 0x273   : > { %v1604_v20 = vadd.f32 %v1549_v19, %v1464_v55 }
 0x275   : > { %v1613_v59 = vadd.f32 %v1611_v4, %v1604_v20 }
 0x276   : > { %v1550_v45 = vpop.f32.mrf.mxu3 }
 0x277   : > { %v1616_v38 = vmul.f32 0.5, %v1613_v59 }
 0x278   : > { %v1537_v28 = vpop.f32.mrf.mxu1 }
 0x279   : > { %1862 = vtanh.f32 %v1616_v38 }
 0x27f   : > { %v1515_v63 = vpop.f32.mrf.mxu0  ;;  %v1863_v61 = vpop.eup %1862 }
 0x280   : > { %v1622_v2 = vmul.f32 0.5, %v1863_v61 }
 0x282   : > { %v1625_v51 = vadd.f32 0.5, %v1622_v2 }
 0x284   : > { %1637 = vrot.lane.b32.xlu1 %v1625_v51, %s1887_s19 }
 0x285   : > { %v1502_v15 = vpop.f32.mrf.mxu2 }
 0x286   : > { %v1503_v52 = vadd.f32 %v1502_v15, %v1207_v8 }
 0x287   : > { %v1517_v10 = vpop.f32.mrf.mxu0 }
 0x288   : > { %v1600_v6 = vpop.f32.mrf.mxu1  ;;  %v1516_v33 = vadd.f32 %v1515_v63, %v1503_v52 }
 0x28d   : > { %v1504_v39 = vpop.f32.mrf.mxu2 }
 0x28e   : > { %v1587_v42 = vpop.f32.mrf.mxu3 }
 0x28f   : > { %v1601_v47 = vadd.f32 %v1600_v6, %v1587_v42 }
 0x290   : > { %v1602_v0 = vpop.f32.mrf.mxu1 }
 0x291   : > { %v1606_v14 = vadd.f32 %v1601_v47, %v1516_v33 }
 0x293   : > { %v1615_v7 = vadd.f32 %v1611_v4, %v1606_v14 }
 0x295   : > { %v1618_v53 = vmul.f32 0.5, %v1615_v7 }
 0x296   : > { %v1589_v17 = vpop.f32.mrf.mxu3 }
 0x297   : > { %1864 = vtanh.f32 %v1618_v53 }
 0x29b   : > { %v1574_v36 = vpop.f32.mrf.mxu2 }
 0x29d   : > { %v1865_v1 = vpop.eup %1864  ;;  %v1561_v43 = vpop.f32.mrf.mxu0 }
 0x29e   : > { %v1624_v18 = vmul.f32 0.5, %v1865_v1  ;;  %v1575_v46 = vadd.f32 %v1574_v36, %v1561_v43 }
 0x2a0   : > { %v1627_v26 = vadd.f32 0.5, %v1624_v18  ;;  %v1605_v24 = vadd.f32 %v1575_v46, %v1490_v34 }
 0x2a2   : > { %1641 = vrot.lane.b32.xlu0 %v1627_v26, %s1887_s19  ;;  %1635 = vst.msk [vmem:[%s318_s23 + $0x8] sm:$0x7] %vm1634_vm15, %v1627_v26  ;;  %v1614_v11 = vadd.f32 %v1611_v4, %v1605_v24 }
 0x2a3   : > { %v1576_v54 = vpop.f32.mrf.mxu2 }
 0x2a4   : > { %v1617_v31 = vmul.f32 0.5, %v1614_v11 }
 0x2a5   : > { %v1563_v44 = vpop.f32.mrf.mxu0 }
 0x2a6   : > { %1866 = vtanh.f32 %v1617_v31 }
 0x2ac   : > { %v1867_v13 = vpop.eup %1866 }
 0x2ad   : > { %v1623_v5 = vmul.f32 0.5, %v1867_v13 }
 0x2af   : > { %v1626_v49 = vadd.f32 0.5, %v1623_v5 }
 0x2b1   : > { %1639 = vrot.lane.b32.xlu2 %v1626_v49, %s1887_s19  ;;  %v1630_v60 = vrot.slane %v1626_v49, 4 }
 0x2b3   : > { %v1631_v58 = vsel %vm1122_vm6, %v1625_v51, %v1630_v60 }
 0x2b4   : > { %1633 = vst [vmem:[%s318_s23] sm:$0x77] %v1631_v58 }
 0x2f6   : > { %v1638_v22 = vpop.permute.xlu1 %1637 }
 0x2f7   : > { %v1649_v48 = vsel %vm1976_vm1, %v1638_v22, 0.0  ;;  %vm1666_vm1 = vcmask 1042432  }
 0x2f8   : > { %1655 = vrot.lane.b32.xlu1 %v1649_v48, %s1880_s26  ;;  %v1676_v30 = vmul.f32 %v1649_v48, %v1649_v48 }
 0x300   : > { %1682 = vrot.lane.b32.xlu1 %v1676_v30, %s1880_s26 }
 0x30b   : > { %v1640_v56 = vpop.permute.xlu2 %1639 }
 0x30c   : > { %v1644_v37 = vsel %vm1643_vm0, %v1638_v22, %v1640_v56 }
 0x30d   : > { %v1650_v32 = vsel %vm1980_vm2, %v1644_v37, 0.0  ;;  %vm1674_vm2 = vcmask 2048  }
 0x30e   : > { %1657 = vrot.lane.b32.xlu2 %v1650_v32, %s1880_s26  ;;  %v1677_v3 = vmul.f32 %v1650_v32, %v1650_v32 }
 0x314   : > { %v1642_v25 = vpop.permute.xlu0 %1641 }
 0x315   : > { %v1645_v57 = vsel %vm1643_vm0, %v1640_v56, %v1642_v25 }
 0x316   : > { %v1651_v29 = vsel %vm1984_vm3, %v1645_v57, 0.0  ;;  %1684 = vrot.lane.b32.xlu2 %v1677_v3, %s1880_s26 }
 0x317   : > { %1659 = vrot.lane.b32.xlu0 %v1651_v29, %s1880_s26  ;;  %v1678_v34 = vmul.f32 %v1651_v29, %v1651_v29 }
 0x31f   : > { %1686 = vrot.lane.b32.xlu0 %v1678_v34, %s1880_s26 }
 0x368   : > { %v1658_v50 = vpop.permute.xlu2 %1657 }
 0x36a   : > { %v1656_v21 = vpop.permute.xlu1 %1655 }
 0x36b   : > { %v1661_v23 = vsel %vm575_vm7, %v1656_v21, %v1658_v50 }
 0x36c   : > { %v1667_v12 = vsel %vm1666_vm1, %v1661_v23, 0.0 }
 0x370   : > { %v1685_v20 = vpop.permute.xlu2 %1684 }
 0x372   : > { %v1683_v55 = vpop.permute.xlu1 %1682 }
 0x373   : > { %v1688_v4 = vsel %vm575_vm7, %v1683_v55, %v1685_v20 }
 0x374   : > { %v1693_v38 = vsel %vm1666_vm1, %v1688_v4, 0.0 }
 0x389   : > { %v1660_v16 = vpop.permute.xlu0 %1659 }
 0x38a   : > { %v1662_v35 = vsel %vm575_vm7, %v1658_v50, %v1660_v16  ;;  %v1670_v19 = vsel %vm1634_vm15, %v1660_v16, 0.0 }
 0x38b   : > { %v1668_v27 = vsel %vm1666_vm1, %v1662_v35, 0.0 }
 0x38c   : > { %v1669_v40 = vadd.f32 %v1668_v27, %v1667_v12 }
 0x38e   : > { %v1671_v9 = vadd.f32 %v1670_v19, %v1669_v40 }
 0x390   : > { %1672 = vadd.xlane.f32.xlu1 %v1671_v9 }
 0x391   : > { %v1687_v59 = vpop.permute.xlu0 %1686 }
 0x392   : > { %v1689_v45 = vsel %vm575_vm7, %v1685_v20, %v1687_v59  ;;  %v1696_v61 = vsel %vm1634_vm15, %v1687_v59, 0.0 }
 0x393   : > { %v1694_v28 = vsel %vm1666_vm1, %v1689_v45, 0.0 }
 0x394   : > { %v1695_v63 = vadd.f32 %v1694_v28, %v1693_v38 }
 0x396   : > { %v1697_v2 = vadd.f32 %v1696_v61, %v1695_v63 }
 0x398   : > { %1698 = vadd.xlane.f32.xlu2 %v1697_v2 }
 0x403   : > { %v1673_v51 = vpop.xlane.xlu1 %1672 }
 0x404   : > { %1675 = vst.msk [vmem:[%s322_s29] sm:$0x7] %vm1674_vm2, %v1673_v51 }
 0x40b   : > { %v1699_v15 = vpop.xlane.xlu2 %1698 }
 0x40c   : > { %1700 = vst.msk [vmem:[%s326_s10] sm:$0x7] %vm1674_vm2, %v1699_v15 }
 0x40d PF: > { %s19_s27 = sadd.s32 1, %s1876_s27  }
 0x40e   : > { %p16_p4 = scmp.ge.s32.totalorder %s19_s27, 4  }
 0x410   :  { %18 = sbr.rel (!%p16_p4) target bundleno = 1 (0x1), region = 99 }

</bundles_post_ra>
